<compile_context>
chip_gen: v6e
topology: v6e:2x2x1
jax: 0.10.0
libtpu: 0.0.40
codegen_flags: <defaults>
</compile_context>

<pallas_src>
import functools

import jax
import jax.numpy as jnp
from jax.experimental import pallas as pl
from jax.experimental.pallas import tpu as pltpu

_VMEM_LIMIT = 32 * 1024 * 1024
_EPS = 1e-5
_SLOPE = 0.2


def _compiler_params(dims):
    return pltpu.CompilerParams(dimension_semantics=dims,
                                vmem_limit_bytes=_VMEM_LIMIT)


def _leaky(y):
    return jnp.where(y > 0, y, _SLOPE * y)


def _pick_rows(m_ps, unit, target):
    """Largest row tile TM s.t. TM | m_ps, TM % unit == 0, (TM % 8 == 0 or TM == m_ps)."""
    cands = [d for d in range(unit, m_ps + 1, unit)
             if m_ps % d == 0 and (d % 8 == 0 or d == m_ps)]
    small = [d for d in cands if d <= target]
    return max(small) if small else min(cands)


# -----------------------------------------------------------------------------
# Fused single-tile kernels (fast path): whole sample in one M tile.
# -----------------------------------------------------------------------------
def _mm_fused_kernel(p_ref, w_ref, b_ref, y_ref, *, norm, act, inv_count):
    """Stride-2 (wrapper im2col): conv (+InstanceNorm) (+LeakyReLU), one shot."""
    y = jnp.dot(p_ref[0], w_ref[...], preferred_element_type=jnp.float32)
    y = y + b_ref[...]
    if norm:
        mean = jnp.sum(y, axis=0, keepdims=True) * inv_count
        ex2 = jnp.sum(y * y, axis=0, keepdims=True) * inv_count
        var = jnp.maximum(ex2 - mean * mean, 0.0)
        y = (y - mean) * jax.lax.rsqrt(var + _EPS)
    if act:
        y = _leaky(y)
    y_ref[0] = y.astype(y_ref.dtype)


def _s1_fused_kernel(*refs, norm, act, tm, wp, inv_count):
    """Stride-1 (in-kernel im2col): 9 contiguous-slice matmuls, fully fused."""
    if norm:
        x_ref, w_ref, b_ref, mask_ref, y_ref = refs
    else:
        x_ref, w_ref, b_ref, y_ref = refs
    cout = w_ref.shape[-1]
    acc = jnp.zeros((tm, cout), jnp.float32)
    for i in range(3):
        for j in range(3):
            xs = x_ref[0, pl.ds(i * wp + j, tm), :]          # (tm, Cin) bf16
            acc = acc + jnp.dot(xs, w_ref[i * 3 + j],
                                preferred_element_type=jnp.float32)
    y = acc + b_ref[...]
    if norm:
        ym = y * mask_ref[...]                               # zero garbage cols
        mean = jnp.sum(ym, axis=0, keepdims=True) * inv_count
        ex2 = jnp.sum(ym * y, axis=0, keepdims=True) * inv_count
        var = jnp.maximum(ex2 - mean * mean, 0.0)
        y = (y - mean) * jax.lax.rsqrt(var + _EPS)
    if act:
        y = _leaky(y)
    y_ref[0] = y.astype(y_ref.dtype)


# -----------------------------------------------------------------------------
# Tiled kernels (fallback for large spatial sizes): pass 1 of two-pass scheme.
# If norm: accumulate per-(sample, channel) sum / sumsq across the M axis.
# -----------------------------------------------------------------------------
def _matmul_kernel(*refs, norm, act):
    if norm:
        p_ref, w_ref, b_ref, y_ref, s1_ref, s2_ref = refs
    else:
        p_ref, w_ref, b_ref, y_ref = refs

    y = jnp.dot(p_ref[0], w_ref[...], preferred_element_type=jnp.float32)
    y = y + b_ref[...]
    if act and not norm:
        y = _leaky(y)
    y_ref[0] = y.astype(y_ref.dtype)

    if norm:
        m_idx = pl.program_id(1)
        s1 = jnp.sum(y, axis=0, keepdims=True)               # (1, Cout)
        s2 = jnp.sum(y * y, axis=0, keepdims=True)

        @pl.when(m_idx == 0)
        def _():
            s1_ref[0] = s1
            s2_ref[0] = s2

        @pl.when(m_idx > 0)
        def _():
            s1_ref[0] = s1_ref[0] + s1
            s2_ref[0] = s2_ref[0] + s2


def _conv_s1_kernel(*refs, norm, act, tm, wp):
    if norm:
        x_ref, w_ref, b_ref, mask_ref, y_ref, s1_ref, s2_ref = refs
    else:
        x_ref, w_ref, b_ref, y_ref = refs

    m_idx = pl.program_id(1)
    base = pl.multiple_of(m_idx * tm, tm)
    cout = w_ref.shape[-1]

    acc = jnp.zeros((tm, cout), jnp.float32)
    for i in range(3):
        for j in range(3):
            xs = x_ref[0, pl.ds(base + i * wp + j, tm), :]   # (tm, Cin) bf16
            acc = acc + jnp.dot(xs, w_ref[i * 3 + j],
                                preferred_element_type=jnp.float32)
    y = acc + b_ref[...]
    if act and not norm:
        y = _leaky(y)
    y_ref[0] = y.astype(y_ref.dtype)

    if norm:
        ym = y * mask_ref[...]                               # zero garbage cols
        s1 = jnp.sum(ym, axis=0, keepdims=True)
        s2 = jnp.sum(ym * y, axis=0, keepdims=True)

        @pl.when(m_idx == 0)
        def _():
            s1_ref[0] = s1
            s2_ref[0] = s2

        @pl.when(m_idx > 0)
        def _():
            s1_ref[0] = s1_ref[0] + s1
            s2_ref[0] = s2_ref[0] + s2


# -----------------------------------------------------------------------------
# Pass 2 (fallback only): apply InstanceNorm from accumulated stats + LeakyReLU.
# -----------------------------------------------------------------------------
def _norm_act_kernel(y_ref, s1_ref, s2_ref, o_ref, *, inv_count, act):
    mean = s1_ref[0] * inv_count                             # (1, C)
    ex2 = s2_ref[0] * inv_count
    var = jnp.maximum(ex2 - mean * mean, 0.0)
    inv = jax.lax.rsqrt(var + _EPS)
    y = (y_ref[0] - mean) * inv
    if act:
        y = _leaky(y)
    o_ref[0] = y.astype(o_ref.dtype)


def _apply_norm_act(y, s1, s2, tm, count, act, out_dtype):
    n, m_ps, c = y.shape
    mt = m_ps // tm
    kernel = functools.partial(_norm_act_kernel, inv_count=1.0 / float(count), act=act)
    return pl.pallas_call(
        kernel,
        out_shape=jax.ShapeDtypeStruct((n, m_ps, c), out_dtype),
        grid=(n, mt),
        in_specs=[pl.BlockSpec((1, tm, c), lambda i, j: (i, j, 0)),
                  pl.BlockSpec((1, 1, c), lambda i, j: (i, 0, 0)),
                  pl.BlockSpec((1, 1, c), lambda i, j: (i, 0, 0))],
        out_specs=pl.BlockSpec((1, tm, c), lambda i, j: (i, j, 0)),
        compiler_params=_compiler_params(("parallel", "parallel")),
    )(y, s1, s2)


# -----------------------------------------------------------------------------
# Layer wrappers
# -----------------------------------------------------------------------------
def _conv_s2_block(x, w_mat, b, norm, act, out_dtype):
    """Stride-2 conv block. x: (N,H,W,Cin); w_mat: (9*Cin, Cout) bf16."""
    n, h, w, cin = x.shape
    cout = w_mat.shape[-1]
    ho = (h - 1) // 2 + 1
    wo = (w - 1) // 2 + 1
    xp = jnp.pad(x, ((0, 0), (1, 1), (1, 1), (0, 0)))
    taps = [xp[:, i::2, j::2, :][:, :ho, :wo, :] for i in range(3) for j in range(3)]
    patches = jnp.stack(taps, axis=3).reshape(n, ho * wo, 9 * cin).astype(jnp.bfloat16)

    m_ps = ho * wo
    tm = _pick_rows(m_ps, 1, target=512)
    mt = m_ps // tm
    k = 9 * cin

    if mt == 1:
        # Fully fused fast path: one pallas_call, 1-D batch grid.
        kernel = functools.partial(_mm_fused_kernel, norm=norm, act=act,
                                   inv_count=1.0 / float(m_ps))
        y = pl.pallas_call(
            kernel,
            out_shape=jax.ShapeDtypeStruct((n, m_ps, cout), out_dtype),
            grid=(n,),
            in_specs=[pl.BlockSpec((1, m_ps, k), lambda i: (i, 0, 0)),
                      pl.BlockSpec((k, cout), lambda i: (0, 0)),
                      pl.BlockSpec((1, cout), lambda i: (0, 0))],
            out_specs=pl.BlockSpec((1, m_ps, cout), lambda i: (i, 0, 0)),
            compiler_params=_compiler_params(("parallel",)),
        )(patches, w_mat, b)
        return y.reshape(n, ho, wo, cout)

    # Two-pass tiled fallback.
    in_specs = [pl.BlockSpec((1, tm, k), lambda i, j: (i, j, 0)),
                pl.BlockSpec((k, cout), lambda i, j: (0, 0)),
                pl.BlockSpec((1, cout), lambda i, j: (0, 0))]
    y_dtype = jnp.float32 if norm else out_dtype
    y_sd = jax.ShapeDtypeStruct((n, m_ps, cout), y_dtype)
    y_spec = pl.BlockSpec((1, tm, cout), lambda i, j: (i, j, 0))

    if norm:
        s_sd = jax.ShapeDtypeStruct((n, 1, cout), jnp.float32)
        s_spec = pl.BlockSpec((1, 1, cout), lambda i, j: (i, 0, 0))
        out_shape = (y_sd, s_sd, s_sd)
        out_specs = (y_spec, s_spec, s_spec)
        dims = ("parallel", "arbitrary")
    else:
        out_shape = y_sd
        out_specs = y_spec
        dims = ("parallel", "parallel")

    kernel = functools.partial(_matmul_kernel, norm=norm, act=act)
    res = pl.pallas_call(
        kernel, out_shape=out_shape, grid=(n, mt),
        in_specs=in_specs, out_specs=out_specs,
        compiler_params=_compiler_params(dims),
    )(patches, w_mat, b)

    if norm:
        y, s1, s2 = res
        y = _apply_norm_act(y, s1, s2, tm, count=m_ps, act=act, out_dtype=out_dtype)
    else:
        y = res
    return y.reshape(n, ho, wo, cout)


def _conv_s1_block(x, w9, b, norm, act, out_dtype):
    """Stride-1 conv block with fused im2col. x: (N,H,W,Cin); w9: (9,Cin,Cout) bf16."""
    n, h, w, cin = x.shape
    cout = w9.shape[-1]
    wp = w + 2
    lp = (h + 3) * wp                      # rows padded (1, 2) so flat reads stay in bounds
    xp = jnp.pad(x, ((0, 0), (1, 2), (1, 1), (0, 0)))
    xf = xp.reshape(n, lp, cin).astype(jnp.bfloat16)

    m_ps = h * wp                          # flat output rows (incl. 2 garbage cols / row)
    tm = _pick_rows(m_ps, wp, target=256)
    mt = m_ps // tm

    if mt == 1:
        # Fully fused fast path: static tap offsets, single M tile per sample.
        inputs = [xf, w9, b]
        in_specs = [pl.BlockSpec((1, lp, cin), lambda i: (i, 0, 0)),
                    pl.BlockSpec((9, cin, cout), lambda i: (0, 0, 0)),
                    pl.BlockSpec((1, cout), lambda i: (0, 0))]
        if norm:
            mask = (jnp.arange(m_ps) % wp < w).astype(jnp.float32).reshape(m_ps, 1)
            inputs.append(mask)
            in_specs.append(pl.BlockSpec((m_ps, 1), lambda i: (0, 0)))
        kernel = functools.partial(_s1_fused_kernel, norm=norm, act=act,
                                   tm=m_ps, wp=wp, inv_count=1.0 / float(h * w))
        y = pl.pallas_call(
            kernel,
            out_shape=jax.ShapeDtypeStruct((n, m_ps, cout), out_dtype),
            grid=(n,),
            in_specs=in_specs,
            out_specs=pl.BlockSpec((1, m_ps, cout), lambda i: (i, 0, 0)),
            compiler_params=_compiler_params(("parallel",)),
        )(*inputs)
        return y.reshape(n, h, wp, cout)[:, :, :w, :]

    # Two-pass tiled fallback.
    inputs = [xf, w9, b]
    in_specs = [pl.BlockSpec((1, lp, cin), lambda i, j: (i, 0, 0)),
                pl.BlockSpec((9, cin, cout), lambda i, j: (0, 0, 0)),
                pl.BlockSpec((1, cout), lambda i, j: (0, 0))]
    if norm:
        mask = (jnp.arange(m_ps) % wp < w).astype(jnp.float32).reshape(m_ps, 1)
        inputs.append(mask)
        in_specs.append(pl.BlockSpec((tm, 1), lambda i, j: (j, 0)))

    y_dtype = jnp.float32 if norm else out_dtype
    y_sd = jax.ShapeDtypeStruct((n, m_ps, cout), y_dtype)
    y_spec = pl.BlockSpec((1, tm, cout), lambda i, j: (i, j, 0))
    if norm:
        s_sd = jax.ShapeDtypeStruct((n, 1, cout), jnp.float32)
        s_spec = pl.BlockSpec((1, 1, cout), lambda i, j: (i, 0, 0))
        out_shape = (y_sd, s_sd, s_sd)
        out_specs = (y_spec, s_spec, s_spec)
        dims = ("parallel", "arbitrary")
    else:
        out_shape = y_sd
        out_specs = y_spec
        dims = ("parallel", "parallel")

    kernel = functools.partial(_conv_s1_kernel, norm=norm, act=act, tm=tm, wp=wp)
    res = pl.pallas_call(
        kernel, out_shape=out_shape, grid=(n, mt),
        in_specs=in_specs, out_specs=out_specs,
        compiler_params=_compiler_params(dims),
    )(*inputs)

    if norm:
        y, s1, s2 = res
        y = _apply_norm_act(y, s1, s2, tm, count=h * w, act=act, out_dtype=out_dtype)
    else:
        y = res
    # Strip the 2 garbage columns per row.
    return y.reshape(n, h, wp, cout)[:, :, :w, :]


# -----------------------------------------------------------------------------
# Parameters (deterministic, in-script)
# -----------------------------------------------------------------------------
def init_params(key, channels=3):
    cfg = [(channels, 64, 2, False), (64, 128, 2, True),
           (128, 256, 2, True), (256, 512, 1, True), (512, 1, 1, False)]
    params = []
    for (cin, cout, stride, norm) in cfg:
        key, kw_, kb_ = jax.random.split(key, 3)
        w = 0.05 * jax.random.normal(kw_, (3, 3, cin, cout), dtype=jnp.float32)
        b = 0.05 * jax.random.normal(kb_, (cout,), dtype=jnp.float32)
        # Pad the Cout=1 final conv to 128 lanes (zero weights/bias); sliced later.
        cout_pad = 128 if cout < 64 else cout
        if cout_pad != cout:
            w = jnp.pad(w, ((0, 0), (0, 0), (0, 0), (0, cout_pad - cout)))
            b = jnp.pad(b, ((0, cout_pad - cout),))
        if stride == 2:
            w_k = w.reshape(9 * cin, cout_pad).astype(jnp.bfloat16)
        else:
            w_k = w.reshape(9, cin, cout_pad).astype(jnp.bfloat16)
        params.append(dict(w=w_k, b=b.reshape(1, cout_pad).astype(jnp.float32),
                           stride=stride, norm=norm, cout=cout))
    return params


# -----------------------------------------------------------------------------
# Full discriminator forward (NCHW in, NCHW out — PyTorch semantics)
# -----------------------------------------------------------------------------
def discriminator_forward(img_nchw, params):
    x = jnp.transpose(img_nchw, (0, 2, 3, 1)).astype(jnp.float32)   # NCHW -> NHWC
    n_layers = len(params)
    for li, p in enumerate(params):
        act = li < n_layers - 1                 # final conv: no norm, no activation
        out_dtype = jnp.float32 if li == n_layers - 1 else jnp.bfloat16
        if p["stride"] == 2:
            x = _conv_s2_block(x, p["w"], p["b"], p["norm"], act, out_dtype)
        else:
            x = _conv_s1_block(x, p["w"], p["b"], p["norm"], act, out_dtype)
        x = x[..., :p["cout"]]                  # drop lane padding (only last layer)
    return jnp.transpose(x, (0, 3, 1, 2)).astype(jnp.float32)       # NHWC -> NCHW


if __name__ == "__main__":
    key = jax.random.PRNGKey(0)
    k_img, k_par = jax.random.split(key)

    # Small input consistent with the module: N=2, C=3, H=W=16.
    img = jax.random.normal(k_img, (2, 3, 16, 16), dtype=jnp.float32)
    params = init_params(k_par, channels=3)

    fwd = jax.jit(lambda im: discriminator_forward(im, params))
    out = jax.block_until_ready(fwd(img))

    # Expected output shape: (2, 1, 2, 2) for a 16x16 input (three stride-2 convs).
    assert out.shape == (2, 1, 2, 2), out.shape
    assert bool(jnp.all(jnp.isfinite(out)))
    print("KERNEL_OK")
</pallas_src>

<mosaic_0001>
module attributes {stable_mosaic.version = 11 : i64} {
  func.func @_mm_fused_kernel(%arg0: i32, %arg1: memref<1x64x27xbf16, #tpu.memory_space<vmem>>, %arg2: memref<27x64xbf16, #tpu.memory_space<vmem>>, %arg3: memref<1x64xf32, #tpu.memory_space<vmem>>, %arg4: memref<1x64x64xbf16, #tpu.memory_space<vmem>>) attributes {dimension_semantics = [#tpu.dimension_semantics<parallel>], iteration_bounds = array<i64: 2>, scalar_prefetch = 0 : i64, scratch_operands = 0 : i64, tpu.core_type = #tpu.core_type<tc>, window_params = [{transform_indices = @transform_0, window_bounds = array<i64: 1, 64, 27>}, {pipeline_mode = #tpu.pipeline_mode<synchronous>, transform_indices = @transform_1, window_bounds = array<i64: 27, 64>}, {pipeline_mode = #tpu.pipeline_mode<synchronous>, transform_indices = @transform_2, window_bounds = array<i64: 1, 64>}, {transform_indices = @transform_3, window_bounds = array<i64: 1, 64, 64>}]} {
    %c0 = arith.constant 0 : index
    %c0_0 = arith.constant 0 : index
    %c0_1 = arith.constant 0 : index
    %0 = vector.load %arg1[%c0, %c0_0, %c0_1] : memref<1x64x27xbf16, #tpu.memory_space<vmem>>, vector<1x64x27xbf16>
    %1 = vector.shape_cast %0 : vector<1x64x27xbf16> to vector<64x27xbf16>
    %c0_2 = arith.constant 0 : index
    %c0_3 = arith.constant 0 : index
    %2 = vector.load %arg2[%c0_2, %c0_3] : memref<27x64xbf16, #tpu.memory_space<vmem>>, vector<27x64xbf16>
    %cst = arith.constant dense<0.000000e+00> : vector<64x64xf32>
    %3 = tpu.matmul %1, %2, %cst {dimension_numbers = #tpu.dot_dimension_numbers<[1], [0], [0], [1], [0, 0, 1, 1], [], []>} : vector<64x27xbf16>, vector<27x64xbf16>, vector<64x64xf32> -> vector<64x64xf32>
    %c0_4 = arith.constant 0 : index
    %c0_5 = arith.constant 0 : index
    %4 = vector.load %arg3[%c0_4, %c0_5] : memref<1x64xf32, #tpu.memory_space<vmem>>, vector<1x64xf32>
    %5 = vector.broadcast %4 : vector<1x64xf32> to vector<64x64xf32>
    %6 = arith.addf %3, %5 : vector<64x64xf32>
    %cst_6 = arith.constant 0.000000e+00 : f32
    %7 = vector.broadcast %cst_6 : f32 to vector<64x64xf32>
    %8 = arith.cmpf ogt, %6, %7 : vector<64x64xf32>
    %cst_7 = arith.constant 2.000000e-01 : f32
    %9 = vector.broadcast %cst_7 : f32 to vector<64x64xf32>
    %10 = arith.mulf %9, %6 : vector<64x64xf32>
    %11 = arith.select %8, %6, %10 : vector<64x64xi1>, vector<64x64xf32>
    %12 = arith.truncf %11 : vector<64x64xf32> to vector<64x64xbf16>
    %c0_8 = arith.constant 0 : index
    %c0_9 = arith.constant 0 : index
    %c0_10 = arith.constant 0 : index
    %13 = vector.load %arg4[%c0_8, %c0_9, %c0_10] : memref<1x64x64xbf16, #tpu.memory_space<vmem>>, vector<1x64x64xbf16>
    %14 = vector.shape_cast %13 : vector<1x64x64xbf16> to vector<64x64xbf16>
    %15 = vector.shape_cast %12 : vector<64x64xbf16> to vector<1x64x64xbf16>
    tpu.vector_store %arg4[%c0_8, %c0_9, %c0_10], %15 {strides = array<i32>} : memref<1x64x64xbf16, #tpu.memory_space<vmem>>, vector<1x64x64xbf16>,
    return
  }
  func.func @transform_0(%arg0: i32) -> (i32, i32, i32) {
    %c0_i32 = arith.constant 0 : i32
    %c0_i32_0 = arith.constant 0 : i32
    %c0_i32_1 = arith.constant 0 : i32
    return %arg0, %c0_i32, %c0_i32_0 : i32, i32, i32
  }
  func.func @transform_1(%arg0: i32) -> (i32, i32) {
    %c0_i32 = arith.constant 0 : i32
    %c0_i32_0 = arith.constant 0 : i32
    %c0_i32_1 = arith.constant 0 : i32
    return %c0_i32, %c0_i32_0 : i32, i32
  }
  func.func @transform_2(%arg0: i32) -> (i32, i32) {
    %c0_i32 = arith.constant 0 : i32
    %c0_i32_0 = arith.constant 0 : i32
    %c0_i32_1 = arith.constant 0 : i32
    return %c0_i32, %c0_i32_0 : i32, i32
  }
  func.func @transform_3(%arg0: i32) -> (i32, i32, i32) {
    %c0_i32 = arith.constant 0 : i32
    %c0_i32_0 = arith.constant 0 : i32
    %c0_i32_1 = arith.constant 0 : i32
    return %arg0, %c0_i32, %c0_i32_0 : i32, i32, i32
  }
}

module attributes {stable_mosaic.version = 11 : i64} {
  func.func @_mm_fused_kernel(%arg0: i32, %arg1: memref<1x16x576xbf16, #tpu.memory_space<vmem>>, %arg2: memref<576x128xbf16, #tpu.memory_space<vmem>>, %arg3: memref<1x128xf32, #tpu.memory_space<vmem>>, %arg4: memref<1x16x128xbf16, #tpu.memory_space<vmem>>) attributes {dimension_semantics = [#tpu.dimension_semantics<parallel>], iteration_bounds = array<i64: 2>, scalar_prefetch = 0 : i64, scratch_operands = 0 : i64, tpu.core_type = #tpu.core_type<tc>, window_params = [{transform_indices = @transform_0, window_bounds = array<i64: 1, 16, 576>}, {pipeline_mode = #tpu.pipeline_mode<synchronous>, transform_indices = @transform_1, window_bounds = array<i64: 576, 128>}, {pipeline_mode = #tpu.pipeline_mode<synchronous>, transform_indices = @transform_2, window_bounds = array<i64: 1, 128>}, {transform_indices = @transform_3, window_bounds = array<i64: 1, 16, 128>}]} {
    %c0 = arith.constant 0 : index
    %c0_0 = arith.constant 0 : index
    %c0_1 = arith.constant 0 : index
    %0 = vector.load %arg1[%c0, %c0_0, %c0_1] : memref<1x16x576xbf16, #tpu.memory_space<vmem>>, vector<1x16x576xbf16>
    %1 = vector.shape_cast %0 : vector<1x16x576xbf16> to vector<16x576xbf16>
    %c0_2 = arith.constant 0 : index
    %c0_3 = arith.constant 0 : index
    %2 = vector.load %arg2[%c0_2, %c0_3] : memref<576x128xbf16, #tpu.memory_space<vmem>>, vector<576x128xbf16>
    %cst = arith.constant dense<0.000000e+00> : vector<16x128xf32>
    %3 = tpu.matmul %1, %2, %cst {dimension_numbers = #tpu.dot_dimension_numbers<[1], [0], [0], [1], [0, 0, 1, 1], [], []>} : vector<16x576xbf16>, vector<576x128xbf16>, vector<16x128xf32> -> vector<16x128xf32>
    %c0_4 = arith.constant 0 : index
    %c0_5 = arith.constant 0 : index
    %4 = vector.load %arg3[%c0_4, %c0_5] : memref<1x128xf32, #tpu.memory_space<vmem>>, vector<1x128xf32>
    %5 = vector.broadcast %4 : vector<1x128xf32> to vector<16x128xf32>
    %6 = arith.addf %3, %5 : vector<16x128xf32>
    %cst_6 = arith.constant dense<0.000000e+00> : vector<128xf32>
    %7 = vector.multi_reduction <add>, %6, %cst_6 [0] : vector<16x128xf32> to vector<128xf32>
    %8 = vector.shape_cast %7 : vector<128xf32> to vector<1x128xf32>
    %cst_7 = arith.constant 6.250000e-02 : f32
    %9 = vector.broadcast %cst_7 : f32 to vector<1x128xf32>
    %10 = arith.mulf %8, %9 : vector<1x128xf32>
    %11 = arith.mulf %6, %6 : vector<16x128xf32>
    %cst_8 = arith.constant dense<0.000000e+00> : vector<128xf32>
    %12 = vector.multi_reduction <add>, %11, %cst_8 [0] : vector<16x128xf32> to vector<128xf32>
    %13 = vector.shape_cast %12 : vector<128xf32> to vector<1x128xf32>
    %cst_9 = arith.constant 6.250000e-02 : f32
    %14 = vector.broadcast %cst_9 : f32 to vector<1x128xf32>
    %15 = arith.mulf %13, %14 : vector<1x128xf32>
    %16 = arith.mulf %10, %10 : vector<1x128xf32>
    %17 = arith.subf %15, %16 : vector<1x128xf32>
    %cst_10 = arith.constant 0.000000e+00 : f32
    %18 = vector.broadcast %cst_10 : f32 to vector<1x128xf32>
    %19 = arith.maximumf %17, %18 : vector<1x128xf32>
    %20 = vector.broadcast %10 : vector<1x128xf32> to vector<16x128xf32>
    %21 = arith.subf %6, %20 : vector<16x128xf32>
    %cst_11 = arith.constant 9.99999974E-6 : f32
    %22 = vector.broadcast %cst_11 : f32 to vector<1x128xf32>
    %23 = arith.addf %19, %22 : vector<1x128xf32>
    %24 = math.rsqrt %23 : vector<1x128xf32>
    %25 = vector.broadcast %24 : vector<1x128xf32> to vector<16x128xf32>
    %26 = arith.mulf %21, %25 : vector<16x128xf32>
    %cst_12 = arith.constant 0.000000e+00 : f32
    %27 = vector.broadcast %cst_12 : f32 to vector<16x128xf32>
    %28 = arith.cmpf ogt, %26, %27 : vector<16x128xf32>
    %cst_13 = arith.constant 2.000000e-01 : f32
    %29 = vector.broadcast %cst_13 : f32 to vector<16x128xf32>
    %30 = arith.mulf %29, %26 : vector<16x128xf32>
    %31 = arith.select %28, %26, %30 : vector<16x128xi1>, vector<16x128xf32>
    %32 = arith.truncf %31 : vector<16x128xf32> to vector<16x128xbf16>
    %c0_14 = arith.constant 0 : index
    %c0_15 = arith.constant 0 : index
    %c0_16 = arith.constant 0 : index
    %33 = vector.load %arg4[%c0_14, %c0_15, %c0_16] : memref<1x16x128xbf16, #tpu.memory_space<vmem>>, vector<1x16x128xbf16>
    %34 = vector.shape_cast %33 : vector<1x16x128xbf16> to vector<16x128xbf16>
    %35 = vector.shape_cast %32 : vector<16x128xbf16> to vector<1x16x128xbf16>
    tpu.vector_store %arg4[%c0_14, %c0_15, %c0_16], %35 {strides = array<i32>} : memref<1x16x128xbf16, #tpu.memory_space<vmem>>, vector<1x16x128xbf16>,
    return
  }
  func.func @transform_0(%arg0: i32) -> (i32, i32, i32) {
    %c0_i32 = arith.constant 0 : i32
    %c0_i32_0 = arith.constant 0 : i32
    %c0_i32_1 = arith.constant 0 : i32
    return %arg0, %c0_i32, %c0_i32_0 : i32, i32, i32
  }
  func.func @transform_1(%arg0: i32) -> (i32, i32) {
    %c0_i32 = arith.constant 0 : i32
    %c0_i32_0 = arith.constant 0 : i32
    %c0_i32_1 = arith.constant 0 : i32
    return %c0_i32, %c0_i32_0 : i32, i32
  }
  func.func @transform_2(%arg0: i32) -> (i32, i32) {
    %c0_i32 = arith.constant 0 : i32
    %c0_i32_0 = arith.constant 0 : i32
    %c0_i32_1 = arith.constant 0 : i32
    return %c0_i32, %c0_i32_0 : i32, i32
  }
  func.func @transform_3(%arg0: i32) -> (i32, i32, i32) {
    %c0_i32 = arith.constant 0 : i32
    %c0_i32_0 = arith.constant 0 : i32
    %c0_i32_1 = arith.constant 0 : i32
    return %arg0, %c0_i32, %c0_i32_0 : i32, i32, i32
  }
}

module attributes {stable_mosaic.version = 11 : i64} {
  func.func @_mm_fused_kernel(%arg0: i32, %arg1: memref<1x4x1152xbf16, #tpu.memory_space<vmem>>, %arg2: memref<1152x256xbf16, #tpu.memory_space<vmem>>, %arg3: memref<1x256xf32, #tpu.memory_space<vmem>>, %arg4: memref<1x4x256xbf16, #tpu.memory_space<vmem>>) attributes {dimension_semantics = [#tpu.dimension_semantics<parallel>], iteration_bounds = array<i64: 2>, scalar_prefetch = 0 : i64, scratch_operands = 0 : i64, tpu.core_type = #tpu.core_type<tc>, window_params = [{transform_indices = @transform_0, window_bounds = array<i64: 1, 4, 1152>}, {pipeline_mode = #tpu.pipeline_mode<synchronous>, transform_indices = @transform_1, window_bounds = array<i64: 1152, 256>}, {pipeline_mode = #tpu.pipeline_mode<synchronous>, transform_indices = @transform_2, window_bounds = array<i64: 1, 256>}, {transform_indices = @transform_3, window_bounds = array<i64: 1, 4, 256>}]} {
    %c0 = arith.constant 0 : index
    %c0_0 = arith.constant 0 : index
    %c0_1 = arith.constant 0 : index
    %0 = vector.load %arg1[%c0, %c0_0, %c0_1] : memref<1x4x1152xbf16, #tpu.memory_space<vmem>>, vector<1x4x1152xbf16>
    %1 = vector.shape_cast %0 : vector<1x4x1152xbf16> to vector<4x1152xbf16>
    %c0_2 = arith.constant 0 : index
    %c0_3 = arith.constant 0 : index
    %2 = vector.load %arg2[%c0_2, %c0_3] : memref<1152x256xbf16, #tpu.memory_space<vmem>>, vector<1152x256xbf16>
    %cst = arith.constant dense<0.000000e+00> : vector<4x256xf32>
    %3 = tpu.matmul %1, %2, %cst {dimension_numbers = #tpu.dot_dimension_numbers<[1], [0], [0], [1], [0, 0, 1, 1], [], []>} : vector<4x1152xbf16>, vector<1152x256xbf16>, vector<4x256xf32> -> vector<4x256xf32>
    %c0_4 = arith.constant 0 : index
    %c0_5 = arith.constant 0 : index
    %4 = vector.load %arg3[%c0_4, %c0_5] : memref<1x256xf32, #tpu.memory_space<vmem>>, vector<1x256xf32>
    %5 = vector.broadcast %4 : vector<1x256xf32> to vector<4x256xf32>
    %6 = arith.addf %3, %5 : vector<4x256xf32>
    %cst_6 = arith.constant dense<0.000000e+00> : vector<256xf32>
    %7 = vector.multi_reduction <add>, %6, %cst_6 [0] : vector<4x256xf32> to vector<256xf32>
    %8 = vector.shape_cast %7 : vector<256xf32> to vector<1x256xf32>
    %cst_7 = arith.constant 2.500000e-01 : f32
    %9 = vector.broadcast %cst_7 : f32 to vector<1x256xf32>
    %10 = arith.mulf %8, %9 : vector<1x256xf32>
    %11 = arith.mulf %6, %6 : vector<4x256xf32>
    %cst_8 = arith.constant dense<0.000000e+00> : vector<256xf32>
    %12 = vector.multi_reduction <add>, %11, %cst_8 [0] : vector<4x256xf32> to vector<256xf32>
    %13 = vector.shape_cast %12 : vector<256xf32> to vector<1x256xf32>
    %cst_9 = arith.constant 2.500000e-01 : f32
    %14 = vector.broadcast %cst_9 : f32 to vector<1x256xf32>
    %15 = arith.mulf %13, %14 : vector<1x256xf32>
    %16 = arith.mulf %10, %10 : vector<1x256xf32>
    %17 = arith.subf %15, %16 : vector<1x256xf32>
    %cst_10 = arith.constant 0.000000e+00 : f32
    %18 = vector.broadcast %cst_10 : f32 to vector<1x256xf32>
    %19 = arith.maximumf %17, %18 : vector<1x256xf32>
    %20 = vector.broadcast %10 : vector<1x256xf32> to vector<4x256xf32>
    %21 = arith.subf %6, %20 : vector<4x256xf32>
    %cst_11 = arith.constant 9.99999974E-6 : f32
    %22 = vector.broadcast %cst_11 : f32 to vector<1x256xf32>
    %23 = arith.addf %19, %22 : vector<1x256xf32>
    %24 = math.rsqrt %23 : vector<1x256xf32>
    %25 = vector.broadcast %24 : vector<1x256xf32> to vector<4x256xf32>
    %26 = arith.mulf %21, %25 : vector<4x256xf32>
    %cst_12 = arith.constant 0.000000e+00 : f32
    %27 = vector.broadcast %cst_12 : f32 to vector<4x256xf32>
    %28 = arith.cmpf ogt, %26, %27 : vector<4x256xf32>
    %cst_13 = arith.constant 2.000000e-01 : f32
    %29 = vector.broadcast %cst_13 : f32 to vector<4x256xf32>
    %30 = arith.mulf %29, %26 : vector<4x256xf32>
    %31 = arith.select %28, %26, %30 : vector<4x256xi1>, vector<4x256xf32>
    %32 = arith.truncf %31 : vector<4x256xf32> to vector<4x256xbf16>
    %c0_14 = arith.constant 0 : index
    %c0_15 = arith.constant 0 : index
    %c0_16 = arith.constant 0 : index
    %33 = vector.load %arg4[%c0_14, %c0_15, %c0_16] : memref<1x4x256xbf16, #tpu.memory_space<vmem>>, vector<1x4x256xbf16>
    %34 = vector.shape_cast %33 : vector<1x4x256xbf16> to vector<4x256xbf16>
    %35 = vector.shape_cast %32 : vector<4x256xbf16> to vector<1x4x256xbf16>
    tpu.vector_store %arg4[%c0_14, %c0_15, %c0_16], %35 {strides = array<i32>} : memref<1x4x256xbf16, #tpu.memory_space<vmem>>, vector<1x4x256xbf16>,
    return
  }
  func.func @transform_0(%arg0: i32) -> (i32, i32, i32) {
    %c0_i32 = arith.constant 0 : i32
    %c0_i32_0 = arith.constant 0 : i32
    %c0_i32_1 = arith.constant 0 : i32
    return %arg0, %c0_i32, %c0_i32_0 : i32, i32, i32
  }
  func.func @transform_1(%arg0: i32) -> (i32, i32) {
    %c0_i32 = arith.constant 0 : i32
    %c0_i32_0 = arith.constant 0 : i32
    %c0_i32_1 = arith.constant 0 : i32
    return %c0_i32, %c0_i32_0 : i32, i32
  }
  func.func @transform_2(%arg0: i32) -> (i32, i32) {
    %c0_i32 = arith.constant 0 : i32
    %c0_i32_0 = arith.constant 0 : i32
    %c0_i32_1 = arith.constant 0 : i32
    return %c0_i32, %c0_i32_0 : i32, i32
  }
  func.func @transform_3(%arg0: i32) -> (i32, i32, i32) {
    %c0_i32 = arith.constant 0 : i32
    %c0_i32_0 = arith.constant 0 : i32
    %c0_i32_1 = arith.constant 0 : i32
    return %arg0, %c0_i32, %c0_i32_0 : i32, i32, i32
  }
}

module attributes {stable_mosaic.version = 11 : i64} {
  func.func @_s1_fused_kernel(%arg0: i32, %arg1: memref<1x20x256xbf16, #tpu.memory_space<vmem>>, %arg2: memref<9x256x512xbf16, #tpu.memory_space<vmem>>, %arg3: memref<1x512xf32, #tpu.memory_space<vmem>>, %arg4: memref<8x1xf32, #tpu.memory_space<vmem>>, %arg5: memref<1x8x512xbf16, #tpu.memory_space<vmem>>) attributes {dimension_semantics = [#tpu.dimension_semantics<parallel>], iteration_bounds = array<i64: 2>, scalar_prefetch = 0 : i64, scratch_operands = 0 : i64, tpu.core_type = #tpu.core_type<tc>, window_params = [{transform_indices = @transform_0, window_bounds = array<i64: 1, 20, 256>}, {pipeline_mode = #tpu.pipeline_mode<synchronous>, transform_indices = @transform_1, window_bounds = array<i64: 9, 256, 512>}, {pipeline_mode = #tpu.pipeline_mode<synchronous>, transform_indices = @transform_2, window_bounds = array<i64: 1, 512>}, {pipeline_mode = #tpu.pipeline_mode<synchronous>, transform_indices = @transform_3, window_bounds = array<i64: 8, 1>}, {transform_indices = @transform_4, window_bounds = array<i64: 1, 8, 512>}]} {
    %cst = arith.constant 0.000000e+00 : f32
    %0 = vector.broadcast %cst : f32 to vector<8x512xf32>
    %c0 = arith.constant 0 : index
    %c0_0 = arith.constant 0 : index
    %c0_1 = arith.constant 0 : index
    %1 = vector.load %arg1[%c0, %c0_0, %c0_1] : memref<1x20x256xbf16, #tpu.memory_space<vmem>>, vector<1x8x256xbf16>
    %2 = vector.shape_cast %1 : vector<1x8x256xbf16> to vector<8x256xbf16>
    %c0_2 = arith.constant 0 : index
    %c0_3 = arith.constant 0 : index
    %c0_4 = arith.constant 0 : index
    %3 = vector.load %arg2[%c0_2, %c0_3, %c0_4] : memref<9x256x512xbf16, #tpu.memory_space<vmem>>, vector<1x256x512xbf16>
    %4 = vector.shape_cast %3 : vector<1x256x512xbf16> to vector<256x512xbf16>
    %cst_5 = arith.constant dense<0.000000e+00> : vector<8x512xf32>
    %5 = tpu.matmul %2, %4, %cst_5 {dimension_numbers = #tpu.dot_dimension_numbers<[1], [0], [0], [1], [0, 0, 1, 1], [], []>} : vector<8x256xbf16>, vector<256x512xbf16>, vector<8x512xf32> -> vector<8x512xf32>
    %6 = arith.addf %0, %5 : vector<8x512xf32>
    %c0_6 = arith.constant 0 : index
    %c1 = arith.constant 1 : index
    %c0_7 = arith.constant 0 : index
    %7 = vector.load %arg1[%c0_6, %c1, %c0_7] : memref<1x20x256xbf16, #tpu.memory_space<vmem>>, vector<1x8x256xbf16>
    %8 = vector.shape_cast %7 : vector<1x8x256xbf16> to vector<8x256xbf16>
    %c1_8 = arith.constant 1 : index
    %c0_9 = arith.constant 0 : index
    %c0_10 = arith.constant 0 : index
    %9 = vector.load %arg2[%c1_8, %c0_9, %c0_10] : memref<9x256x512xbf16, #tpu.memory_space<vmem>>, vector<1x256x512xbf16>
    %10 = vector.shape_cast %9 : vector<1x256x512xbf16> to vector<256x512xbf16>
    %cst_11 = arith.constant dense<0.000000e+00> : vector<8x512xf32>
    %11 = tpu.matmul %8, %10, %cst_11 {dimension_numbers = #tpu.dot_dimension_numbers<[1], [0], [0], [1], [0, 0, 1, 1], [], []>} : vector<8x256xbf16>, vector<256x512xbf16>, vector<8x512xf32> -> vector<8x512xf32>
    %12 = arith.addf %6, %11 : vector<8x512xf32>
    %c0_12 = arith.constant 0 : index
    %c2 = arith.constant 2 : index
    %c0_13 = arith.constant 0 : index
    %13 = vector.load %arg1[%c0_12, %c2, %c0_13] : memref<1x20x256xbf16, #tpu.memory_space<vmem>>, vector<1x8x256xbf16>
    %14 = vector.shape_cast %13 : vector<1x8x256xbf16> to vector<8x256xbf16>
    %c2_14 = arith.constant 2 : index
    %c0_15 = arith.constant 0 : index
    %c0_16 = arith.constant 0 : index
    %15 = vector.load %arg2[%c2_14, %c0_15, %c0_16] : memref<9x256x512xbf16, #tpu.memory_space<vmem>>, vector<1x256x512xbf16>
    %16 = vector.shape_cast %15 : vector<1x256x512xbf16> to vector<256x512xbf16>
    %cst_17 = arith.constant dense<0.000000e+00> : vector<8x512xf32>
    %17 = tpu.matmul %14, %16, %cst_17 {dimension_numbers = #tpu.dot_dimension_numbers<[1], [0], [0], [1], [0, 0, 1, 1], [], []>} : vector<8x256xbf16>, vector<256x512xbf16>, vector<8x512xf32> -> vector<8x512xf32>
    %18 = arith.addf %12, %17 : vector<8x512xf32>
    %c0_18 = arith.constant 0 : index
    %c4 = arith.constant 4 : index
    %c0_19 = arith.constant 0 : index
    %19 = vector.load %arg1[%c0_18, %c4, %c0_19] : memref<1x20x256xbf16, #tpu.memory_space<vmem>>, vector<1x8x256xbf16>
    %20 = vector.shape_cast %19 : vector<1x8x256xbf16> to vector<8x256xbf16>
    %c3 = arith.constant 3 : index
    %c0_20 = arith.constant 0 : index
    %c0_21 = arith.constant 0 : index
    %21 = vector.load %arg2[%c3, %c0_20, %c0_21] : memref<9x256x512xbf16, #tpu.memory_space<vmem>>, vector<1x256x512xbf16>
    %22 = vector.shape_cast %21 : vector<1x256x512xbf16> to vector<256x512xbf16>
    %cst_22 = arith.constant dense<0.000000e+00> : vector<8x512xf32>
    %23 = tpu.matmul %20, %22, %cst_22 {dimension_numbers = #tpu.dot_dimension_numbers<[1], [0], [0], [1], [0, 0, 1, 1], [], []>} : vector<8x256xbf16>, vector<256x512xbf16>, vector<8x512xf32> -> vector<8x512xf32>
    %24 = arith.addf %18, %23 : vector<8x512xf32>
    %c0_23 = arith.constant 0 : index
    %c5 = arith.constant 5 : index
    %c0_24 = arith.constant 0 : index
    %25 = vector.load %arg1[%c0_23, %c5, %c0_24] : memref<1x20x256xbf16, #tpu.memory_space<vmem>>, vector<1x8x256xbf16>
    %26 = vector.shape_cast %25 : vector<1x8x256xbf16> to vector<8x256xbf16>
    %c4_25 = arith.constant 4 : index
    %c0_26 = arith.constant 0 : index
    %c0_27 = arith.constant 0 : index
    %27 = vector.load %arg2[%c4_25, %c0_26, %c0_27] : memref<9x256x512xbf16, #tpu.memory_space<vmem>>, vector<1x256x512xbf16>
    %28 = vector.shape_cast %27 : vector<1x256x512xbf16> to vector<256x512xbf16>
    %cst_28 = arith.constant dense<0.000000e+00> : vector<8x512xf32>
    %29 = tpu.matmul %26, %28, %cst_28 {dimension_numbers = #tpu.dot_dimension_numbers<[1], [0], [0], [1], [0, 0, 1, 1], [], []>} : vector<8x256xbf16>, vector<256x512xbf16>, vector<8x512xf32> -> vector<8x512xf32>
    %30 = arith.addf %24, %29 : vector<8x512xf32>
    %c0_29 = arith.constant 0 : index
    %c6 = arith.constant 6 : index
    %c0_30 = arith.constant 0 : index
    %31 = vector.load %arg1[%c0_29, %c6, %c0_30] : memref<1x20x256xbf16, #tpu.memory_space<vmem>>, vector<1x8x256xbf16>
    %32 = vector.shape_cast %31 : vector<1x8x256xbf16> to vector<8x256xbf16>
    %c5_31 = arith.constant 5 : index
    %c0_32 = arith.constant 0 : index
    %c0_33 = arith.constant 0 : index
    %33 = vector.load %arg2[%c5_31, %c0_32, %c0_33] : memref<9x256x512xbf16, #tpu.memory_space<vmem>>, vector<1x256x512xbf16>
    %34 = vector.shape_cast %33 : vector<1x256x512xbf16> to vector<256x512xbf16>
    %cst_34 = arith.constant dense<0.000000e+00> : vector<8x512xf32>
    %35 = tpu.matmul %32, %34, %cst_34 {dimension_numbers = #tpu.dot_dimension_numbers<[1], [0], [0], [1], [0, 0, 1, 1], [], []>} : vector<8x256xbf16>, vector<256x512xbf16>, vector<8x512xf32> -> vector<8x512xf32>
    %36 = arith.addf %30, %35 : vector<8x512xf32>
    %c0_35 = arith.constant 0 : index
    %c8 = arith.constant 8 : index
    %c0_36 = arith.constant 0 : index
    %37 = vector.load %arg1[%c0_35, %c8, %c0_36] : memref<1x20x256xbf16, #tpu.memory_space<vmem>>, vector<1x8x256xbf16>
    %38 = vector.shape_cast %37 : vector<1x8x256xbf16> to vector<8x256xbf16>
    %c6_37 = arith.constant 6 : index
    %c0_38 = arith.constant 0 : index
    %c0_39 = arith.constant 0 : index
    %39 = vector.load %arg2[%c6_37, %c0_38, %c0_39] : memref<9x256x512xbf16, #tpu.memory_space<vmem>>, vector<1x256x512xbf16>
    %40 = vector.shape_cast %39 : vector<1x256x512xbf16> to vector<256x512xbf16>
    %cst_40 = arith.constant dense<0.000000e+00> : vector<8x512xf32>
    %41 = tpu.matmul %38, %40, %cst_40 {dimension_numbers = #tpu.dot_dimension_numbers<[1], [0], [0], [1], [0, 0, 1, 1], [], []>} : vector<8x256xbf16>, vector<256x512xbf16>, vector<8x512xf32> -> vector<8x512xf32>
    %42 = arith.addf %36, %41 : vector<8x512xf32>
    %c0_41 = arith.constant 0 : index
    %c9 = arith.constant 9 : index
    %c0_42 = arith.constant 0 : index
    %43 = vector.load %arg1[%c0_41, %c9, %c0_42] : memref<1x20x256xbf16, #tpu.memory_space<vmem>>, vector<1x8x256xbf16>
    %44 = vector.shape_cast %43 : vector<1x8x256xbf16> to vector<8x256xbf16>
    %c7 = arith.constant 7 : index
    %c0_43 = arith.constant 0 : index
    %c0_44 = arith.constant 0 : index
    %45 = vector.load %arg2[%c7, %c0_43, %c0_44] : memref<9x256x512xbf16, #tpu.memory_space<vmem>>, vector<1x256x512xbf16>
    %46 = vector.shape_cast %45 : vector<1x256x512xbf16> to vector<256x512xbf16>
    %cst_45 = arith.constant dense<0.000000e+00> : vector<8x512xf32>
    %47 = tpu.matmul %44, %46, %cst_45 {dimension_numbers = #tpu.dot_dimension_numbers<[1], [0], [0], [1], [0, 0, 1, 1], [], []>} : vector<8x256xbf16>, vector<256x512xbf16>, vector<8x512xf32> -> vector<8x512xf32>
    %48 = arith.addf %42, %47 : vector<8x512xf32>
    %c0_46 = arith.constant 0 : index
    %c10 = arith.constant 10 : index
    %c0_47 = arith.constant 0 : index
    %49 = vector.load %arg1[%c0_46, %c10, %c0_47] : memref<1x20x256xbf16, #tpu.memory_space<vmem>>, vector<1x8x256xbf16>
    %50 = vector.shape_cast %49 : vector<1x8x256xbf16> to vector<8x256xbf16>
    %c8_48 = arith.constant 8 : index
    %c0_49 = arith.constant 0 : index
    %c0_50 = arith.constant 0 : index
    %51 = vector.load %arg2[%c8_48, %c0_49, %c0_50] : memref<9x256x512xbf16, #tpu.memory_space<vmem>>, vector<1x256x512xbf16>
    %52 = vector.shape_cast %51 : vector<1x256x512xbf16> to vector<256x512xbf16>
    %cst_51 = arith.constant dense<0.000000e+00> : vector<8x512xf32>
    %53 = tpu.matmul %50, %52, %cst_51 {dimension_numbers = #tpu.dot_dimension_numbers<[1], [0], [0], [1], [0, 0, 1, 1], [], []>} : vector<8x256xbf16>, vector<256x512xbf16>, vector<8x512xf32> -> vector<8x512xf32>
    %54 = arith.addf %48, %53 : vector<8x512xf32>
    %c0_52 = arith.constant 0 : index
    %c0_53 = arith.constant 0 : index
    %55 = vector.load %arg3[%c0_52, %c0_53] : memref<1x512xf32, #tpu.memory_space<vmem>>, vector<1x512xf32>
    %56 = vector.broadcast %55 : vector<1x512xf32> to vector<8x512xf32>
    %57 = arith.addf %54, %56 : vector<8x512xf32>
    %c0_54 = arith.constant 0 : index
    %c0_55 = arith.constant 0 : index
    %58 = vector.load %arg4[%c0_54, %c0_55] : memref<8x1xf32, #tpu.memory_space<vmem>>, vector<8x1xf32>
    %59 = vector.broadcast %58 : vector<8x1xf32> to vector<8x512xf32>
    %60 = arith.mulf %57, %59 : vector<8x512xf32>
    %cst_56 = arith.constant dense<0.000000e+00> : vector<512xf32>
    %61 = vector.multi_reduction <add>, %60, %cst_56 [0] : vector<8x512xf32> to vector<512xf32>
    %62 = vector.shape_cast %61 : vector<512xf32> to vector<1x512xf32>
    %cst_57 = arith.constant 2.500000e-01 : f32
    %63 = vector.broadcast %cst_57 : f32 to vector<1x512xf32>
    %64 = arith.mulf %62, %63 : vector<1x512xf32>
    %65 = arith.mulf %60, %57 : vector<8x512xf32>
    %cst_58 = arith.constant dense<0.000000e+00> : vector<512xf32>
    %66 = vector.multi_reduction <add>, %65, %cst_58 [0] : vector<8x512xf32> to vector<512xf32>
    %67 = vector.shape_cast %66 : vector<512xf32> to vector<1x512xf32>
    %cst_59 = arith.constant 2.500000e-01 : f32
    %68 = vector.broadcast %cst_59 : f32 to vector<1x512xf32>
    %69 = arith.mulf %67, %68 : vector<1x512xf32>
    %70 = arith.mulf %64, %64 : vector<1x512xf32>
    %71 = arith.subf %69, %70 : vector<1x512xf32>
    %cst_60 = arith.constant 0.000000e+00 : f32
    %72 = vector.broadcast %cst_60 : f32 to vector<1x512xf32>
    %73 = arith.maximumf %71, %72 : vector<1x512xf32>
    %74 = vector.broadcast %64 : vector<1x512xf32> to vector<8x512xf32>
    %75 = arith.subf %57, %74 : vector<8x512xf32>
    %cst_61 = arith.constant 9.99999974E-6 : f32
    %76 = vector.broadcast %cst_61 : f32 to vector<1x512xf32>
    %77 = arith.addf %73, %76 : vector<1x512xf32>
    %78 = math.rsqrt %77 : vector<1x512xf32>
    %79 = vector.broadcast %78 : vector<1x512xf32> to vector<8x512xf32>
    %80 = arith.mulf %75, %79 : vector<8x512xf32>
    %cst_62 = arith.constant 0.000000e+00 : f32
    %81 = vector.broadcast %cst_62 : f32 to vector<8x512xf32>
    %82 = arith.cmpf ogt, %80, %81 : vector<8x512xf32>
    %cst_63 = arith.constant 2.000000e-01 : f32
    %83 = vector.broadcast %cst_63 : f32 to vector<8x512xf32>
    %84 = arith.mulf %83, %80 : vector<8x512xf32>
    %85 = arith.select %82, %80, %84 : vector<8x512xi1>, vector<8x512xf32>
    %86 = arith.truncf %85 : vector<8x512xf32> to vector<8x512xbf16>
    %c0_64 = arith.constant 0 : index
    %c0_65 = arith.constant 0 : index
    %c0_66 = arith.constant 0 : index
    %87 = vector.load %arg5[%c0_64, %c0_65, %c0_66] : memref<1x8x512xbf16, #tpu.memory_space<vmem>>, vector<1x8x512xbf16>
    %88 = vector.shape_cast %87 : vector<1x8x512xbf16> to vector<8x512xbf16>
    %89 = vector.shape_cast %86 : vector<8x512xbf16> to vector<1x8x512xbf16>
    tpu.vector_store %arg5[%c0_64, %c0_65, %c0_66], %89 {strides = array<i32>} : memref<1x8x512xbf16, #tpu.memory_space<vmem>>, vector<1x8x512xbf16>,
    return
  }
  func.func @transform_0(%arg0: i32) -> (i32, i32, i32) {
    %c0_i32 = arith.constant 0 : i32
    %c0_i32_0 = arith.constant 0 : i32
    %c0_i32_1 = arith.constant 0 : i32
    return %arg0, %c0_i32, %c0_i32_0 : i32, i32, i32
  }
  func.func @transform_1(%arg0: i32) -> (i32, i32, i32) {
    %c0_i32 = arith.constant 0 : i32
    %c0_i32_0 = arith.constant 0 : i32
    %c0_i32_1 = arith.constant 0 : i32
    %c0_i32_2 = arith.constant 0 : i32
    return %c0_i32, %c0_i32_0, %c0_i32_1 : i32, i32, i32
  }
  func.func @transform_2(%arg0: i32) -> (i32, i32) {
    %c0_i32 = arith.constant 0 : i32
    %c0_i32_0 = arith.constant 0 : i32
    %c0_i32_1 = arith.constant 0 : i32
    return %c0_i32, %c0_i32_0 : i32, i32
  }
  func.func @transform_3(%arg0: i32) -> (i32, i32) {
    %c0_i32 = arith.constant 0 : i32
    %c0_i32_0 = arith.constant 0 : i32
    %c0_i32_1 = arith.constant 0 : i32
    return %c0_i32, %c0_i32_0 : i32, i32
  }
  func.func @transform_4(%arg0: i32) -> (i32, i32, i32) {
    %c0_i32 = arith.constant 0 : i32
    %c0_i32_0 = arith.constant 0 : i32
    %c0_i32_1 = arith.constant 0 : i32
    return %arg0, %c0_i32, %c0_i32_0 : i32, i32, i32
  }
}

module attributes {stable_mosaic.version = 11 : i64} {
  func.func @_s1_fused_kernel(%arg0: i32, %arg1: memref<1x20x512xbf16, #tpu.memory_space<vmem>>, %arg2: memref<9x512x128xbf16, #tpu.memory_space<vmem>>, %arg3: memref<1x128xf32, #tpu.memory_space<vmem>>, %arg4: memref<1x8x128xf32, #tpu.memory_space<vmem>>) attributes {dimension_semantics = [#tpu.dimension_semantics<parallel>], iteration_bounds = array<i64: 2>, scalar_prefetch = 0 : i64, scratch_operands = 0 : i64, tpu.core_type = #tpu.core_type<tc>, window_params = [{transform_indices = @transform_0, window_bounds = array<i64: 1, 20, 512>}, {pipeline_mode = #tpu.pipeline_mode<synchronous>, transform_indices = @transform_1, window_bounds = array<i64: 9, 512, 128>}, {pipeline_mode = #tpu.pipeline_mode<synchronous>, transform_indices = @transform_2, window_bounds = array<i64: 1, 128>}, {transform_indices = @transform_3, window_bounds = array<i64: 1, 8, 128>}]} {
    %cst = arith.constant 0.000000e+00 : f32
    %0 = vector.broadcast %cst : f32 to vector<8x128xf32>
    %c0 = arith.constant 0 : index
    %c0_0 = arith.constant 0 : index
    %c0_1 = arith.constant 0 : index
    %1 = vector.load %arg1[%c0, %c0_0, %c0_1] : memref<1x20x512xbf16, #tpu.memory_space<vmem>>, vector<1x8x512xbf16>
    %2 = vector.shape_cast %1 : vector<1x8x512xbf16> to vector<8x512xbf16>
    %c0_2 = arith.constant 0 : index
    %c0_3 = arith.constant 0 : index
    %c0_4 = arith.constant 0 : index
    %3 = vector.load %arg2[%c0_2, %c0_3, %c0_4] : memref<9x512x128xbf16, #tpu.memory_space<vmem>>, vector<1x512x128xbf16>
    %4 = vector.shape_cast %3 : vector<1x512x128xbf16> to vector<512x128xbf16>
    %cst_5 = arith.constant dense<0.000000e+00> : vector<8x128xf32>
    %5 = tpu.matmul %2, %4, %cst_5 {dimension_numbers = #tpu.dot_dimension_numbers<[1], [0], [0], [1], [0, 0, 1, 1], [], []>} : vector<8x512xbf16>, vector<512x128xbf16>, vector<8x128xf32> -> vector<8x128xf32>
    %6 = arith.addf %0, %5 : vector<8x128xf32>
    %c0_6 = arith.constant 0 : index
    %c1 = arith.constant 1 : index
    %c0_7 = arith.constant 0 : index
    %7 = vector.load %arg1[%c0_6, %c1, %c0_7] : memref<1x20x512xbf16, #tpu.memory_space<vmem>>, vector<1x8x512xbf16>
    %8 = vector.shape_cast %7 : vector<1x8x512xbf16> to vector<8x512xbf16>
    %c1_8 = arith.constant 1 : index
    %c0_9 = arith.constant 0 : index
    %c0_10 = arith.constant 0 : index
    %9 = vector.load %arg2[%c1_8, %c0_9, %c0_10] : memref<9x512x128xbf16, #tpu.memory_space<vmem>>, vector<1x512x128xbf16>
    %10 = vector.shape_cast %9 : vector<1x512x128xbf16> to vector<512x128xbf16>
    %cst_11 = arith.constant dense<0.000000e+00> : vector<8x128xf32>
    %11 = tpu.matmul %8, %10, %cst_11 {dimension_numbers = #tpu.dot_dimension_numbers<[1], [0], [0], [1], [0, 0, 1, 1], [], []>} : vector<8x512xbf16>, vector<512x128xbf16>, vector<8x128xf32> -> vector<8x128xf32>
    %12 = arith.addf %6, %11 : vector<8x128xf32>
    %c0_12 = arith.constant 0 : index
    %c2 = arith.constant 2 : index
    %c0_13 = arith.constant 0 : index
    %13 = vector.load %arg1[%c0_12, %c2, %c0_13] : memref<1x20x512xbf16, #tpu.memory_space<vmem>>, vector<1x8x512xbf16>
    %14 = vector.shape_cast %13 : vector<1x8x512xbf16> to vector<8x512xbf16>
    %c2_14 = arith.constant 2 : index
    %c0_15 = arith.constant 0 : index
    %c0_16 = arith.constant 0 : index
    %15 = vector.load %arg2[%c2_14, %c0_15, %c0_16] : memref<9x512x128xbf16, #tpu.memory_space<vmem>>, vector<1x512x128xbf16>
    %16 = vector.shape_cast %15 : vector<1x512x128xbf16> to vector<512x128xbf16>
    %cst_17 = arith.constant dense<0.000000e+00> : vector<8x128xf32>
    %17 = tpu.matmul %14, %16, %cst_17 {dimension_numbers = #tpu.dot_dimension_numbers<[1], [0], [0], [1], [0, 0, 1, 1], [], []>} : vector<8x512xbf16>, vector<512x128xbf16>, vector<8x128xf32> -> vector<8x128xf32>
    %18 = arith.addf %12, %17 : vector<8x128xf32>
    %c0_18 = arith.constant 0 : index
    %c4 = arith.constant 4 : index
    %c0_19 = arith.constant 0 : index
    %19 = vector.load %arg1[%c0_18, %c4, %c0_19] : memref<1x20x512xbf16, #tpu.memory_space<vmem>>, vector<1x8x512xbf16>
    %20 = vector.shape_cast %19 : vector<1x8x512xbf16> to vector<8x512xbf16>
    %c3 = arith.constant 3 : index
    %c0_20 = arith.constant 0 : index
    %c0_21 = arith.constant 0 : index
    %21 = vector.load %arg2[%c3, %c0_20, %c0_21] : memref<9x512x128xbf16, #tpu.memory_space<vmem>>, vector<1x512x128xbf16>
    %22 = vector.shape_cast %21 : vector<1x512x128xbf16> to vector<512x128xbf16>
    %cst_22 = arith.constant dense<0.000000e+00> : vector<8x128xf32>
    %23 = tpu.matmul %20, %22, %cst_22 {dimension_numbers = #tpu.dot_dimension_numbers<[1], [0], [0], [1], [0, 0, 1, 1], [], []>} : vector<8x512xbf16>, vector<512x128xbf16>, vector<8x128xf32> -> vector<8x128xf32>
    %24 = arith.addf %18, %23 : vector<8x128xf32>
    %c0_23 = arith.constant 0 : index
    %c5 = arith.constant 5 : index
    %c0_24 = arith.constant 0 : index
    %25 = vector.load %arg1[%c0_23, %c5, %c0_24] : memref<1x20x512xbf16, #tpu.memory_space<vmem>>, vector<1x8x512xbf16>
    %26 = vector.shape_cast %25 : vector<1x8x512xbf16> to vector<8x512xbf16>
    %c4_25 = arith.constant 4 : index
    %c0_26 = arith.constant 0 : index
    %c0_27 = arith.constant 0 : index
    %27 = vector.load %arg2[%c4_25, %c0_26, %c0_27] : memref<9x512x128xbf16, #tpu.memory_space<vmem>>, vector<1x512x128xbf16>
    %28 = vector.shape_cast %27 : vector<1x512x128xbf16> to vector<512x128xbf16>
    %cst_28 = arith.constant dense<0.000000e+00> : vector<8x128xf32>
    %29 = tpu.matmul %26, %28, %cst_28 {dimension_numbers = #tpu.dot_dimension_numbers<[1], [0], [0], [1], [0, 0, 1, 1], [], []>} : vector<8x512xbf16>, vector<512x128xbf16>, vector<8x128xf32> -> vector<8x128xf32>
    %30 = arith.addf %24, %29 : vector<8x128xf32>
    %c0_29 = arith.constant 0 : index
    %c6 = arith.constant 6 : index
    %c0_30 = arith.constant 0 : index
    %31 = vector.load %arg1[%c0_29, %c6, %c0_30] : memref<1x20x512xbf16, #tpu.memory_space<vmem>>, vector<1x8x512xbf16>
    %32 = vector.shape_cast %31 : vector<1x8x512xbf16> to vector<8x512xbf16>
    %c5_31 = arith.constant 5 : index
    %c0_32 = arith.constant 0 : index
    %c0_33 = arith.constant 0 : index
    %33 = vector.load %arg2[%c5_31, %c0_32, %c0_33] : memref<9x512x128xbf16, #tpu.memory_space<vmem>>, vector<1x512x128xbf16>
    %34 = vector.shape_cast %33 : vector<1x512x128xbf16> to vector<512x128xbf16>
    %cst_34 = arith.constant dense<0.000000e+00> : vector<8x128xf32>
    %35 = tpu.matmul %32, %34, %cst_34 {dimension_numbers = #tpu.dot_dimension_numbers<[1], [0], [0], [1], [0, 0, 1, 1], [], []>} : vector<8x512xbf16>, vector<512x128xbf16>, vector<8x128xf32> -> vector<8x128xf32>
    %36 = arith.addf %30, %35 : vector<8x128xf32>
    %c0_35 = arith.constant 0 : index
    %c8 = arith.constant 8 : index
    %c0_36 = arith.constant 0 : index
    %37 = vector.load %arg1[%c0_35, %c8, %c0_36] : memref<1x20x512xbf16, #tpu.memory_space<vmem>>, vector<1x8x512xbf16>
    %38 = vector.shape_cast %37 : vector<1x8x512xbf16> to vector<8x512xbf16>
    %c6_37 = arith.constant 6 : index
    %c0_38 = arith.constant 0 : index
    %c0_39 = arith.constant 0 : index
    %39 = vector.load %arg2[%c6_37, %c0_38, %c0_39] : memref<9x512x128xbf16, #tpu.memory_space<vmem>>, vector<1x512x128xbf16>
    %40 = vector.shape_cast %39 : vector<1x512x128xbf16> to vector<512x128xbf16>
    %cst_40 = arith.constant dense<0.000000e+00> : vector<8x128xf32>
    %41 = tpu.matmul %38, %40, %cst_40 {dimension_numbers = #tpu.dot_dimension_numbers<[1], [0], [0], [1], [0, 0, 1, 1], [], []>} : vector<8x512xbf16>, vector<512x128xbf16>, vector<8x128xf32> -> vector<8x128xf32>
    %42 = arith.addf %36, %41 : vector<8x128xf32>
    %c0_41 = arith.constant 0 : index
    %c9 = arith.constant 9 : index
    %c0_42 = arith.constant 0 : index
    %43 = vector.load %arg1[%c0_41, %c9, %c0_42] : memref<1x20x512xbf16, #tpu.memory_space<vmem>>, vector<1x8x512xbf16>
    %44 = vector.shape_cast %43 : vector<1x8x512xbf16> to vector<8x512xbf16>
    %c7 = arith.constant 7 : index
    %c0_43 = arith.constant 0 : index
    %c0_44 = arith.constant 0 : index
    %45 = vector.load %arg2[%c7, %c0_43, %c0_44] : memref<9x512x128xbf16, #tpu.memory_space<vmem>>, vector<1x512x128xbf16>
    %46 = vector.shape_cast %45 : vector<1x512x128xbf16> to vector<512x128xbf16>
    %cst_45 = arith.constant dense<0.000000e+00> : vector<8x128xf32>
    %47 = tpu.matmul %44, %46, %cst_45 {dimension_numbers = #tpu.dot_dimension_numbers<[1], [0], [0], [1], [0, 0, 1, 1], [], []>} : vector<8x512xbf16>, vector<512x128xbf16>, vector<8x128xf32> -> vector<8x128xf32>
    %48 = arith.addf %42, %47 : vector<8x128xf32>
    %c0_46 = arith.constant 0 : index
    %c10 = arith.constant 10 : index
    %c0_47 = arith.constant 0 : index
    %49 = vector.load %arg1[%c0_46, %c10, %c0_47] : memref<1x20x512xbf16, #tpu.memory_space<vmem>>, vector<1x8x512xbf16>
    %50 = vector.shape_cast %49 : vector<1x8x512xbf16> to vector<8x512xbf16>
    %c8_48 = arith.constant 8 : index
    %c0_49 = arith.constant 0 : index
    %c0_50 = arith.constant 0 : index
    %51 = vector.load %arg2[%c8_48, %c0_49, %c0_50] : memref<9x512x128xbf16, #tpu.memory_space<vmem>>, vector<1x512x128xbf16>
    %52 = vector.shape_cast %51 : vector<1x512x128xbf16> to vector<512x128xbf16>
    %cst_51 = arith.constant dense<0.000000e+00> : vector<8x128xf32>
    %53 = tpu.matmul %50, %52, %cst_51 {dimension_numbers = #tpu.dot_dimension_numbers<[1], [0], [0], [1], [0, 0, 1, 1], [], []>} : vector<8x512xbf16>, vector<512x128xbf16>, vector<8x128xf32> -> vector<8x128xf32>
    %54 = arith.addf %48, %53 : vector<8x128xf32>
    %c0_52 = arith.constant 0 : index
    %c0_53 = arith.constant 0 : index
    %55 = vector.load %arg3[%c0_52, %c0_53] : memref<1x128xf32, #tpu.memory_space<vmem>>, vector<1x128xf32>
    %56 = vector.broadcast %55 : vector<1x128xf32> to vector<8x128xf32>
    %57 = arith.addf %54, %56 : vector<8x128xf32>
    %c0_54 = arith.constant 0 : index
    %c0_55 = arith.constant 0 : index
    %c0_56 = arith.constant 0 : index
    %58 = vector.load %arg4[%c0_54, %c0_55, %c0_56] : memref<1x8x128xf32, #tpu.memory_space<vmem>>, vector<1x8x128xf32>
    %59 = vector.shape_cast %58 : vector<1x8x128xf32> to vector<8x128xf32>
    %60 = vector.shape_cast %57 : vector<8x128xf32> to vector<1x8x128xf32>
    tpu.vector_store %arg4[%c0_54, %c0_55, %c0_56], %60 {strides = array<i32>} : memref<1x8x128xf32, #tpu.memory_space<vmem>>, vector<1x8x128xf32>,
    return
  }
  func.func @transform_0(%arg0: i32) -> (i32, i32, i32) {
    %c0_i32 = arith.constant 0 : i32
    %c0_i32_0 = arith.constant 0 : i32
    %c0_i32_1 = arith.constant 0 : i32
    return %arg0, %c0_i32, %c0_i32_0 : i32, i32, i32
  }
  func.func @transform_1(%arg0: i32) -> (i32, i32, i32) {
    %c0_i32 = arith.constant 0 : i32
    %c0_i32_0 = arith.constant 0 : i32
    %c0_i32_1 = arith.constant 0 : i32
    %c0_i32_2 = arith.constant 0 : i32
    return %c0_i32, %c0_i32_0, %c0_i32_1 : i32, i32, i32
  }
  func.func @transform_2(%arg0: i32) -> (i32, i32) {
    %c0_i32 = arith.constant 0 : i32
    %c0_i32_0 = arith.constant 0 : i32
    %c0_i32_1 = arith.constant 0 : i32
    return %c0_i32, %c0_i32_0 : i32, i32
  }
  func.func @transform_3(%arg0: i32) -> (i32, i32, i32) {
    %c0_i32 = arith.constant 0 : i32
    %c0_i32_0 = arith.constant 0 : i32
    %c0_i32_1 = arith.constant 0 : i32
    return %arg0, %c0_i32, %c0_i32_0 : i32, i32, i32
  }
}

</mosaic_0001>

<bundles_post_ra>
// kernel: _lambda_.5
= control target key start
LH: loop header
LB: loop body
LE: loop exit
PB: predicated region body
PF: predicated region fallthrough
CT: control target
= control target key end

     0   :  { %8 = vsyncpa [#allocation3], 0  ;;  %s761_s0 = inlined_call_operand.vmem [shape: bf16[2,64,27], index: 0, kind: input, shape index: {}]   ;;  %s762_s1 = inlined_call_operand.hbm [shape: bf16[27,64], index: 1, kind: input, shape index: {}]   ;;  %s763_s2 = inlined_call_operand.hbm [shape: f32[1,64], index: 2, kind: input, shape index: {}]   ;;  %s764_s3 = inlined_call_operand.vmem [shape: bf16[2,64,64], index: 3, kind: output, shape index: {}]  }
   0x1   :  { %9 = vsyncpa [#allocation5], 0  ;;  %s674_s12 = smov 0  }
   0x2 LB: > { %s680_s13 = sadd.s32 4294967295, %s647_s12   ;;  %p479_p0 = scmp.ge.s32.totalorder %s647_s12, 1  ;;  %s647_s12 = sphi %s674_s12, %s15_s12  }
   0x3   : > { %p114_p1 = scmp.lt.s32.totalorder %s647_s12, 3  ;;  %s649_s14 = smov [#allocation2]  }
   0x4   : > { %s126_s15 = sshll.u32 %s649_s14, 4  ;;  %p558_p3 = scmp.eq.s32.totalorder %s680_s13, 0  ;;  %s127_s15 = int_to_ptr.vmem [resolvable:$true] %s126_s15 }
   0x5   : > { %p684_p2 = pnand %p479_p0, %p114_p1  ;;  %s650_s17 = smov [#allocation4]  }
   0x6   : > { %s140_s18 = sshll.u32 %s650_s17, 4  ;;  %s592_s20 = scalar_lea.vmem %s127_s15, 256  ;;  %s141_s18 = int_to_ptr.vmem [resolvable:$true] %s140_s18 }
   0x7   : > { %p551_p4 = pneg %p684_p2  ;;  %p593_p7 = scmp.ne.s32.totalorder %s127_s15, %s592_s20 }
   0x8   : > { %p600_p10 = scmp.lt.s32.totalorder %s127_s15, %s127_s15  ;;  %p601_p11 = scmp.lt.s32.totalorder %s592_s20, %s592_s20 }
   0x9   : > { %p693_p5 = pnand %p558_p3, %p551_p4 }
   0xa   : > { %p602_p12 = por %p601_p11, %p600_p10 }
   0xb   : > { %p583_p6 = pneg %p693_p5 }
   0xd   : > { %p595_p8 = pnand %p593_p7, %p583_p6 }
   0xf   : > { %p596_p9 = pneg %p595_p8 }
  0x11   : > { %p603_p13 = pnand %p602_p12, %p596_p9 }
  0x13   : > { %606 = shalt.err (!%p603_p13)
}
  0x14   : > { %s651_s21 = smov 64   ;;  %s652_s22 = smov 4  }
  0x15   : > { %554 = dma.hbm_to_vmem [thread:$0]  (!%p693_p5), %s762_s1, 256, %s127_s15, [#allocation3], %s651_s21, %s651_s21, %s652_s22  }
  0x16   : > { %s618_s25 = scalar_lea.vmem %s141_s18, 16  ;;  %s625_s26 = scalar_lea.vmem %s141_s18, 32 }
  0x17   : > { %p619_p0 = scmp.ne.s32.totalorder %s141_s18, %s618_s25  ;;  %p626_p7 = scmp.lt.s32.totalorder %s141_s18, %s141_s18 }
  0x18   : > { %p627_p8 = scmp.lt.s32.totalorder %s625_s26, %s618_s25 }
  0x19   : > { %p621_p1 = pnand %p619_p0, %p583_p6 }
  0x1a   : > { %p628_p9 = por %p627_p8, %p626_p7 }
  0x1b   : > { %p622_p4 = pneg %p621_p1 }
  0x1d   : > { %p629_p10 = pnand %p628_p9, %p622_p4 }
  0x1f   : > { %632 = shalt.err (!%p629_p10)
}
  0x20   : > { %557 = dma.hbm_to_vmem [thread:$0]  (!%p693_p5), %s763_s2, 16, %s141_s18, [#allocation5]  }
  0x21   : > { %161 = sbr.rel (%p684_p2) target bundleno = 263 (0x107), region = 32 }
  0x26   : > { %638 = dma.done.wait (%p558_p3), [#allocation3], 256  }
  0x27   : > { %640 = vsyncadd (%p558_p3), [#allocation3], 4294967040 }
  0x28   : > { %642 = dma.done.wait (%p558_p3), [#allocation5], 16  }
  0x29   : > { %644 = vsyncadd (%p558_p3), [#allocation5], 4294967280  ;;  %vm263_vm0 = vcmask 1044480   ;;  %p189_p6 = scmp.lt.s32.totalorder %s680_s13, 1  ;;  %vm264_vm1 = vcmask 1045504   ;;  %v653_v0 = vmov 65535  }
  0x2a   : > { %v265_v1 = vsel %vm263_vm0, 4294967295, %v653_v0  ;;  %v575_v3 = vld [vmem:[#allocation2 + $0x8] sm:$0x3f]   ;;  %v576_v4 = vld [vmem:[#allocation2] sm:$0xff]   ;;  %vm250_vm2 = vcmask 220160   ;;  %vm391_vm5 = vcmask 519168  }
  0x2b   : > { %s768_s13 = smov (!%p189_p6, %s680_s13), 1  ;;  %v266_v2 = vsel %vm264_vm1, %v265_v1, 0  ;;  %v490_v10 = vld [vmem:[#allocation4] ss:$0 sm:$0xff] }
  0x2c   : > { %s511_s29 = sshll.u32 %s768_s13, 5  ;;  %v268_v5 = vand.u32 %v575_v3, %v266_v2 }
  0x2d   : > { %s193_s5 = scalar_lea.vmem %s761_s0, %s511_s29  ;;  %s740_s8 = scalar_lea.vmem %s764_s3, %s511_s29 }
  0x2e   : > { %v577_v6 = vld [vmem:[%s193_s5] sm:$0xff]   ;;  %v578_v7 = vld [vmem:[%s193_s5 + $0x10] sm:$0xff]   ;;  %527 = vmatprep.subr.bf16.mxu0 %v268_v5  ;;  %539 = vmatprep.subr.bf16.mxu1 %v268_v5  ;;  %v579_v8 = vld [vmem:[%s193_s5 + $0x8] sm:$0xff]  }
  0x2f   : > { %528 = vmatpush3.bf16.msra.mxu0 %v268_v5  ;;  %541 = vmatpush3.bf16.msra.mxu1 %v268_v5  ;;  %v580_v9 = vld [vmem:[%s193_s5 + $0x18] sm:$0xff]  }
  0x30   : > { %529 = vmatprep.subr.bf16.mxu0 %v576_v4  ;;  %540 = vmatprep.subr.bf16.mxu1 %v576_v4 }
  0x31   : > { %531 = vmatprep.mubr.msk.bf16.mxu0 %vm250_vm2, %v577_v6  ;;  %535 = vmatprep.mubr.msk.bf16.mxu1 %vm250_vm2, %v578_v7 }
  0x33   : > { %530 = vmatpush3.bf16.msra.mxu0 %v576_v4  ;;  %542 = vmatpush3.bf16.msra.mxu1 %v576_v4 }
  0x36   : > { %532 = vmatmul.mubr.msk.bf16.vlgmr.msra.gmra.mxu0 %vm250_vm2, %v579_v8  ;;  %536 = vmatmul.mubr.msk.bf16.vlgmr.msra.gmra.mxu1 %vm250_vm2, %v580_v9 }
  0xf6   : > { %v533_v11 = vpop.f32.mrf.mxu0  ;;  %v537_v12 = vpop.f32.mrf.mxu1 }
  0xf7   : > { %v313_v13 = vadd.f32 %v533_v11, %v490_v10  ;;  %v329_v14 = vadd.f32 %v537_v12, %v490_v10 }
  0xf8   : > { %v304_v15 = vpop.f32.mrf.mxu0  ;;  %v320_v16 = vpop.f32.mrf.mxu1 }
  0xf9   : > { %vm337_vm3 = vcmp.gt.f32.partialorder %v313_v13, 0.0  ;;  %v345_v17 = vmul.f32 0.2, %v313_v13  ;;  %vm341_vm4 = vcmp.gt.f32.partialorder %v329_v14, 0.0  ;;  %v349_v18 = vmul.f32 0.2, %v329_v14 }
  0xfa   : > { %v305_v19 = vadd.f32 %v490_v10, %v304_v15  ;;  %v321_v20 = vadd.f32 %v490_v10, %v320_v16  ;;  %v534_v21 = vpop.f32.mrf.mxu0  ;;  %v538_v22 = vpop.f32.mrf.mxu1 }
  0xfb   : > { %v353_v23 = vsel %vm337_vm3, %v313_v13, %v345_v17  ;;  %v357_v24 = vsel %vm341_vm4, %v329_v14, %v349_v18  ;;  %v316_v25 = vadd.f32 %v534_v21, %v490_v10  ;;  %v332_v26 = vadd.f32 %v538_v22, %v490_v10 }
  0xfc   : > { %v515_v27 = vpack.c.bf16 %v353_v23, %v353_v23  ;;  %v519_v28 = vpack.c.bf16 %v357_v24, %v357_v24  ;;  %vm335_vm6 = vcmp.gt.f32.partialorder %v305_v19, 0.0  ;;  %v343_v29 = vmul.f32 0.2, %v305_v19  ;;  %v307_v30 = vpop.f32.mrf.mxu0  ;;  %v323_v31 = vpop.f32.mrf.mxu1 }
  0xfd   : > { %vm339_vm7 = vcmp.gt.f32.partialorder %v321_v20, 0.0  ;;  %v347_v32 = vmul.f32 0.2, %v321_v20  ;;  %vm338_vm8 = vcmp.gt.f32.partialorder %v316_v25, 0.0  ;;  %v346_v33 = vmul.f32 0.2, %v316_v25 }
  0xfe   : > { %394 = vst.msk [vmem:[%s740_s8 + $0x8] sm:$0xf] %vm391_vm5, %v515_v27  ;;  %398 = vst.msk [vmem:[%s740_s8 + $0x18] sm:$0xf] %vm391_vm5, %v519_v28  ;;  %v351_v34 = vsel %vm335_vm6, %v305_v19, %v343_v29  ;;  %vm342_vm9 = vcmp.gt.f32.partialorder %v332_v26, 0.0  ;;  %v308_v36 = vadd.f32 %v490_v10, %v307_v30  ;;  %v324_v40 = vadd.f32 %v490_v10, %v323_v31 }
  0xff   : > { %v350_v35 = vmul.f32 0.2, %v332_v26  ;;  %v513_v37 = vpack.c.bf16 %v351_v34, %v351_v34  ;;  %v355_v38 = vsel %vm339_vm7, %v321_v20, %v347_v32  ;;  %v354_v39 = vsel %vm338_vm8, %v316_v25, %v346_v33 }
 0x100   : > { %v517_v41 = vpack.c.bf16 %v355_v38, %v355_v38  ;;  %v516_v42 = vpack.c.bf16 %v354_v39, %v354_v39  ;;  %vm336_vm10 = vcmp.gt.f32.partialorder %v308_v36, 0.0  ;;  %v344_v45 = vmul.f32 0.2, %v308_v36 }
 0x101   : > { %v358_v43 = vsel %vm342_vm9, %v332_v26, %v350_v35  ;;  %392 = vst.msk [vmem:[%s740_s8] sm:$0xf] %vm391_vm5, %v513_v37  ;;  %vm340_vm11 = vcmp.gt.f32.partialorder %v324_v40, 0.0  ;;  %v348_v46 = vmul.f32 0.2, %v324_v40 }
 0x102   : > { %v520_v44 = vpack.c.bf16 %v358_v43, %v358_v43  ;;  %396 = vst.msk [vmem:[%s740_s8 + $0x10] sm:$0xf] %vm391_vm5, %v517_v41  ;;  %395 = vst.msk [vmem:[%s740_s8 + $0xc] sm:$0xf] %vm391_vm5, %v516_v42  ;;  %v352_v47 = vsel %vm336_vm10, %v308_v36, %v344_v45 }
 0x103   : > { %v356_v48 = vsel %vm340_vm11, %v324_v40, %v348_v46  ;;  %v514_v49 = vpack.c.bf16 %v352_v47, %v352_v47 }
 0x104   : > { %399 = vst.msk [vmem:[%s740_s8 + $0x1c] sm:$0xf] %vm391_vm5, %v520_v44  ;;  %v518_v50 = vpack.c.bf16 %v356_v48, %v356_v48 }
 0x105   : > { %393 = vst.msk [vmem:[%s740_s8 + $0x4] sm:$0xf] %vm391_vm5, %v514_v49 }
 0x106   : > { %397 = vst.msk [vmem:[%s740_s8 + $0x14] sm:$0xf] %vm391_vm5, %v518_v50 }
 0x107 PF: > { %s15_s12 = sadd.s32 1, %s647_s12  }
 0x108   : > { %p12_p2 = scmp.ge.s32.totalorder %s15_s12, 4  }
 0x10a   :  { %14 = sbr.rel (!%p12_p2) target bundleno = 2 (0x2), region = 71 }
 0x10f   :  { %421 = vsyncpa [#allocation3], 1 }
 0x110   :  { %423 = vsyncpa [#allocation3 + $0x1], 1 }
 0x111   :  { %424 = vsyncpa [#allocation5], 1 }

// kernel: _lambda_.6
= control target key start
LH: loop header
LB: loop body
LE: loop exit
PB: predicated region body
PF: predicated region fallthrough
CT: control target
= control target key end

     0   :  { %8 = vsyncpa [#allocation3], 0  ;;  %s1147_s0 = inlined_call_operand.vmem [shape: bf16[2,16,576], index: 0, kind: input, shape index: {}]   ;;  %s1148_s1 = inlined_call_operand.hbm [shape: bf16[576,128], index: 1, kind: input, shape index: {}]   ;;  %s1149_s2 = inlined_call_operand.hbm [shape: f32[1,128], index: 2, kind: input, shape index: {}]   ;;  %s1150_s3 = inlined_call_operand.vmem [shape: bf16[2,16,128], index: 3, kind: output, shape index: {}]  }
   0x1   :  { %9 = vsyncpa [#allocation5], 0  ;;  %s1074_s12 = smov 0  }
   0x2 LB: > { %s1080_s13 = sadd.s32 4294967295, %s1046_s12   ;;  %p775_p0 = scmp.ge.s32.totalorder %s1046_s12, 1  ;;  %s1046_s12 = sphi %s1074_s12, %s15_s12  }
   0x3   : > { %p114_p1 = scmp.lt.s32.totalorder %s1046_s12, 3  ;;  %s1048_s14 = smov [#allocation2]  }
   0x4   : > { %s126_s15 = sshll.u32 %s1048_s14, 4  ;;  %p917_p3 = scmp.eq.s32.totalorder %s1080_s13, 0  ;;  %s127_s15 = int_to_ptr.vmem [resolvable:$true] %s126_s15 }
   0x5   : > { %p1084_p2 = pnand %p775_p0, %p114_p1  ;;  %s1049_s17 = smov [#allocation4]  }
   0x6   : > { %s140_s18 = sshll.u32 %s1049_s17, 4  ;;  %s991_s20 = scalar_lea.vmem %s127_s15, 4608  ;;  %s141_s18 = int_to_ptr.vmem [resolvable:$true] %s140_s18 }
   0x7   : > { %p910_p4 = pneg %p1084_p2  ;;  %p992_p7 = scmp.ne.s32.totalorder %s127_s15, %s991_s20 }
   0x8   : > { %p999_p10 = scmp.lt.s32.totalorder %s127_s15, %s127_s15  ;;  %p1000_p11 = scmp.lt.s32.totalorder %s991_s20, %s991_s20 }
   0x9   : > { %p1093_p5 = pnand %p917_p3, %p910_p4 }
   0xa   : > { %p1001_p12 = por %p1000_p11, %p999_p10 }
   0xb   : > { %p982_p6 = pneg %p1093_p5 }
   0xd   : > { %p994_p8 = pnand %p992_p7, %p982_p6 }
   0xf   : > { %p995_p9 = pneg %p994_p8 }
  0x11   : > { %p1002_p13 = pnand %p1001_p12, %p995_p9 }
  0x13   : > { %1005 = shalt.err (!%p1002_p13)
}
  0x14   : > { %s1050_s21 = smov 64   ;;  %s1051_s22 = smov 4  }
  0x15   : > { %913 = dma.hbm_to_vmem [thread:$0]  (!%p1093_p5), %s1148_s1, 4608, %s127_s15, [#allocation3], %s1050_s21, %s1050_s21, %s1051_s22  }
  0x16   : > { %s1017_s25 = scalar_lea.vmem %s141_s18, 16  ;;  %s1024_s26 = scalar_lea.vmem %s141_s18, 32 }
  0x17   : > { %p1018_p0 = scmp.ne.s32.totalorder %s141_s18, %s1017_s25  ;;  %p1025_p7 = scmp.lt.s32.totalorder %s141_s18, %s141_s18 }
  0x18   : > { %p1026_p8 = scmp.lt.s32.totalorder %s1024_s26, %s1017_s25 }
  0x19   : > { %p1020_p1 = pnand %p1018_p0, %p982_p6 }
  0x1a   : > { %p1027_p9 = por %p1026_p8, %p1025_p7 }
  0x1b   : > { %p1021_p4 = pneg %p1020_p1 }
  0x1d   : > { %p1028_p10 = pnand %p1027_p9, %p1021_p4 }
  0x1f   : > { %1031 = shalt.err (!%p1028_p10)
}
  0x20   : > { %916 = dma.hbm_to_vmem [thread:$0]  (!%p1093_p5), %s1149_s2, 16, %s141_s18, [#allocation5]  }
  0x21   : > { %161 = sbr.rel (%p1084_p2) target bundleno = 335 (0x14f), region = 32 }
  0x26   : > { %1037 = dma.done.wait (%p917_p3), [#allocation3], 4608  }
  0x27   : > { %1039 = vsyncadd (%p917_p3), [#allocation3], 4294962688 }
  0x28   : > { %1041 = dma.done.wait (%p917_p3), [#allocation5], 16  }
  0x29   : > { %1043 = vsyncadd (%p917_p3), [#allocation5], 4294967280  ;;  %v935_v0 = vld [vmem:[#allocation2 + $0x78] sm:$0xff]   ;;  %v939_v4 = vld [vmem:[#allocation2 + $0x70] sm:$0xff]   ;;  %p189_p2 = scmp.lt.s32.totalorder %s1080_s13, 1  ;;  %v1052_v33 = vmov 0.0  }
  0x2a   : > { %v936_v1 = vld [vmem:[#allocation2 + $0x38] sm:$0xff]   ;;  %840 = vmatprep.subr.bf16.mxu0 %v935_v0  ;;  %v940_v5 = vld [vmem:[#allocation2 + $0x30] sm:$0xff]   ;;  %v943_v8 = vld [vmem:[#allocation2 + $0x68] sm:$0xff]   ;;  %vm1053_vm0 = vmmov 0   ;;  %vm526_vm1 = vcmask 523264  }
  0x2b   : > { %v937_v2 = vld [vmem:[#allocation2 + $0xf8] sm:$0xff]   ;;  %841 = vmatpush3.bf16.msra.mxu0 %v936_v1  ;;  %v941_v6 = vld [vmem:[#allocation2 + $0xf0] sm:$0xff]   ;;  %v944_v9 = vld [vmem:[#allocation2 + $0x28] sm:$0xff]   ;;  %s1154_s13 = smov (!%p189_p2, %s1080_s13), 1 }
  0x2c   : > { %v938_v3 = vld [vmem:[#allocation2 + $0xb8] sm:$0xff]   ;;  %862 = vmatprep.subr.bf16.mxu1 %v937_v2  ;;  %842 = vmatprep.subr.bf16.mxu0 %v939_v4  ;;  %v942_v7 = vld [vmem:[#allocation2 + $0xb0] sm:$0xff]   ;;  %v945_v10 = vld [vmem:[#allocation2 + $0xe8] sm:$0xff]   ;;  %s901_s29 = smul.u32 40, %s1154_s13  ;;  %s832_s6 = sshll.u32 %s1154_s13, 3 }
  0x2d   : > { %863 = vmatpush3.bf16.msra.mxu1 %v938_v3  ;;  %v946_v11 = vld [vmem:[#allocation2 + $0xa8] sm:$0xff]   ;;  %v947_v12 = vld [vmem:[#allocation2 + $0x60] sm:$0xff]   ;;  %v951_v16 = vld [vmem:[#allocation2 + $0x58] sm:$0xff]   ;;  %s198_s9 = scalar_lea.vmem %s1150_s3, %s832_s6 }
  0x2e   : > { %864 = vmatprep.subr.bf16.mxu1 %v941_v6  ;;  %v948_v13 = vld [vmem:[#allocation2 + $0x20] sm:$0xff]   ;;  %v952_v17 = vld [vmem:[#allocation2 + $0x18] sm:$0xff]   ;;  %v955_v20 = vld [vmem:[#allocation2 + $0x50] sm:$0xff]   ;;  %s1133_s5 = scalar_lea.vmem %s1147_s0, %s901_s29 }
  0x2f   : > { %843 = vmatpush3.bf16.msra.mxu0 %v940_v5  ;;  %v949_v14 = vld [vmem:[#allocation2 + $0xe0] sm:$0xff]   ;;  %v953_v18 = vld [vmem:[#allocation2 + $0xd8] sm:$0xff]   ;;  %v956_v21 = vld [vmem:[#allocation2 + $0x10] sm:$0xff]  }
  0x30   : > { %844 = vmatprep.subr.bf16.mxu0 %v943_v8  ;;  %v950_v15 = vld [vmem:[#allocation2 + $0xa0] sm:$0xff]   ;;  %v954_v19 = vld [vmem:[#allocation2 + $0x98] sm:$0xff]   ;;  %v957_v22 = vld [vmem:[#allocation2 + $0xd0] sm:$0xff]  }
  0x31   : > { %865 = vmatpush3.bf16.msra.mxu1 %v942_v7  ;;  %v958_v23 = vld [vmem:[#allocation2 + $0x90] sm:$0xff]   ;;  %v959_v24 = vld [vmem:[#allocation2 + $0x48] sm:$0xff]   ;;  %v963_v28 = vld [vmem:[#allocation2 + $0x40] sm:$0xff]  }
  0x32   : > { %866 = vmatprep.subr.bf16.mxu1 %v945_v10  ;;  %v960_v25 = vld [vmem:[#allocation2 + $0x8] sm:$0xff]   ;;  %v964_v29 = vld [vmem:[#allocation2] sm:$0xff]   ;;  %v973_v37 = vld [vmem:[#allocation2 + $0x118] sm:$0xff]  }
  0x33   : > { %845 = vmatpush3.bf16.msra.mxu0 %v944_v9  ;;  %v961_v26 = vld [vmem:[#allocation2 + $0xc8] sm:$0xff]   ;;  %v965_v30 = vld [vmem:[#allocation2 + $0xc0] sm:$0xff]   ;;  %v974_v38 = vld [vmem:[#allocation2 + $0x110] sm:$0xff]  }
  0x34   : > { %846 = vmatprep.subr.bf16.mxu0 %v947_v12  ;;  %v962_v27 = vld [vmem:[#allocation2 + $0x88] sm:$0xff]   ;;  %v966_v31 = vld [vmem:[%s1133_s5] ss:$20 sps:$4 sm:$0xff]   ;;  %v968_v32 = vld [vmem:[%s1133_s5 + $0x4] ss:$20 sps:$4 sm:$0xff]  }
  0x35   : > { %867 = vmatpush3.bf16.msra.mxu1 %v946_v11  ;;  %v969_v34 = vld [vmem:[#allocation2 + $0x80] sm:$0xff]   ;;  %562 = vmatprep.mubr.bf16.mxu0 %v968_v32  ;;  %v970_v35 = vld [vmem:[%s1133_s5 + $0x8] ss:$20 sps:$4 sm:$0xff]  }
  0x36   : > { %868 = vmatprep.subr.bf16.mxu1 %v949_v14  ;;  %v972_v36 = vld [vmem:[%s1133_s5 + $0xc] ss:$20 sps:$4 sm:$0xff]   ;;  %v977_v41 = vld [vmem:[%s1133_s5 + $0x10] ss:$20 sps:$4 sm:$0xff]  }
  0x37   : > { %847 = vmatpush3.bf16.msra.mxu0 %v948_v13  ;;  %603 = vmatprep.mubr.bf16.mxu1 %v972_v36  ;;  %v975_v39 = vld [vmem:[#allocation2 + $0x108] sm:$0xff]   ;;  %v976_v40 = vld [vmem:[#allocation2 + $0x100] sm:$0xff]  }
  0x38   : > { %848 = vmatprep.subr.bf16.mxu0 %v951_v16  ;;  %v785_v50 = vld [vmem:[#allocation4] ss:$0 sm:$0xff] }
  0x39   : > { %869 = vmatpush3.bf16.msra.mxu1 %v950_v15 }
  0x3a   : > { %870 = vmatprep.subr.bf16.mxu1 %v953_v18 }
  0x3b   : > { %849 = vmatpush3.bf16.msra.mxu0 %v952_v17 }
  0x3c   : > { %850 = vmatprep.subr.bf16.mxu0 %v955_v20 }
  0x3d   : > { %871 = vmatpush3.bf16.msra.mxu1 %v954_v19 }
  0x3e   : > { %872 = vmatprep.subr.bf16.mxu1 %v957_v22 }
  0x3f   : > { %851 = vmatpush3.bf16.msra.mxu0 %v956_v21 }
  0x40   : > { %852 = vmatprep.subr.bf16.mxu0 %v959_v24 }
  0x41   : > { %873 = vmatpush3.bf16.msra.mxu1 %v958_v23 }
  0x42   : > { %874 = vmatprep.subr.bf16.mxu1 %v961_v26 }
  0x43   : > { %853 = vmatpush3.bf16.msra.mxu0 %v960_v25 }
  0x44   : > { %854 = vmatprep.subr.bf16.mxu0 %v963_v28 }
  0x45   : > { %875 = vmatpush3.bf16.msra.mxu1 %v962_v27 }
  0x46   : > { %876 = vmatprep.subr.bf16.mxu1 %v965_v30 }
  0x47   : > { %855 = vmatpush3.bf16.msra.mxu0 %v964_v29 }
  0x48   : > { %889 = vmatprep.subr.bf16.mxu0 %v1052_v33 }
  0x49   : > { %877 = vmatpush3.bf16.msra.mxu1 %v969_v34 }
  0x4a   : > { %563 = vmatmul.mubr.bf16.vlgmr.msra.gmra.mxu0 %v966_v31 }
  0x4b   : > { %897 = vmatprep.mubr.msk.bf16.mxu0 %vm1053_vm0, %v1052_v33  ;;  %890 = vmatpush3.bf16.msra.mxu0 %v973_v37 }
  0x4c   : > { %604 = vmatmul.mubr.bf16.vlgmr.msra.gmra.mxu1 %v970_v35  ;;  %891 = vmatprep.subr.bf16.mxu0 %v1052_v33 }
  0x4f   : > { %892 = vmatpush3.bf16.msra.mxu0 %v974_v38 }
  0x50   : > { %893 = vmatprep.subr.bf16.mxu0 %v1052_v33 }
  0x53   : > { %894 = vmatpush3.bf16.msra.mxu0 %v975_v39 }
  0x54   : > { %895 = vmatprep.subr.bf16.mxu0 %v1052_v33 }
  0x57   : > { %896 = vmatpush3.bf16.msra.mxu0 %v976_v40 }
  0x5a   : > { %898 = vmatmul.mubr.msk.bf16.vlgmr.msra.gmra.mxu0 %vm526_vm1, %v977_v41 }
 0x10a   : > { %v856_v42 = vpop.f32.mrf.mxu0 }
 0x10c   : > { %v857_v43 = vpop.f32.mrf.mxu0  ;;  %v878_v44 = vpop.f32.mrf.mxu1 }
 0x10d   : > { %v858_v49 = vadd.f32 %v857_v43, %v856_v42 }
 0x10e   : > { %v859_v45 = vpop.f32.mrf.mxu0  ;;  %v879_v46 = vpop.f32.mrf.mxu1 }
 0x10f   : > { %v565_v53 = vadd.f32 %v858_v49, %v785_v50  ;;  %v880_v54 = vadd.f32 %v879_v46, %v878_v44 }
 0x110   : > { %v860_v47 = vpop.f32.mrf.mxu0  ;;  %v881_v48 = vpop.f32.mrf.mxu1 }
 0x111   : > { %v861_v51 = vadd.f32 %v860_v47, %v859_v45  ;;  %v606_v58 = vadd.f32 %v880_v54, %v565_v53 }
 0x112   : > { %v882_v52 = vpop.f32.mrf.mxu1 }
 0x113   : > { %v568_v55 = vadd.f32 %v861_v51, %v785_v50  ;;  %v883_v56 = vadd.f32 %v882_v52, %v881_v48 }
 0x115   : > { %v609_v61 = vadd.f32 %v883_v56, %v568_v55 }
 0x11a   : > { %v646_v57 = vpop.f32.mrf.mxu0 }
 0x11b   : > { %v647_v60 = vadd.f32 %v646_v57, %v606_v58 }
 0x11c   : > { %v899_v59 = vpop.f32.mrf.mxu0 }
 0x11d   : > { %v661_v1 = vmul.f32 %v647_v60, %v647_v60 }
 0x11e   : > { %v649_v62 = vpop.f32.mrf.mxu0 }
 0x11f   : > { %v650_v63 = vadd.f32 %v649_v62, %v609_v61 }
 0x120   : > { %v900_v0 = vpop.f32.mrf.mxu0 }
 0x121   : > { %v653_v2 = vadd.f32 %v650_v63, %v647_v60  ;;  %v662_v3 = vmul.f32 %v650_v63, %v650_v63 }
 0x123   : > { %v654_v4 = vrot.slane %v653_v2, 4  ;;  %v663_v5 = vadd.f32 %v662_v3, %v661_v1 }
 0x125   : > { %v655_v6 = vadd.f32 %v654_v4, %v653_v2  ;;  %v664_v7 = vrot.slane %v663_v5, 4 }
 0x127   : > { %v656_v8 = vrot.slane %v655_v6, 2  ;;  %v665_v9 = vadd.f32 %v664_v7, %v663_v5 }
 0x129   : > { %v657_v10 = vadd.f32 %v656_v8, %v655_v6  ;;  %v666_v11 = vrot.slane %v665_v9, 2 }
 0x12b   : > { %v658_v12 = vrot.slane %v657_v10, 1  ;;  %v667_v13 = vadd.f32 %v666_v11, %v665_v9 }
 0x12d   : > { %v659_v14 = vadd.f32 %v658_v12, %v657_v10  ;;  %v668_v15 = vrot.slane %v667_v13, 1 }
 0x12f   : > { %v660_v16 = vmul.f32 0.0625, %v659_v14  ;;  %v669_v17 = vadd.f32 %v668_v15, %v667_v13 }
 0x131   : > { %v670_v18 = vmul.f32 0.0625, %v669_v17  ;;  %v671_v19 = vmul.f32 %v660_v16, %v660_v16  ;;  %v674_v23 = vsub.f32 %v647_v60, %v660_v16  ;;  %v675_v24 = vsub.f32 %v650_v63, %v660_v16 }
 0x133   : > { %v672_v20 = vsub.f32 %v670_v18, %v671_v19 }
 0x135   : > { %v673_v21 = vmax.f32 %v672_v20, 0.0 }
 0x137   : > { %v676_v22 = vadd.f32 1e-05, %v673_v21 }
 0x139   : > { %978 = vrsqrt.f32 %v676_v22 }
 0x146   : > { %v979_v25 = vpop.eup %978 }
 0x147   : > { %v678_v26 = vmul.f32 %v979_v25, %v674_v23  ;;  %v679_v27 = vmul.f32 %v979_v25, %v675_v24 }
 0x149   : > { %vm680_vm2 = vcmp.gt.f32.partialorder %v678_v26, 0.0  ;;  %vm681_vm3 = vcmp.gt.f32.partialorder %v679_v27, 0.0  ;;  %v682_v28 = vmul.f32 0.2, %v678_v26  ;;  %v683_v29 = vmul.f32 0.2, %v679_v27 }
 0x14b   : > { %v684_v30 = vsel %vm680_vm2, %v678_v26, %v682_v28  ;;  %v685_v31 = vsel %vm681_vm3, %v679_v27, %v683_v29 }
 0x14c   : > { %v838_v32 = vpack.c.bf16 %v685_v31, %v684_v30 }
 0x14e   : > { %839 = vst [vmem:[%s198_s9] sm:$0xff] %v838_v32  }
 0x14f PF: > { %s15_s12 = sadd.s32 1, %s1046_s12  }
 0x150   : > { %p12_p3 = scmp.ge.s32.totalorder %s15_s12, 4  }
 0x152   :  { %14 = sbr.rel (!%p12_p3) target bundleno = 2 (0x2), region = 71 }
 0x157   :  { %717 = vsyncpa [#allocation3], 1 }
 0x158   :  { %719 = vsyncpa [#allocation3 + $0x1], 1 }
 0x159   :  { %720 = vsyncpa [#allocation5], 1 }

// kernel: _lambda_.7
= control target key start
LH: loop header
LB: loop body
LE: loop exit
PB: predicated region body
PF: predicated region fallthrough
CT: control target
= control target key end

     0   :  { %s1854_s12 = smov 0   ;;  %s2344_s0 = inlined_call_operand.vmem [shape: bf16[2,4,1152], index: 0, kind: input, shape index: {}]   ;;  %s2345_s1 = inlined_call_operand.vmem [shape: bf16[1152,256], index: 1, kind: input, shape index: {}]   ;;  %s2346_s2 = inlined_call_operand.vmem [shape: f32[1,256], index: 2, kind: input, shape index: {}]   ;;  %s2347_s3 = inlined_call_operand.vmem [shape: bf16[2,4,256], index: 3, kind: output, shape index: {}]  }
   0x1 LB: > { %s1433_s13 = sadd.s32 4294967295, %s1830_s12   ;;  %p1437_p0 = scmp.ge.s32.totalorder %s1830_s12, 1  ;;  %s1830_s12 = sphi %s1854_s12, %s13_s12  }
   0x2   : > { %p137_p1 = scmp.lt.s32.totalorder %s1830_s12, 3 }
   0x4   : > { %p138_p2 = pnand %p1437_p0, %p137_p1 }
   0x5   : > { %p161_p3 = scmp.lt.s32.totalorder (!%p138_p2), %s1433_s13, 1 }
   0x6   : > { %141 = sbr.rel (%p138_p2) target bundleno = 414 (0x19e), region = 32 }
   0xb   : > { %v1602_v0 = vld [vmem:[%s2345_s1 + $0x74] ss:$8 sps:$4 sm:$0xff]   ;;  %v1604_v1 = vld [vmem:[%s2345_s1 + $0x70] ss:$8 sps:$4 sm:$0xff]   ;;  %v1608_v4 = vld [vmem:[%s2345_s1 + $0x64] ss:$8 sps:$4 sm:$0xff]   ;;  %v321_v35 = vlaneseq }
   0xc   : > { %1104 = vmatprep.subr.bf16.mxu0 %v1602_v0  ;;  %v1605_v2 = vld [vmem:[%s2345_s1 + $0x174] ss:$8 sps:$4 sm:$0xff]   ;;  %v1607_v3 = vld [vmem:[%s2345_s1 + $0x170] ss:$8 sps:$4 sm:$0xff]   ;;  %v1610_v5 = vld [vmem:[%s2345_s1 + $0x60] ss:$8 sps:$4 sm:$0xff]  }
   0xd   : > { %1105 = vmatpush1.bf16.msra.mxu0 %v1604_v1  ;;  %1145 = vmatprep.subr.bf16.mxu1 %v1605_v2  ;;  %v1611_v6 = vld [vmem:[%s2345_s1 + $0x164] ss:$8 sps:$4 sm:$0xff]   ;;  %v1613_v7 = vld [vmem:[%s2345_s1 + $0x160] ss:$8 sps:$4 sm:$0xff]   ;;  %v1614_v8 = vld [vmem:[%s2345_s1 + $0x54] ss:$8 sps:$4 sm:$0xff]  }
   0xe   : > { %1146 = vmatpush1.bf16.msra.mxu1 %v1607_v3  ;;  %1106 = vmatprep.subr.bf16.mxu0 %v1608_v4  ;;  %v1616_v9 = vld [vmem:[%s2345_s1 + $0x50] ss:$8 sps:$4 sm:$0xff]   ;;  %v1617_v10 = vld [vmem:[%s2345_s1 + $0x154] ss:$8 sps:$4 sm:$0xff]   ;;  %v1620_v11 = vld [vmem:[%s2345_s1 + $0x44] ss:$8 sps:$4 sm:$0xff]  }
   0xf   : > { %1147 = vmatprep.subr.bf16.mxu1 %v1611_v6  ;;  %v1619_v12 = vld [vmem:[%s2345_s1 + $0x150] ss:$8 sps:$4 sm:$0xff]   ;;  %v1623_v13 = vld [vmem:[%s2345_s1 + $0x144] ss:$8 sps:$4 sm:$0xff]   ;;  %v1622_v14 = vld [vmem:[%s2345_s1 + $0x40] ss:$8 sps:$4 sm:$0xff]  }
  0x10   : > { %v1626_v15 = vld [vmem:[%s2345_s1 + $0x34] ss:$8 sps:$4 sm:$0xff]   ;;  %v1625_v16 = vld [vmem:[%s2345_s1 + $0x140] ss:$8 sps:$4 sm:$0xff]   ;;  %v1628_v18 = vld [vmem:[%s2345_s1 + $0x30] ss:$8 sps:$4 sm:$0xff]  }
  0x11   : > { %1107 = vmatpush1.bf16.msra.mxu0 %v1610_v5  ;;  %v1629_v17 = vld [vmem:[%s2345_s1 + $0x134] ss:$8 sps:$4 sm:$0xff]   ;;  %v1632_v19 = vld [vmem:[%s2345_s1 + $0x24] ss:$8 sps:$4 sm:$0xff]   ;;  %v1631_v20 = vld [vmem:[%s2345_s1 + $0x130] ss:$8 sps:$4 sm:$0xff]  }
  0x12   : > { %1108 = vmatprep.subr.bf16.mxu0 %v1614_v8  ;;  %1148 = vmatpush1.bf16.msra.mxu1 %v1613_v7  ;;  %v1635_v21 = vld [vmem:[%s2345_s1 + $0x124] ss:$8 sps:$4 sm:$0xff]   ;;  %v1634_v22 = vld [vmem:[%s2345_s1 + $0x20] ss:$8 sps:$4 sm:$0xff]   ;;  %v1638_v23 = vld [vmem:[%s2345_s1 + $0x14] ss:$8 sps:$4 sm:$0xff]  }
  0x13   : > { %1149 = vmatprep.subr.bf16.mxu1 %v1617_v10  ;;  %v1637_v24 = vld [vmem:[%s2345_s1 + $0x120] ss:$8 sps:$4 sm:$0xff]   ;;  %v1641_v25 = vld [vmem:[%s2345_s1 + $0x114] ss:$8 sps:$4 sm:$0xff]   ;;  %v1640_v26 = vld [vmem:[%s2345_s1 + $0x10] ss:$8 sps:$4 sm:$0xff]  }
  0x14   : > { %v1644_v27 = vld [vmem:[%s2345_s1 + $0x4] ss:$8 sps:$4 sm:$0xff]   ;;  %v1643_v28 = vld [vmem:[%s2345_s1 + $0x110] ss:$8 sps:$4 sm:$0xff]   ;;  %v1646_v30 = vld [vmem:[%s2345_s1] ss:$8 sps:$4 sm:$0xff]  }
  0x15   : > { %1109 = vmatpush1.bf16.msra.mxu0 %v1616_v9  ;;  %v1647_v29 = vld [vmem:[%s2345_s1 + $0x104] ss:$8 sps:$4 sm:$0xff]   ;;  %v1650_v31 = vld [vmem:[%s2345_s1 + $0xf4] ss:$8 sps:$4 sm:$0xff]   ;;  %v1649_v32 = vld [vmem:[%s2345_s1 + $0x100] ss:$8 sps:$4 sm:$0xff]  }
  0x16   : > { %1110 = vmatprep.subr.bf16.mxu0 %v1620_v11  ;;  %1150 = vmatpush1.bf16.msra.mxu1 %v1619_v12  ;;  %v1653_v33 = vld [vmem:[%s2345_s1 + $0x1f4] ss:$8 sps:$4 sm:$0xff]   ;;  %v1652_v34 = vld [vmem:[%s2345_s1 + $0xf0] ss:$8 sps:$4 sm:$0xff]   ;;  %s2349_s13 = smov (!%p161_p3, %s1433_s13), 1  ;;  %v1986_v42 = vshrl.u32 %v321_v35, 7 }
  0x17   : > { %1151 = vmatprep.subr.bf16.mxu1 %v1623_v13  ;;  %v1832_v36 = vmov 1983009808   ;;  %v1656_v38 = vld [vmem:[%s2345_s1 + $0xe4] ss:$8 sps:$4 sm:$0xff]   ;;  %v1655_v39 = vld [vmem:[%s2345_s1 + $0x1f0] ss:$8 sps:$4 sm:$0xff]  }
  0x18   : > { %v336_v37 = vunpack.c.l.s4 %v1832_v36  ;;  %v1659_v40 = vld [vmem:[%s2345_s1 + $0x1e4] ss:$8 sps:$4 sm:$0xff]   ;;  %v1658_v41 = vld [vmem:[%s2345_s1 + $0xe0] ss:$8 sps:$4 sm:$0xff]   ;;  %s1591_s17 = smul.u32 18, %s2349_s13  ;;  %vm1309_vm0 = vcmask 1043456  }
  0x19   : > { %1111 = vmatpush1.bf16.msra.mxu0 %v1622_v14  ;;  %v1662_v44 = vld [vmem:[%s2345_s1 + $0xd4] ss:$8 sps:$4 sm:$0xff]   ;;  %v1661_v45 = vld [vmem:[%s2345_s1 + $0x1e0] ss:$8 sps:$4 sm:$0xff]   ;;  %v1664_v47 = vld [vmem:[%s2345_s1 + $0xd0] ss:$8 sps:$4 sm:$0xff]  }
  0x1a   : > { %1112 = vmatprep.subr.bf16.mxu0 %v1626_v15  ;;  %1152 = vmatpush1.bf16.msra.mxu1 %v1625_v16  ;;  %v337_v43 = vunpack.c.0.s8 %v336_v37  ;;  %v1665_v46 = vld [vmem:[%s2345_s1 + $0x1d4] ss:$8 sps:$4 sm:$0xff]   ;;  %s2003_s28 = scalar_lea.vmem %s2344_s0, %s1591_s17  ;;  %v1668_v49 = vld [vmem:[%s2345_s1 + $0xc4] ss:$8 sps:$4 sm:$0xff]   ;;  %v1667_v50 = vld [vmem:[%s2345_s1 + $0x1d0] ss:$8 sps:$4 sm:$0xff]  }
  0x1b   : > { %1153 = vmatprep.subr.bf16.mxu1 %v1629_v17  ;;  %v1671_v51 = vld [vmem:[%s2345_s1 + $0x1c4] ss:$8 sps:$4 sm:$0xff]   ;;  %v1670_v53 = vld [vmem:[%s2345_s1 + $0xc0] ss:$8 sps:$4 sm:$0xff]   ;;  %v1674_v56 = vld [vmem:[%s2345_s1 + $0xb4] ss:$8 sps:$4 sm:$0xff]  }
  0x1c   : > { %v2006_v48 = vsub.s32 %v337_v43, %v1986_v42  ;;  %v172_v52 = vld [vmem:[%s2003_s28] sm:$0xff]  ;;  %v1677_v60 = vld [vmem:[%s2345_s1 + $0x1b4] ss:$8 sps:$4 sm:$0xff]   ;;  %v1676_v61 = vld [vmem:[%s2345_s1 + $0xb0] ss:$8 sps:$4 sm:$0xff]  }
  0x1d   : > { %1113 = vmatpush1.bf16.msra.mxu0 %v1628_v18  ;;  %v334_v55 = vcombine.high %v172_v52, %v172_v52  ;;  %v1673_v57 = vld [vmem:[%s2345_s1 + $0x1c0] ss:$8 sps:$4 sm:$0xff]   ;;  %v1680_v63 = vld [vmem:[%s2345_s1 + $0xa4] ss:$8 sps:$4 sm:$0xff]   ;;  %v1679_v0 = vld [vmem:[%s2345_s1 + $0x1b0] ss:$8 sps:$4 sm:$0xff]  }
  0x1e   : > { %1114 = vmatprep.subr.bf16.mxu0 %v1632_v19  ;;  %1154 = vmatpush1.bf16.msra.mxu1 %v1631_v20  ;;  %v341_v54 = vrot.slane %v172_v52, %v2006_v48  ;;  %v1683_v1 = vld [vmem:[%s2345_s1 + $0x1a4] ss:$8 sps:$4 sm:$0xff]   ;;  %v1682_v2 = vld [vmem:[%s2345_s1 + $0xa0] ss:$8 sps:$4 sm:$0xff]   ;;  %v1686_v3 = vld [vmem:[%s2345_s1 + $0x94] ss:$8 sps:$4 sm:$0xff]  }
  0x1f   : > { %1155 = vmatprep.subr.bf16.mxu1 %v1635_v21  ;;  %v348_v59 = vrot.slane %v334_v55, %v2006_v48  ;;  %v1685_v4 = vld [vmem:[%s2345_s1 + $0x1a0] ss:$8 sps:$4 sm:$0xff]   ;;  %v1689_v5 = vld [vmem:[%s2345_s1 + $0x194] ss:$8 sps:$4 sm:$0xff]   ;;  %v1688_v6 = vld [vmem:[%s2345_s1 + $0x90] ss:$8 sps:$4 sm:$0xff]  }
  0x20   : > { %v349_v58 = vcombine.high %v341_v54, %v341_v54  ;;  %v1692_v7 = vld [vmem:[%s2345_s1 + $0x84] ss:$8 sps:$4 sm:$0xff]   ;;  %v1691_v8 = vld [vmem:[%s2345_s1 + $0x190] ss:$8 sps:$4 sm:$0xff]   ;;  %v1694_v10 = vld [vmem:[%s2345_s1 + $0x80] ss:$8 sps:$4 sm:$0xff]  }
  0x21   : > { %1115 = vmatpush1.bf16.msra.mxu0 %v1634_v22  ;;  %v350_v62 = vcombine.high %v348_v59, %v348_v59  ;;  %v1695_v9 = vld [vmem:[%s2345_s1 + $0x184] ss:$8 sps:$4 sm:$0xff]   ;;  %v1700_v11 = vld [vmem:[%s2345_s1 + $0x274] ss:$8 sps:$4 sm:$0xff]   ;;  %v1697_v12 = vld [vmem:[%s2345_s1 + $0x180] ss:$8 sps:$4 sm:$0xff]  }
  0x22   : > { %1116 = vmatprep.subr.bf16.mxu0 %v1638_v23  ;;  %1156 = vmatpush1.bf16.msra.mxu1 %v1637_v24  ;;  %v1704_v13 = vld [vmem:[%s2345_s1 + $0x374] ss:$8 sps:$4 sm:$0xff]   ;;  %v1698_v14 = vld [vmem:[%s2345_s1 + $0x270] ss:$8 sps:$4 sm:$0xff]   ;;  %v1707_v15 = vld [vmem:[%s2345_s1 + $0x264] ss:$8 sps:$4 sm:$0xff]  }
  0x23   : > { %1157 = vmatprep.subr.bf16.mxu1 %v1641_v25  ;;  %1136 = vmatprep.mubr.bf16.mxu0 %v349_v58  ;;  %v1702_v16 = vld [vmem:[%s2345_s1 + $0x370] ss:$8 sps:$4 sm:$0xff]   ;;  %v1710_v17 = vld [vmem:[%s2345_s1 + $0x364] ss:$8 sps:$4 sm:$0xff]   ;;  %v1705_v18 = vld [vmem:[%s2345_s1 + $0x260] ss:$8 sps:$4 sm:$0xff]  }
  0x24   : > { %1177 = vmatprep.mubr.bf16.mxu1 %v350_v62  ;;  %v1713_v19 = vld [vmem:[%s2345_s1 + $0x254] ss:$8 sps:$4 sm:$0xff]   ;;  %v1708_v20 = vld [vmem:[%s2345_s1 + $0x360] ss:$8 sps:$4 sm:$0xff]   ;;  %v1711_v22 = vld [vmem:[%s2345_s1 + $0x250] ss:$8 sps:$4 sm:$0xff]  }
  0x25   : > { %1117 = vmatpush1.bf16.msra.mxu0 %v1640_v26  ;;  %v1716_v21 = vld [vmem:[%s2345_s1 + $0x354] ss:$8 sps:$4 sm:$0xff]   ;;  %v1719_v23 = vld [vmem:[%s2345_s1 + $0x244] ss:$8 sps:$4 sm:$0xff]   ;;  %v1714_v24 = vld [vmem:[%s2345_s1 + $0x350] ss:$8 sps:$4 sm:$0xff]  }
  0x26   : > { %1118 = vmatprep.subr.bf16.mxu0 %v1644_v27  ;;  %1158 = vmatpush1.bf16.msra.mxu1 %v1643_v28  ;;  %v1722_v25 = vld [vmem:[%s2345_s1 + $0x344] ss:$8 sps:$4 sm:$0xff]   ;;  %v1717_v26 = vld [vmem:[%s2345_s1 + $0x240] ss:$8 sps:$4 sm:$0xff]   ;;  %v1725_v27 = vld [vmem:[%s2345_s1 + $0x234] ss:$8 sps:$4 sm:$0xff]  }
  0x27   : > { %1159 = vmatprep.subr.bf16.mxu1 %v1647_v29  ;;  %v1720_v28 = vld [vmem:[%s2345_s1 + $0x340] ss:$8 sps:$4 sm:$0xff]   ;;  %v1728_v29 = vld [vmem:[%s2345_s1 + $0x334] ss:$8 sps:$4 sm:$0xff]   ;;  %v1743_v43 = vld [vmem:[%s2345_s1 + $0x204] ss:$8 sps:$4 sm:$0xff]  }
  0x28   : > { %v1737_v35 = vld [vmem:[%s2345_s1 + $0x214] ss:$8 sps:$4 sm:$0xff]   ;;  %v1732_v36 = vld [vmem:[%s2345_s1 + $0x320] ss:$8 sps:$4 sm:$0xff]   ;;  %v1750_v55 = vld [vmem:[%s2345_s1 + $0x3f0] ss:$8 sps:$4 sm:$0xff]  }
  0x29   : > { %1119 = vmatpush1.bf16.msra.mxu0 %v1646_v30  ;;  %v1723_v30 = vld [vmem:[%s2345_s1 + $0x230] ss:$8 sps:$4 sm:$0xff]   ;;  %v173_v37 = vld [vmem:[%s2003_s28 + $0x8] sm:$0xff]  ;;  %v1752_v52 = vld [vmem:[%s2345_s1 + $0x3f4] ss:$8 sps:$4 sm:$0xff]  }
  0x2a   : > { %1120 = vmatprep.subr.bf16.mxu0 %v1650_v31  ;;  %1160 = vmatpush1.bf16.msra.mxu1 %v1649_v32  ;;  %v1731_v31 = vld [vmem:[%s2345_s1 + $0x224] ss:$8 sps:$4 sm:$0xff]   ;;  %v1726_v32 = vld [vmem:[%s2345_s1 + $0x330] ss:$8 sps:$4 sm:$0xff]   ;;  %v1761_v58 = vld [vmem:[%s2345_s1 + $0x2d4] ss:$8 sps:$4 sm:$0xff]  }
  0x2b   : > { %1161 = vmatprep.subr.bf16.mxu1 %v1653_v33  ;;  %v1734_v33 = vld [vmem:[%s2345_s1 + $0x324] ss:$8 sps:$4 sm:$0xff]  }
  0x2c   : > { %v1767_v62 = vld [vmem:[%s2345_s1 + $0x2c4] ss:$8 sps:$4 sm:$0xff]  }
  0x2d   : > { %1121 = vmatpush2.bf16.msra.mxu0 %v1652_v34  ;;  %v1729_v34 = vld [vmem:[%s2345_s1 + $0x220] ss:$8 sps:$4 sm:$0xff]  }
  0x2e   : > { %1122 = vmatprep.subr.bf16.mxu0 %v1656_v38  ;;  %1162 = vmatpush2.bf16.msra.mxu1 %v1655_v39  ;;  %v1740_v38 = vld [vmem:[%s2345_s1 + $0x314] ss:$8 sps:$4 sm:$0xff]   ;;  %v2154_v39 = vrot.slane %v173_v37, %v2006_v48 }
  0x2f   : > { %1163 = vmatprep.subr.bf16.mxu1 %v1659_v40  ;;  %v351_v40 = vcombine.high %v173_v37, %v173_v37  ;;  %v323_v37 = vsub.s32 0, %v1986_v42 }
  0x31   : > { %1123 = vmatpush2.bf16.msra.mxu0 %v1658_v41  ;;  %v1735_v41 = vld [vmem:[%s2345_s1 + $0x210] ss:$8 sps:$4 sm:$0xff]  }
  0x32   : > { %1124 = vmatprep.subr.bf16.mxu0 %v1662_v44  ;;  %1164 = vmatpush2.bf16.msra.mxu1 %v1661_v45  ;;  %v366_v44 = vcombine.high %v2154_v39, %v2154_v39  ;;  %v2165_v45 = vrot.slane %v351_v40, %v2006_v48  ;;  %v1741_v48 = vld [vmem:[%s2345_s1 + $0x200] ss:$8 sps:$4 sm:$0xff]  }
  0x33   : > { %1165 = vmatprep.subr.bf16.mxu1 %v1665_v46  ;;  %v1738_v46 = vld [vmem:[%s2345_s1 + $0x310] ss:$8 sps:$4 sm:$0xff]  }
  0x35   : > { %1125 = vmatpush2.bf16.msra.mxu0 %v1664_v47  ;;  %v1746_v47 = vld [vmem:[%s2345_s1 + $0x304] ss:$8 sps:$4 sm:$0xff]  }
  0x36   : > { %1126 = vmatprep.subr.bf16.mxu0 %v1668_v49  ;;  %1166 = vmatpush2.bf16.msra.mxu1 %v1667_v50  ;;  %v367_v49 = vcombine.high %v2165_v45, %v2165_v45  ;;  %v1749_v50 = vld [vmem:[%s2345_s1 + $0x2f4] ss:$8 sps:$4 sm:$0xff]  }
  0x37   : > { %1167 = vmatprep.subr.bf16.mxu1 %v1671_v51  ;;  %v1744_v51 = vld [vmem:[%s2345_s1 + $0x300] ss:$8 sps:$4 sm:$0xff]  }
  0x39   : > { %1127 = vmatpush2.bf16.msra.mxu0 %v1670_v53  ;;  %v1747_v53 = vld [vmem:[%s2345_s1 + $0x2f0] ss:$8 sps:$4 sm:$0xff]  }
  0x3a   : > { %1128 = vmatprep.subr.bf16.mxu0 %v1674_v56  ;;  %1168 = vmatpush2.bf16.msra.mxu1 %v1673_v57  ;;  %v1758_v56 = vld [vmem:[%s2345_s1 + $0x3e4] ss:$8 sps:$4 sm:$0xff]   ;;  %v1753_v57 = vld [vmem:[%s2345_s1 + $0x2e0] ss:$8 sps:$4 sm:$0xff]  }
  0x3b   : > { %1169 = vmatprep.subr.bf16.mxu1 %v1677_v60  ;;  %v1764_v60 = vld [vmem:[%s2345_s1 + $0x3d4] ss:$8 sps:$4 sm:$0xff]  }
  0x3d   : > { %1129 = vmatpush2.bf16.msra.mxu0 %v1676_v61  ;;  %v1759_v61 = vld [vmem:[%s2345_s1 + $0x2d0] ss:$8 sps:$4 sm:$0xff]  }
  0x3e   : > { %1130 = vmatprep.subr.bf16.mxu0 %v1680_v63  ;;  %1170 = vmatpush2.bf16.msra.mxu1 %v1679_v0  ;;  %v1762_v63 = vld [vmem:[%s2345_s1 + $0x3d0] ss:$8 sps:$4 sm:$0xff]   ;;  %v1770_v0 = vld [vmem:[%s2345_s1 + $0x3c4] ss:$8 sps:$4 sm:$0xff]  }
  0x3f   : > { %1171 = vmatprep.subr.bf16.mxu1 %v1683_v1  ;;  %v1765_v1 = vld [vmem:[%s2345_s1 + $0x2c0] ss:$8 sps:$4 sm:$0xff]  }
  0x41   : > { %1131 = vmatpush2.bf16.msra.mxu0 %v1682_v2  ;;  %v1773_v2 = vld [vmem:[%s2345_s1 + $0x2b4] ss:$8 sps:$4 sm:$0xff]  }
  0x42   : > { %1132 = vmatprep.subr.bf16.mxu0 %v1686_v3  ;;  %1172 = vmatpush2.bf16.msra.mxu1 %v1685_v4  ;;  %v1768_v3 = vld [vmem:[%s2345_s1 + $0x3c0] ss:$8 sps:$4 sm:$0xff]   ;;  %v1776_v4 = vld [vmem:[%s2345_s1 + $0x3b4] ss:$8 sps:$4 sm:$0xff]  }
  0x43   : > { %1173 = vmatprep.subr.bf16.mxu1 %v1689_v5  ;;  %v1771_v5 = vld [vmem:[%s2345_s1 + $0x2b0] ss:$8 sps:$4 sm:$0xff]  }
  0x45   : > { %1133 = vmatpush2.bf16.msra.mxu0 %v1688_v6  ;;  %v1779_v6 = vld [vmem:[%s2345_s1 + $0x2a4] ss:$8 sps:$4 sm:$0xff]  }
  0x46   : > { %1134 = vmatprep.subr.bf16.mxu0 %v1692_v7  ;;  %1174 = vmatpush2.bf16.msra.mxu1 %v1691_v8  ;;  %v1774_v7 = vld [vmem:[%s2345_s1 + $0x3b0] ss:$8 sps:$4 sm:$0xff]   ;;  %v1782_v8 = vld [vmem:[%s2345_s1 + $0x3a4] ss:$8 sps:$4 sm:$0xff]  }
  0x47   : > { %1175 = vmatprep.subr.bf16.mxu1 %v1695_v9  ;;  %v1777_v9 = vld [vmem:[%s2345_s1 + $0x2a0] ss:$8 sps:$4 sm:$0xff]  }
  0x49   : > { %1135 = vmatpush2.bf16.msra.mxu0 %v1694_v10  ;;  %v1785_v10 = vld [vmem:[%s2345_s1 + $0x294] ss:$8 sps:$4 sm:$0xff]  }
  0x4a   : > { %1186 = vmatprep.subr.bf16.mxu0 %v1700_v11  ;;  %1176 = vmatpush2.bf16.msra.mxu1 %v1697_v12  ;;  %v1780_v11 = vld [vmem:[%s2345_s1 + $0x3a0] ss:$8 sps:$4 sm:$0xff]   ;;  %v1788_v12 = vld [vmem:[%s2345_s1 + $0x394] ss:$8 sps:$4 sm:$0xff]  }
  0x4b   : > { %1227 = vmatprep.subr.bf16.mxu1 %v1704_v13  ;;  %v1783_v13 = vld [vmem:[%s2345_s1 + $0x290] ss:$8 sps:$4 sm:$0xff]  }
  0x4c   : > { %1137 = vmatmul.mubr.bf16.vlgmr.msra.gmra.mxu0 %v341_v54  ;;  %v1755_v54 = vld [vmem:[%s2345_s1 + $0x2e4] ss:$8 sps:$4 sm:$0xff]  }
  0x4d   : > { %1187 = vmatpush1.bf16.msra.mxu0 %v1698_v14  ;;  %1178 = vmatmul.mubr.bf16.vlgmr.msra.gmra.mxu1 %v348_v59  ;;  %v1756_v59 = vld [vmem:[%s2345_s1 + $0x3e0] ss:$8 sps:$4 sm:$0xff]   ;;  %v1791_v14 = vld [vmem:[%s2345_s1 + $0x284] ss:$8 sps:$4 sm:$0xff]  }
  0x4e   : > { %1188 = vmatprep.subr.bf16.mxu0 %v1707_v15  ;;  %1228 = vmatpush1.bf16.msra.mxu1 %v1702_v16  ;;  %v1786_v15 = vld [vmem:[%s2345_s1 + $0x390] ss:$8 sps:$4 sm:$0xff]   ;;  %v1794_v16 = vld [vmem:[%s2345_s1 + $0x384] ss:$8 sps:$4 sm:$0xff]  }
  0x4f   : > { %1229 = vmatprep.subr.bf16.mxu1 %v1710_v17  ;;  %1218 = vmatprep.mubr.bf16.mxu0 %v366_v44  ;;  %v1789_v17 = vld [vmem:[%s2345_s1 + $0x280] ss:$8 sps:$4 sm:$0xff]  }
  0x50   : > { %1259 = vmatprep.mubr.bf16.mxu1 %v367_v49 }
  0x51   : > { %1189 = vmatpush1.bf16.msra.mxu0 %v1705_v18  ;;  %v1797_v18 = vld [vmem:[%s2345_s1 + $0x474] ss:$8 sps:$4 sm:$0xff]  }
  0x52   : > { %1190 = vmatprep.subr.bf16.mxu0 %v1713_v19  ;;  %1230 = vmatpush1.bf16.msra.mxu1 %v1708_v20  ;;  %v1792_v19 = vld [vmem:[%s2345_s1 + $0x380] ss:$8 sps:$4 sm:$0xff]   ;;  %v1795_v20 = vld [vmem:[%s2345_s1 + $0x470] ss:$8 sps:$4 sm:$0xff]  }
  0x53   : > { %1231 = vmatprep.subr.bf16.mxu1 %v1716_v21  ;;  %v1801_v21 = vld [vmem:[%s2345_s1 + $0x464] ss:$8 sps:$4 sm:$0xff]  }
  0x55   : > { %1191 = vmatpush1.bf16.msra.mxu0 %v1711_v22  ;;  %v1799_v22 = vld [vmem:[%s2345_s1 + $0x460] ss:$8 sps:$4 sm:$0xff]  }
  0x56   : > { %1192 = vmatprep.subr.bf16.mxu0 %v1719_v23  ;;  %1232 = vmatpush1.bf16.msra.mxu1 %v1714_v24  ;;  %v1833_v23 = vmov 0   ;;  %v1804_v24 = vld [vmem:[%s2345_s1 + $0x454] ss:$8 sps:$4 sm:$0xff]  }
  0x57   : > { %1233 = vmatprep.subr.bf16.mxu1 %v1722_v25  ;;  %v1802_v25 = vld [vmem:[%s2345_s1 + $0x450] ss:$8 sps:$4 sm:$0xff]  }
  0x59   : > { %1193 = vmatpush1.bf16.msra.mxu0 %v1717_v26  ;;  %v1807_v26 = vld [vmem:[%s2345_s1 + $0x444] ss:$8 sps:$4 sm:$0xff]  }
  0x5a   : > { %1194 = vmatprep.subr.bf16.mxu0 %v1725_v27  ;;  %1234 = vmatpush1.bf16.msra.mxu1 %v1720_v28  ;;  %v1805_v27 = vld [vmem:[%s2345_s1 + $0x440] ss:$8 sps:$4 sm:$0xff]   ;;  %v1810_v28 = vld [vmem:[%s2345_s1 + $0x434] ss:$8 sps:$4 sm:$0xff]  }
  0x5b   : > { %1235 = vmatprep.subr.bf16.mxu1 %v1728_v29  ;;  %v1808_v29 = vld [vmem:[%s2345_s1 + $0x430] ss:$8 sps:$4 sm:$0xff]  }
  0x5d   : > { %1195 = vmatpush1.bf16.msra.mxu0 %v1723_v30  ;;  %v1813_v30 = vld [vmem:[%s2345_s1 + $0x424] ss:$8 sps:$4 sm:$0xff]  }
  0x5e   : > { %1196 = vmatprep.subr.bf16.mxu0 %v1731_v31  ;;  %1236 = vmatpush1.bf16.msra.mxu1 %v1726_v32  ;;  %v1811_v31 = vld [vmem:[%s2345_s1 + $0x420] ss:$8 sps:$4 sm:$0xff]   ;;  %v1816_v32 = vld [vmem:[%s2345_s1 + $0x414] ss:$8 sps:$4 sm:$0xff]  }
  0x5f   : > { %1237 = vmatprep.subr.bf16.mxu1 %v1734_v33  ;;  %v1814_v33 = vld [vmem:[%s2345_s1 + $0x410] ss:$8 sps:$4 sm:$0xff]  }
  0x61   : > { %1197 = vmatpush1.bf16.msra.mxu0 %v1729_v34  ;;  %v1819_v34 = vld [vmem:[%s2345_s1 + $0x404] ss:$8 sps:$4 sm:$0xff]  }
  0x62   : > { %1198 = vmatprep.subr.bf16.mxu0 %v1737_v35  ;;  %1238 = vmatpush1.bf16.msra.mxu1 %v1732_v36  ;;  %v1817_v35 = vld [vmem:[%s2345_s1 + $0x400] ss:$8 sps:$4 sm:$0xff]   ;;  %v1441_v36 = vld.sshfl [vmem:[%s2003_s28 + $0x10] sm:$0x3 pattern:$0x76325410] }
  0x63   : > { %1239 = vmatprep.subr.bf16.mxu1 %v1740_v38  ;;  %v319_v38 = vld [vmem:[%s2346_s2] sm:$0x3]  ;;  %s1590_s28 = sshll.u32 %s2349_s13, 2 }
  0x64   : > { %v324_v40 = vrot.slane %v319_v38, %v323_v37  ;;  %s170_s18 = scalar_lea.vmem %s2347_s3, %s1590_s28 }
  0x65   : > { %1199 = vmatpush1.bf16.msra.mxu0 %v1735_v41 }
  0x66   : > { %1200 = vmatprep.subr.bf16.mxu0 %v1743_v43  ;;  %1240 = vmatpush1.bf16.msra.mxu1 %v1738_v46 }
  0x67   : > { %1241 = vmatprep.subr.bf16.mxu1 %v1746_v47 }
  0x69   : > { %1201 = vmatpush1.bf16.msra.mxu0 %v1741_v48 }
  0x6a   : > { %1202 = vmatprep.subr.bf16.mxu0 %v1749_v50  ;;  %1242 = vmatpush1.bf16.msra.mxu1 %v1744_v51 }
  0x6b   : > { %1243 = vmatprep.subr.bf16.mxu1 %v1752_v52 }
  0x6d   : > { %1203 = vmatpush2.bf16.msra.mxu0 %v1747_v53 }
  0x6e   : > { %1204 = vmatprep.subr.bf16.mxu0 %v1755_v54  ;;  %1244 = vmatpush2.bf16.msra.mxu1 %v1750_v55 }
  0x6f   : > { %1245 = vmatprep.subr.bf16.mxu1 %v1758_v56 }
  0x71   : > { %1205 = vmatpush2.bf16.msra.mxu0 %v1753_v57 }
  0x72   : > { %1206 = vmatprep.subr.bf16.mxu0 %v1761_v58  ;;  %1246 = vmatpush2.bf16.msra.mxu1 %v1756_v59 }
  0x73   : > { %1247 = vmatprep.subr.bf16.mxu1 %v1764_v60 }
  0x75   : > { %1207 = vmatpush2.bf16.msra.mxu0 %v1759_v61 }
  0x76   : > { %1208 = vmatprep.subr.bf16.mxu0 %v1767_v62  ;;  %1248 = vmatpush2.bf16.msra.mxu1 %v1762_v63 }
  0x77   : > { %1249 = vmatprep.subr.bf16.mxu1 %v1770_v0 }
  0x79   : > { %1209 = vmatpush2.bf16.msra.mxu0 %v1765_v1 }
  0x7a   : > { %1210 = vmatprep.subr.bf16.mxu0 %v1773_v2  ;;  %1250 = vmatpush2.bf16.msra.mxu1 %v1768_v3 }
  0x7b   : > { %1251 = vmatprep.subr.bf16.mxu1 %v1776_v4 }
  0x7d   : > { %1211 = vmatpush2.bf16.msra.mxu0 %v1771_v5 }
  0x7e   : > { %1212 = vmatprep.subr.bf16.mxu0 %v1779_v6  ;;  %1252 = vmatpush2.bf16.msra.mxu1 %v1774_v7 }
  0x7f   : > { %1253 = vmatprep.subr.bf16.mxu1 %v1782_v8 }
  0x81   : > { %1213 = vmatpush2.bf16.msra.mxu0 %v1777_v9 }
  0x82   : > { %1214 = vmatprep.subr.bf16.mxu0 %v1785_v10  ;;  %1254 = vmatpush2.bf16.msra.mxu1 %v1780_v11 }
  0x83   : > { %1255 = vmatprep.subr.bf16.mxu1 %v1788_v12 }
  0x85   : > { %1215 = vmatpush2.bf16.msra.mxu0 %v1783_v13 }
  0x86   : > { %1216 = vmatprep.subr.bf16.mxu0 %v1791_v14  ;;  %1256 = vmatpush2.bf16.msra.mxu1 %v1786_v15 }
  0x87   : > { %1257 = vmatprep.subr.bf16.mxu1 %v1794_v16 }
  0x89   : > { %1217 = vmatpush2.bf16.msra.mxu0 %v1789_v17 }
  0x8a   : > { %1268 = vmatprep.subr.bf16.mxu0 %v1797_v18  ;;  %1258 = vmatpush2.bf16.msra.mxu1 %v1792_v19 }
  0x8c   : > { %1219 = vmatmul.mubr.bf16.vlgmr.msra.gmra.mxu0 %v2154_v39  ;;  %v327_v39 = vsub.s32 1, %v1986_v42 }
  0x8d   : > { %1269 = vmatpush1.bf16.msra.mxu0 %v1795_v20  ;;  %1300 = vmatprep.mubr.bf16.mxu0 %v1833_v23 }
  0x8e   : > { %1260 = vmatmul.mubr.bf16.vlgmr.msra.gmra.mxu1 %v2165_v45  ;;  %1270 = vmatprep.subr.bf16.mxu0 %v1801_v21  ;;  %v328_v41 = vrot.slane %v319_v38, %v327_v39 }
  0x91   : > { %1271 = vmatpush1.bf16.msra.mxu0 %v1799_v22 }
  0x92   : > { %1272 = vmatprep.subr.bf16.mxu0 %v1804_v24 }
  0x95   : > { %1273 = vmatpush1.bf16.msra.mxu0 %v1802_v25 }
  0x96   : > { %1274 = vmatprep.subr.bf16.mxu0 %v1807_v26 }
  0x99   : > { %1275 = vmatpush1.bf16.msra.mxu0 %v1805_v27 }
  0x9a   : > { %1276 = vmatprep.subr.bf16.mxu0 %v1810_v28 }
  0x9d   : > { %1277 = vmatpush1.bf16.msra.mxu0 %v1808_v29 }
  0x9e   : > { %1278 = vmatprep.subr.bf16.mxu0 %v1813_v30 }
  0xa1   : > { %1279 = vmatpush1.bf16.msra.mxu0 %v1811_v31 }
  0xa2   : > { %1280 = vmatprep.subr.bf16.mxu0 %v1816_v32 }
  0xa5   : > { %1281 = vmatpush1.bf16.msra.mxu0 %v1814_v33 }
  0xa6   : > { %1282 = vmatprep.subr.bf16.mxu0 %v1819_v34 }
  0xa9   : > { %1283 = vmatpush1.bf16.msra.mxu0 %v1817_v35 }
  0xac   : > { %1301 = vmatmul.mubr.bf16.vlgmr.msra.gmra.mxu0 %v1441_v36 }
 0x10c   : > { %v1138_v43 = vpop.f32.mrf.mxu0 }
 0x10d   : > { %v1139_v44 = vadd.f32 %v1138_v43, %v324_v40  ;;  %v1179_v46 = vpop.f32.mrf.mxu1 }
 0x10e   : > { %v1140_v45 = vpop.f32.mrf.mxu0 }
 0x10f   : > { %v1141_v47 = vadd.f32 %v1140_v45, %v328_v41  ;;  %v1180_v49 = vadd.f32 %v1179_v46, %v1139_v44  ;;  %v1181_v50 = vpop.f32.mrf.mxu1 }
 0x110   : > { %v1142_v48 = vpop.f32.mrf.mxu0 }
 0x111   : > { %v1182_v51 = vadd.f32 %v1181_v50, %v1141_v47  ;;  %v1183_v53 = vpop.f32.mrf.mxu1 }
 0x112   : > { %v1143_v52 = vpop.f32.mrf.mxu0 }
 0x113   : > { %v1184_v54 = vpop.f32.mrf.mxu1 }
 0x14c   : > { %v1220_v55 = vpop.f32.mrf.mxu0 }
 0x14d   : > { %v1221_v62 = vadd.f32 %v1220_v55, %v1180_v49 }
 0x14e   : > { %v1222_v56 = vpop.f32.mrf.mxu0  ;;  %v1261_v57 = vpop.f32.mrf.mxu1 }
 0x14f   : > { %v1223_v63 = vadd.f32 %v1222_v56, %v1182_v51  ;;  %v1262_v0 = vadd.f32 %v1261_v57, %v1221_v62 }
 0x150   : > { %v1224_v58 = vpop.f32.mrf.mxu0  ;;  %v1263_v59 = vpop.f32.mrf.mxu1 }
 0x151   : > { %v1264_v2 = vadd.f32 %v1263_v59, %v1223_v63 }
 0x152   : > { %v1225_v42 = vpop.f32.mrf.mxu0  ;;  %v1265_v60 = vpop.f32.mrf.mxu1 }
 0x154   : > { %v1266_v61 = vpop.f32.mrf.mxu1 }
 0x16c   : > { %v1302_v1 = vpop.f32.mrf.mxu0 }
 0x16d   : > { %v1303_v3 = vadd.f32 %v1302_v1, %v1262_v0 }
 0x16e   : > { %v1304_v4 = vpop.f32.mrf.mxu0 }
 0x16f   : > { %v1310_v5 = vsel %vm1309_vm0, %v1303_v3, 0.0  ;;  %v1326_v6 = vmul.f32 %v1303_v3, %v1303_v3  ;;  %v1305_v7 = vadd.f32 %v1304_v4, %v1264_v2 }
 0x170   : > { %v1311_v8 = vrot.slane %v1310_v5, 4  ;;  %v1306_v9 = vpop.f32.mrf.mxu0 }
 0x171   : > { %v1328_v10 = vsel %vm1309_vm0, %v1326_v6, 0.0  ;;  %v1317_v11 = vsel %vm1309_vm0, %v1305_v7, 0.0  ;;  %v1327_v12 = vmul.f32 %v1305_v7, %v1305_v7 }
 0x172   : > { %v1312_v13 = vadd.f32 %v1311_v8, %v1310_v5  ;;  %v1329_v14 = vrot.slane %v1328_v10, 4  ;;  %v1318_v15 = vrot.slane %v1317_v11, 4  ;;  %v1307_v16 = vpop.f32.mrf.mxu0 }
 0x173   : > { %v1335_v17 = vsel %vm1309_vm0, %v1327_v12, 0.0 }
 0x174   : > { %v1313_v18 = vrot.slane %v1312_v13, 2  ;;  %v1330_v19 = vadd.f32 %v1329_v14, %v1328_v10  ;;  %v1319_v20 = vadd.f32 %v1318_v15, %v1317_v11  ;;  %v1336_v21 = vrot.slane %v1335_v17, 4 }
 0x176   : > { %v1314_v22 = vadd.f32 %v1313_v18, %v1312_v13  ;;  %v1331_v23 = vrot.slane %v1330_v19, 2  ;;  %v1320_v24 = vrot.slane %v1319_v20, 2  ;;  %v1337_v25 = vadd.f32 %v1336_v21, %v1335_v17 }
 0x178   : > { %v1315_v26 = vrot.slane %v1314_v22, 1  ;;  %v1332_v27 = vadd.f32 %v1331_v23, %v1330_v19  ;;  %v1321_v28 = vadd.f32 %v1320_v24, %v1319_v20  ;;  %v1338_v29 = vrot.slane %v1337_v25, 2 }
 0x17a   : > { %v1316_v30 = vadd.f32 %v1315_v26, %v1314_v22  ;;  %v1333_v31 = vrot.slane %v1332_v27, 1  ;;  %v1322_v32 = vrot.slane %v1321_v28, 1  ;;  %v1339_v33 = vadd.f32 %v1338_v29, %v1337_v25 }
 0x17c   : > { %v1324_v34 = vmul.f32 0.25, %v1316_v30  ;;  %v1334_v35 = vadd.f32 %v1333_v31, %v1332_v27  ;;  %v1323_v36 = vadd.f32 %v1322_v32, %v1321_v28  ;;  %v1340_v37 = vrot.slane %v1339_v33, 1 }
 0x17e   : > { %v1342_v38 = vmul.f32 0.25, %v1334_v35  ;;  %v1344_v39 = vmul.f32 %v1324_v34, %v1324_v34  ;;  %v1325_v40 = vmul.f32 0.25, %v1323_v36  ;;  %v1341_v41 = vadd.f32 %v1340_v37, %v1339_v33 }
 0x17f   : > { %v1350_v51 = vsub.f32 %v1303_v3, %v1324_v34 }
 0x180   : > { %v1346_v43 = vsub.f32 %v1342_v38, %v1344_v39  ;;  %v1345_v44 = vmul.f32 %v1325_v40, %v1325_v40  ;;  %v1343_v45 = vmul.f32 0.25, %v1341_v41  ;;  %v1351_v54 = vsub.f32 %v1305_v7, %v1325_v40 }
 0x182   : > { %v1348_v46 = vmax.f32 %v1346_v43, 0.0  ;;  %v1347_v47 = vsub.f32 %v1343_v45, %v1345_v44 }
 0x184   : > { %v1352_v49 = vadd.f32 1e-05, %v1348_v46  ;;  %v1349_v48 = vmax.f32 %v1347_v47, 0.0 }
 0x186   : > { %1820 = vrsqrt.f32 %v1352_v49  ;;  %v1353_v50 = vadd.f32 1e-05, %v1349_v48 }
 0x188   : > { %1822 = vrsqrt.f32 %v1353_v50 }
 0x193   : > { %v1821_v52 = vpop.eup %1820 }
 0x194   : > { %v1356_v53 = vmul.f32 %v1821_v52, %v1350_v51 }
 0x195   : > { %v1823_v55 = vpop.eup %1822 }
 0x196   : > { %v1360_v56 = vmul.f32 0.2, %v1356_v53  ;;  %v1357_v57 = vmul.f32 %v1823_v55, %v1351_v54  ;;  %vm1358_vm1 = vcmp.gt.f32.partialorder %v1356_v53, 0.0 }
 0x198   : > { %vm1359_vm2 = vcmp.gt.f32.partialorder %v1357_v57, 0.0  ;;  %v1361_v58 = vmul.f32 0.2, %v1357_v57  ;;  %v1362_v59 = vsel %vm1358_vm1, %v1356_v53, %v1360_v56 }
 0x19a   : > { %v1363_v42 = vsel %vm1359_vm2, %v1357_v57, %v1361_v58 }
 0x19b   : > { %v1586_v60 = vpack.c.bf16 %v1363_v42, %v1362_v59 }
 0x19d   : > { %1587 = vst.sshfl [vmem:[%s170_s18] sm:$0x33 pattern:$0x76325410] %v1586_v60 }
 0x19e PF: > { %s13_s12 = sadd.s32 1, %s1830_s12  }
 0x19f   : > { %p10_p4 = scmp.ge.s32.totalorder %s13_s12, 4  }
 0x1a1   :  { %12 = sbr.rel (!%p10_p4) target bundleno = 1 (0x1), region = 62 }

// kernel: _lambda_.9
= control target key start
LH: loop header
LB: loop body
LE: loop exit
PB: predicated region body
PF: predicated region fallthrough
CT: control target
= control target key end

     0   :  { %s5138_s12 = smov 0   ;;  %s6138_s0 = inlined_call_operand.vmem [shape: bf16[2,20,512], index: 0, kind: input, shape index: {}]   ;;  %s6139_s1 = inlined_call_operand.vmem [shape: bf16[9,512,128], index: 1, kind: input, shape index: {}]   ;;  %s6140_s2 = inlined_call_operand.vmem [shape: f32[1,128], index: 2, kind: input, shape index: {}]   ;;  %s6141_s3 = inlined_call_operand.vmem [shape: f32[2,8,128], index: 3, kind: output, shape index: {}]  }
   0x1 LB: > { %s3535_s13 = sadd.s32 4294967295, %s5116_s12   ;;  %p3539_p0 = scmp.ge.s32.totalorder %s5116_s12, 1  ;;  %s5116_s12 = sphi %s5138_s12, %s13_s12  }
   0x2   : > { %p137_p1 = scmp.lt.s32.totalorder %s5116_s12, 3 }
   0x4   : > { %p138_p2 = pnand %p3539_p0, %p137_p1 }
   0x5   : > { %p160_p3 = scmp.lt.s32.totalorder (!%p138_p2), %s3535_s13, 1 }
   0x6   : > { %141 = sbr.rel (%p138_p2) target bundleno = 506 (0x1fa), region = 32 }
   0xb   : > { %v4786_v0 = vld [vmem:[%s6139_s1 + $0x178] sm:$0xff]   ;;  %v4790_v4 = vld [vmem:[%s6139_s1 + $0x170] sm:$0xff]   ;;  %v4794_v8 = vld [vmem:[%s6139_s1 + $0x168] sm:$0xff]   ;;  %s6143_s13 = smov (!%p160_p3, %s3535_s13), 1 }
   0xc   : > { %v4787_v1 = vld [vmem:[%s6139_s1 + $0x1f8] sm:$0xff]   ;;  %4381 = vmatprep.subr.bf16.mxu0 %v4786_v0  ;;  %v4791_v5 = vld [vmem:[%s6139_s1 + $0x1f0] sm:$0xff]   ;;  %v4795_v9 = vld [vmem:[%s6139_s1 + $0x1e8] sm:$0xff]   ;;  %s4777_s16 = smul.u32 48, %s6143_s13 }
   0xd   : > { %v4788_v2 = vld [vmem:[%s6139_s1 + $0x138] sm:$0xff]   ;;  %4403 = vmatprep.subr.bf16.mxu1 %v4787_v1  ;;  %v4792_v6 = vld [vmem:[%s6139_s1 + $0x130] sm:$0xff]   ;;  %v4796_v10 = vld [vmem:[%s6139_s1 + $0x128] sm:$0xff]  }
   0xe   : > { %v4789_v3 = vld [vmem:[%s6139_s1 + $0x1b8] sm:$0xff]   ;;  %4382 = vmatpush3.bf16.msra.mxu0 %v4788_v2  ;;  %v4793_v7 = vld [vmem:[%s6139_s1 + $0x1b0] sm:$0xff]   ;;  %v4797_v11 = vld [vmem:[%s6139_s1 + $0x1a8] sm:$0xff]   ;;  %s5246_s27 = scalar_lea.vmem %s6138_s0, %s4777_s16 }
   0xf   : > { %4404 = vmatpush3.bf16.msra.mxu1 %v4789_v3  ;;  %4383 = vmatprep.subr.bf16.mxu0 %v4790_v4  ;;  %v4798_v12 = vld [vmem:[%s6139_s1 + $0x160] sm:$0xff]   ;;  %v4802_v16 = vld [vmem:[%s6139_s1 + $0x158] sm:$0xff]   ;;  %v4806_v20 = vld [vmem:[%s6139_s1 + $0x150] sm:$0xff]  }
  0x10   : > { %4405 = vmatprep.subr.bf16.mxu1 %v4791_v5  ;;  %v4799_v13 = vld [vmem:[%s6139_s1 + $0x1e0] sm:$0xff]   ;;  %v4803_v17 = vld [vmem:[%s6139_s1 + $0x1d8] sm:$0xff]   ;;  %v4807_v21 = vld [vmem:[%s6139_s1 + $0x1d0] sm:$0xff]  }
  0x11   : > { %v4800_v14 = vld [vmem:[%s6139_s1 + $0x120] sm:$0xff]   ;;  %v4804_v18 = vld [vmem:[%s6139_s1 + $0x118] sm:$0xff]   ;;  %v4808_v22 = vld [vmem:[%s6139_s1 + $0x110] sm:$0xff]  }
  0x12   : > { %4384 = vmatpush3.bf16.msra.mxu0 %v4792_v6  ;;  %v4801_v15 = vld [vmem:[%s6139_s1 + $0x1a0] sm:$0xff]   ;;  %v4805_v19 = vld [vmem:[%s6139_s1 + $0x198] sm:$0xff]   ;;  %v4809_v23 = vld [vmem:[%s6139_s1 + $0x190] sm:$0xff]  }
  0x13   : > { %4406 = vmatpush3.bf16.msra.mxu1 %v4793_v7  ;;  %4385 = vmatprep.subr.bf16.mxu0 %v4794_v8  ;;  %v4810_v24 = vld [vmem:[%s6139_s1 + $0x148] sm:$0xff]   ;;  %v4814_v28 = vld [vmem:[%s6139_s1 + $0x140] sm:$0xff]   ;;  %v5258_v33 = vld [vmem:[%s5246_s27 + $0x10] sm:$0x11] }
  0x14   : > { %4407 = vmatprep.subr.bf16.mxu1 %v4795_v9  ;;  %v4811_v25 = vld [vmem:[%s6139_s1 + $0x1c8] sm:$0xff]   ;;  %v4815_v29 = vld [vmem:[%s6139_s1 + $0x1c0] sm:$0xff]   ;;  %v5266_v36 = vld [vmem:[%s5246_s27 + $0x18] sm:$0x11] }
  0x15   : > { %v4812_v26 = vld [vmem:[%s6139_s1 + $0x108] sm:$0xff]   ;;  %v4816_v30 = vld [vmem:[%s6139_s1 + $0x100] sm:$0xff]   ;;  %v4822_v40 = vld [vmem:[%s6139_s1 + $0x78] sm:$0xff]  }
  0x16   : > { %4386 = vmatpush3.bf16.msra.mxu0 %v4796_v10  ;;  %v4813_v27 = vld [vmem:[%s6139_s1 + $0x188] sm:$0xff]   ;;  %v4817_v31 = vld [vmem:[%s6139_s1 + $0x180] sm:$0xff]   ;;  %v4823_v45 = vld [vmem:[%s6139_s1 + $0xf8] sm:$0xff]  }
  0x17   : > { %4408 = vmatpush3.bf16.msra.mxu1 %v4797_v11  ;;  %4387 = vmatprep.subr.bf16.mxu0 %v4798_v12  ;;  %v5255_v32 = vld [vmem:[%s5246_s27] sm:$0xff]  ;;  %v5261_v34 = vld [vmem:[%s5246_s27 + $0x8] sm:$0xff]  ;;  %v4824_v54 = vld [vmem:[%s6139_s1 + $0x38] sm:$0xff]  }
  0x18   : > { %4409 = vmatprep.subr.bf16.mxu1 %v4799_v13  ;;  %v3607_v35 = vcombine.high %v5255_v32, %v5258_v33  ;;  %v3606_v37 = vcombine.low %v5255_v32, %v5258_v33  ;;  %v3609_v38 = vcombine.high %v5261_v34, %v5266_v36  ;;  %v3608_v39 = vcombine.low %v5261_v34, %v5266_v36  ;;  %v4825_v55 = vld [vmem:[%s6139_s1 + $0xb8] sm:$0xff]   ;;  %v4826_v60 = vld [vmem:[%s6139_s1 + $0x70] sm:$0xff]   ;;  %v4830_v2 = vld [vmem:[%s6139_s1 + $0x68] sm:$0xff]  }
  0x19   : > { %v4827_v61 = vld [vmem:[%s6139_s1 + $0xf0] sm:$0xff]   ;;  %v3643_v62 = vcombine.high %v5255_v32, %v5255_v32  ;;  %v3645_v0 = vcombine.high %v5261_v34, %v5261_v34  ;;  %v4831_v3 = vld [vmem:[%s6139_s1 + $0xe8] sm:$0xff]   ;;  %v4834_v6 = vld [vmem:[%s6139_s1 + $0x60] sm:$0xff]  }
  0x1a   : > { %4388 = vmatpush3.bf16.msra.mxu0 %v4800_v14  ;;  %v327_v41 = vshrl.u32 %v3607_v35, 16  ;;  %v329_v42 = vshll.u32 %v3607_v35, 16  ;;  %v320_v43 = vshrl.u32 %v3606_v37, 16  ;;  %v322_v44 = vshll.u32 %v3606_v37, 16  ;;  %v4828_v63 = vld [vmem:[%s6139_s1 + $0x30] sm:$0xff]   ;;  %v4832_v4 = vld [vmem:[%s6139_s1 + $0x28] sm:$0xff]  }
  0x1b   : > { %4410 = vmatpush3.bf16.msra.mxu1 %v4801_v15  ;;  %4389 = vmatprep.subr.bf16.mxu0 %v4802_v16  ;;  %v341_v46 = vshrl.u32 %v3609_v38, 16  ;;  %v343_v47 = vshll.u32 %v3609_v38, 16  ;;  %v334_v48 = vshrl.u32 %v3608_v39, 16  ;;  %v336_v49 = vshll.u32 %v3608_v39, 16  ;;  %v4829_v1 = vld [vmem:[%s6139_s1 + $0xb0] sm:$0xff]   ;;  %v4833_v5 = vld [vmem:[%s6139_s1 + $0xa8] sm:$0xff]  }
  0x1c   : > { %4411 = vmatprep.subr.bf16.mxu1 %v4803_v17  ;;  %v331_v50 = vrot.slane %v329_v42, 1  ;;  %v324_v51 = vrot.slane %v322_v44, 1  ;;  %v4835_v7 = vld [vmem:[%s6139_s1 + $0xe0] sm:$0xff]   ;;  %v4838_v10 = vld [vmem:[%s6139_s1 + $0x58] sm:$0xff]   ;;  %v4842_v14 = vld [vmem:[%s6139_s1 + $0x50] sm:$0xff]  }
  0x1d   : > { %v345_v52 = vrot.slane %v343_v47, 1  ;;  %v338_v53 = vrot.slane %v336_v49, 1  ;;  %v4836_v8 = vld [vmem:[%s6139_s1 + $0x20] sm:$0xff]   ;;  %v4839_v11 = vld [vmem:[%s6139_s1 + $0xd8] sm:$0xff]   ;;  %v4843_v15 = vld [vmem:[%s6139_s1 + $0xd0] sm:$0xff]  }
  0x1e   : > { %4390 = vmatpush3.bf16.msra.mxu0 %v4804_v18  ;;  %v332_v56 = vor.u32 %v331_v50, %v327_v41  ;;  %v325_v57 = vor.u32 %v324_v51, %v320_v43  ;;  %v4837_v9 = vld [vmem:[%s6139_s1 + $0xa0] sm:$0xff]   ;;  %v4840_v12 = vld [vmem:[%s6139_s1 + $0x18] sm:$0xff]   ;;  %v4844_v16 = vld [vmem:[%s6139_s1 + $0x10] sm:$0xff]  }
  0x1f   : > { %4412 = vmatpush3.bf16.msra.mxu1 %v4805_v19  ;;  %4391 = vmatprep.subr.bf16.mxu0 %v4806_v20  ;;  %v346_v58 = vor.u32 %v345_v52, %v341_v46  ;;  %v339_v59 = vor.u32 %v338_v53, %v334_v48  ;;  %v4841_v13 = vld [vmem:[%s6139_s1 + $0x98] sm:$0xff]   ;;  %v4845_v17 = vld [vmem:[%s6139_s1 + $0x90] sm:$0xff]   ;;  %v4846_v18 = vld [vmem:[%s6139_s1 + $0x48] sm:$0xff]  }
  0x20   : > { %4413 = vmatprep.subr.bf16.mxu1 %v4807_v21  ;;  %575 = vmatprep.mubr.bf16.mxu0 %v332_v56  ;;  %v4847_v19 = vld [vmem:[%s6139_s1 + $0xc8] sm:$0xff]   ;;  %v4862_v35 = vld [vmem:[%s6139_s1 + $0x270] sm:$0xff]   ;;  %v4870_v42 = vld [vmem:[%s6139_s1 + $0x260] sm:$0xff]  }
  0x21   : > { %615 = vmatprep.mubr.bf16.mxu1 %v346_v58  ;;  %v4848_v20 = vld [vmem:[%s6139_s1 + $0x8] sm:$0xff]   ;;  %v4865_v37 = vld [vmem:[%s6139_s1 + $0x2b0] sm:$0xff]   ;;  %v4871_v43 = vld [vmem:[%s6139_s1 + $0x2e0] sm:$0xff]  }
  0x22   : > { %4392 = vmatpush3.bf16.msra.mxu0 %v4808_v22  ;;  %v4849_v21 = vld [vmem:[%s6139_s1 + $0x88] sm:$0xff]   ;;  %v4850_v22 = vld [vmem:[%s6139_s1 + $0x40] sm:$0xff]   ;;  %v4874_v46 = vld [vmem:[%s6139_s1 + $0x258] sm:$0xff]  }
  0x23   : > { %4414 = vmatpush3.bf16.msra.mxu1 %v4809_v23  ;;  %4393 = vmatprep.subr.bf16.mxu0 %v4810_v24  ;;  %v4851_v23 = vld [vmem:[%s6139_s1 + $0xc0] sm:$0xff]   ;;  %v4866_v38 = vld [vmem:[%s6139_s1 + $0x268] sm:$0xff]   ;;  %v4875_v47 = vld [vmem:[%s6139_s1 + $0x2d8] sm:$0xff]  }
  0x24   : > { %4415 = vmatprep.subr.bf16.mxu1 %v4811_v25  ;;  %v4852_v24 = vld [vmem:[%s6139_s1] sm:$0xff]   ;;  %v4867_v39 = vld [vmem:[%s6139_s1 + $0x2e8] sm:$0xff]   ;;  %v4876_v48 = vld [vmem:[%s6139_s1 + $0x218] sm:$0xff]  }
  0x25   : > { %v4853_v25 = vld [vmem:[%s6139_s1 + $0x80] sm:$0xff]   ;;  %v4869_v41 = vld [vmem:[%s6139_s1 + $0x2a8] sm:$0xff]   ;;  %v4877_v49 = vld [vmem:[%s6139_s1 + $0x298] sm:$0xff]  }
  0x26   : > { %4394 = vmatpush3.bf16.msra.mxu0 %v4812_v26  ;;  %v4858_v26 = vld [vmem:[%s6139_s1 + $0x278] sm:$0xff]   ;;  %v4872_v44 = vld [vmem:[%s6139_s1 + $0x220] sm:$0xff]   ;;  %v4878_v50 = vld [vmem:[%s6139_s1 + $0x250] sm:$0xff]  }
  0x27   : > { %4416 = vmatpush3.bf16.msra.mxu1 %v4813_v27  ;;  %4395 = vmatprep.subr.bf16.mxu0 %v4814_v28  ;;  %v4859_v27 = vld [vmem:[%s6139_s1 + $0x2f8] sm:$0xff]   ;;  %v3642_v28 = vcombine.low %v5255_v32, %v5255_v32  ;;  %v4863_v32 = vld [vmem:[%s6139_s1 + $0x2f0] sm:$0xff]   ;;  %v4884_v56 = vld [vmem:[%s6139_s1 + $0x208] sm:$0xff]  }
  0x28   : > { %4417 = vmatprep.subr.bf16.mxu1 %v4815_v29  ;;  %v4860_v29 = vld [vmem:[%s6139_s1 + $0x238] sm:$0xff]   ;;  %v4879_v51 = vld [vmem:[%s6139_s1 + $0x2d0] sm:$0xff]   ;;  %v4886_v58 = vld [vmem:[%s6139_s1 + $0x240] sm:$0xff]  }
  0x29   : > { %v4880_v52 = vld [vmem:[%s6139_s1 + $0x210] sm:$0xff]  }
  0x2a   : > { %4396 = vmatpush3.bf16.msra.mxu0 %v4816_v30  ;;  %v3644_v30 = vcombine.low %v5261_v34, %v5261_v34  ;;  %v4864_v34 = vld [vmem:[%s6139_s1 + $0x230] sm:$0xff]  }
  0x2b   : > { %4418 = vmatpush3.bf16.msra.mxu1 %v4817_v31  ;;  %4425 = vmatprep.subr.bf16.mxu0 %v4822_v40  ;;  %v4861_v31 = vld [vmem:[%s6139_s1 + $0x2b8] sm:$0xff]   ;;  %v4868_v40 = vld [vmem:[%s6139_s1 + $0x228] sm:$0xff]   ;;  %v4881_v53 = vld [vmem:[%s6139_s1 + $0x290] sm:$0xff]  }
  0x2c   : > { %4447 = vmatprep.subr.bf16.mxu1 %v4823_v45  ;;  %v4873_v45 = vld [vmem:[%s6139_s1 + $0x2a0] sm:$0xff]  }
  0x2d   : > { %576 = vmatmul.mubr.bf16.vlgmr.msra.gmra.mxu0 %v325_v57  ;;  %v4885_v57 = vld [vmem:[%s6139_s1 + $0x288] sm:$0xff]  }
  0x2e   : > { %616 = vmatmul.mubr.bf16.vlgmr.msra.gmra.mxu1 %v339_v59  ;;  %4426 = vmatpush3.bf16.msra.mxu0 %v4824_v54  ;;  %v4882_v54 = vld [vmem:[%s6139_s1 + $0x248] sm:$0xff]   ;;  %v4887_v59 = vld [vmem:[%s6139_s1 + $0x2c0] sm:$0xff]  }
  0x2f   : > { %4448 = vmatpush3.bf16.msra.mxu1 %v4825_v55  ;;  %4427 = vmatprep.subr.bf16.mxu0 %v4826_v60  ;;  %v4883_v55 = vld [vmem:[%s6139_s1 + $0x2c8] sm:$0xff]   ;;  %v4888_v60 = vld [vmem:[%s6139_s1 + $0x200] sm:$0xff]  }
  0x30   : > { %4449 = vmatprep.subr.bf16.mxu1 %v4827_v61  ;;  %855 = vmatprep.mubr.bf16.mxu0 %v3643_v62  ;;  %v903_v61 = vld [vmem:[%s5246_s27] sm:$0xee] }
  0x31   : > { %895 = vmatprep.mubr.bf16.mxu1 %v3645_v0  ;;  %v3742_v62 = vcombine.low %v903_v61, %v5258_v33  ;;  %v904_v0 = vld [vmem:[%s5246_s27 + $0x8] sm:$0xee] }
  0x32   : > { %4428 = vmatpush3.bf16.msra.mxu0 %v4828_v63  ;;  %v3743_v63 = vcombine.high %v903_v61, %v5258_v33  ;;  %v4895_v33 = vld [vmem:[%s6139_s1 + $0x3f8] sm:$0xff]   ;;  %v4939_v61 = vld [vmem:[%s6139_s1 + $0x4e8] sm:$0xff]  }
  0x33   : > { %4450 = vmatpush3.bf16.msra.mxu1 %v4829_v1  ;;  %4429 = vmatprep.subr.bf16.mxu0 %v4830_v2  ;;  %v4889_v1 = vld [vmem:[%s6139_s1 + $0x280] sm:$0xff]   ;;  %v3744_v2 = vcombine.low %v904_v0, %v5266_v36 }
  0x34   : > { %4451 = vmatprep.subr.bf16.mxu1 %v4831_v3  ;;  %v3745_v3 = vcombine.high %v904_v0, %v5266_v36  ;;  %v4897_v36 = vld [vmem:[%s6139_s1 + $0x3b8] sm:$0xff]   ;;  %v4942_v0 = vld [vmem:[%s6139_s1 + $0x460] sm:$0xff]  }
  0x36   : > { %4430 = vmatpush3.bf16.msra.mxu0 %v4832_v4  ;;  %v980_v4 = vrot.slane %v3742_v62, 1  ;;  %v4940_v62 = vld [vmem:[%s6139_s1 + $0x428] sm:$0xff]  }
  0x37   : > { %4452 = vmatpush3.bf16.msra.mxu1 %v4833_v5  ;;  %4431 = vmatprep.subr.bf16.mxu0 %v4834_v6  ;;  %v981_v5 = vrot.slane %v3743_v63, 1  ;;  %v4894_v6 = vld [vmem:[%s6139_s1 + $0x378] sm:$0xff]   ;;  %v4941_v63 = vld [vmem:[%s6139_s1 + $0x4a8] sm:$0xff]  }
  0x38   : > { %4453 = vmatprep.subr.bf16.mxu1 %v4835_v7  ;;  %v983_v7 = vrot.slane %v3745_v3, 1  ;;  %v4945_v3 = vld [vmem:[%s6139_s1 + $0x4a0] sm:$0xff]  }
  0x3a   : > { %4432 = vmatpush3.bf16.msra.mxu0 %v4836_v8  ;;  %v4896_v8 = vld [vmem:[%s6139_s1 + $0x338] sm:$0xff]  }
  0x3b   : > { %4454 = vmatpush3.bf16.msra.mxu1 %v4837_v9  ;;  %4433 = vmatprep.subr.bf16.mxu0 %v4838_v10  ;;  %v982_v9 = vrot.slane %v3744_v2, 1  ;;  %v4898_v10 = vld [vmem:[%s6139_s1 + $0x370] sm:$0xff]   ;;  %v4944_v2 = vld [vmem:[%s6139_s1 + $0x420] sm:$0xff]  }
  0x3c   : > { %4455 = vmatprep.subr.bf16.mxu1 %v4839_v11  ;;  %v4899_v11 = vld [vmem:[%s6139_s1 + $0x3f0] sm:$0xff]  }
  0x3e   : > { %4434 = vmatpush3.bf16.msra.mxu0 %v4840_v12  ;;  %v4900_v12 = vld [vmem:[%s6139_s1 + $0x330] sm:$0xff]  }
  0x3f   : > { %4456 = vmatpush3.bf16.msra.mxu1 %v4841_v13  ;;  %4435 = vmatprep.subr.bf16.mxu0 %v4842_v14  ;;  %v4901_v13 = vld [vmem:[%s6139_s1 + $0x3b0] sm:$0xff]   ;;  %v4902_v14 = vld [vmem:[%s6139_s1 + $0x368] sm:$0xff]  }
  0x40   : > { %4457 = vmatprep.subr.bf16.mxu1 %v4843_v15  ;;  %v4903_v15 = vld [vmem:[%s6139_s1 + $0x3e8] sm:$0xff]  }
  0x42   : > { %4436 = vmatpush3.bf16.msra.mxu0 %v4844_v16  ;;  %v4904_v16 = vld [vmem:[%s6139_s1 + $0x328] sm:$0xff]  }
  0x43   : > { %4458 = vmatpush3.bf16.msra.mxu1 %v4845_v17  ;;  %4437 = vmatprep.subr.bf16.mxu0 %v4846_v18  ;;  %v4905_v17 = vld [vmem:[%s6139_s1 + $0x3a8] sm:$0xff]   ;;  %v4906_v18 = vld [vmem:[%s6139_s1 + $0x360] sm:$0xff]  }
  0x44   : > { %4459 = vmatprep.subr.bf16.mxu1 %v4847_v19  ;;  %v4907_v19 = vld [vmem:[%s6139_s1 + $0x3e0] sm:$0xff]  }
  0x46   : > { %4438 = vmatpush3.bf16.msra.mxu0 %v4848_v20  ;;  %v4908_v20 = vld [vmem:[%s6139_s1 + $0x320] sm:$0xff]  }
  0x47   : > { %4460 = vmatpush3.bf16.msra.mxu1 %v4849_v21  ;;  %4439 = vmatprep.subr.bf16.mxu0 %v4850_v22  ;;  %v4909_v21 = vld [vmem:[%s6139_s1 + $0x3a0] sm:$0xff]   ;;  %v4910_v22 = vld [vmem:[%s6139_s1 + $0x358] sm:$0xff]  }
  0x48   : > { %4461 = vmatprep.subr.bf16.mxu1 %v4851_v23  ;;  %v4911_v23 = vld [vmem:[%s6139_s1 + $0x3d8] sm:$0xff]  }
  0x4a   : > { %4440 = vmatpush3.bf16.msra.mxu0 %v4852_v24  ;;  %v4912_v24 = vld [vmem:[%s6139_s1 + $0x318] sm:$0xff]  }
  0x4b   : > { %4462 = vmatpush3.bf16.msra.mxu1 %v4853_v25  ;;  %4469 = vmatprep.subr.bf16.mxu0 %v4858_v26  ;;  %v4913_v25 = vld [vmem:[%s6139_s1 + $0x398] sm:$0xff]   ;;  %v4914_v26 = vld [vmem:[%s6139_s1 + $0x350] sm:$0xff]  }
  0x4c   : > { %4491 = vmatprep.subr.bf16.mxu1 %v4859_v27  ;;  %v4915_v27 = vld [vmem:[%s6139_s1 + $0x3d0] sm:$0xff]  }
  0x4d   : > { %856 = vmatmul.mubr.bf16.vlgmr.msra.gmra.mxu0 %v3642_v28  ;;  %v4916_v28 = vld [vmem:[%s6139_s1 + $0x310] sm:$0xff]  }
  0x4e   : > { %896 = vmatmul.mubr.bf16.vlgmr.msra.gmra.mxu1 %v3644_v30  ;;  %4470 = vmatpush3.bf16.msra.mxu0 %v4860_v29  ;;  %v4917_v29 = vld [vmem:[%s6139_s1 + $0x390] sm:$0xff]   ;;  %v4918_v30 = vld [vmem:[%s6139_s1 + $0x348] sm:$0xff]  }
  0x4f   : > { %4492 = vmatpush3.bf16.msra.mxu1 %v4861_v31  ;;  %4471 = vmatprep.subr.bf16.mxu0 %v4862_v35  ;;  %v4919_v31 = vld [vmem:[%s6139_s1 + $0x3c8] sm:$0xff]  }
  0x50   : > { %4493 = vmatprep.subr.bf16.mxu1 %v4863_v32  ;;  %1212 = vmatprep.mubr.bf16.mxu0 %v981_v5  ;;  %v4920_v35 = vld [vmem:[%s6139_s1 + $0x308] sm:$0xff]   ;;  %v4947_v5 = vld [vmem:[%s6139_s1 + $0x4d8] sm:$0xff]  }
  0x51   : > { %1252 = vmatprep.mubr.bf16.mxu1 %v983_v7  ;;  %v4921_v32 = vld [vmem:[%s6139_s1 + $0x388] sm:$0xff]   ;;  %v4950_v7 = vld [vmem:[%s6139_s1 + $0x450] sm:$0xff]  }
  0x52   : > { %4472 = vmatpush3.bf16.msra.mxu0 %v4864_v34  ;;  %v4922_v34 = vld [vmem:[%s6139_s1 + $0x340] sm:$0xff]  }
  0x53   : > { %4494 = vmatpush3.bf16.msra.mxu1 %v4865_v37  ;;  %4473 = vmatprep.subr.bf16.mxu0 %v4866_v38  ;;  %v4923_v37 = vld [vmem:[%s6139_s1 + $0x3c0] sm:$0xff]  }
  0x54   : > { %4495 = vmatprep.subr.bf16.mxu1 %v4867_v39  ;;  %v4924_v38 = vld [vmem:[%s6139_s1 + $0x300] sm:$0xff]  }
  0x55   : > { %v4925_v39 = vld [vmem:[%s6139_s1 + $0x380] sm:$0xff]  }
  0x56   : > { %4474 = vmatpush3.bf16.msra.mxu0 %v4868_v40  ;;  %v5577_v40 = vld [vmem:[%s5246_s27] sm:$0xcc] }
  0x57   : > { %4496 = vmatpush3.bf16.msra.mxu1 %v4869_v41  ;;  %4475 = vmatprep.subr.bf16.mxu0 %v4870_v42  ;;  %v1263_v41 = vld [vmem:[%s5246_s27 + $0x10] sm:$0x33]  ;;  %v5581_v42 = vld [vmem:[%s5246_s27 + $0x8] sm:$0xcc] }
  0x58   : > { %4497 = vmatprep.subr.bf16.mxu1 %v4871_v43  ;;  %v1264_v43 = vld [vmem:[%s5246_s27 + $0x18] sm:$0x33] }
  0x5a   : > { %4476 = vmatpush3.bf16.msra.mxu0 %v4872_v44  ;;  %v3842_v44 = vcombine.low %v5577_v40, %v1263_v41 }
  0x5b   : > { %4498 = vmatpush3.bf16.msra.mxu1 %v4873_v45  ;;  %4477 = vmatprep.subr.bf16.mxu0 %v4874_v46  ;;  %v3843_v45 = vcombine.high %v5577_v40, %v1263_v41  ;;  %v3844_v46 = vcombine.low %v5581_v42, %v1264_v43 }
  0x5c   : > { %4499 = vmatprep.subr.bf16.mxu1 %v4875_v47  ;;  %v3845_v47 = vcombine.high %v5581_v42, %v1264_v43 }
  0x5e   : > { %4478 = vmatpush3.bf16.msra.mxu0 %v4876_v48  ;;  %v4930_v48 = vld [vmem:[%s6139_s1 + $0x478] sm:$0xff]  }
  0x5f   : > { %4500 = vmatpush3.bf16.msra.mxu1 %v4877_v49  ;;  %4479 = vmatprep.subr.bf16.mxu0 %v4878_v50  ;;  %v4931_v49 = vld [vmem:[%s6139_s1 + $0x4f8] sm:$0xff]   ;;  %v1346_v50 = vrot.slane %v3842_v44, 2 }
  0x60   : > { %4501 = vmatprep.subr.bf16.mxu1 %v4879_v51  ;;  %v1347_v51 = vrot.slane %v3843_v45, 2 }
  0x62   : > { %4480 = vmatpush3.bf16.msra.mxu0 %v4880_v52  ;;  %v1348_v52 = vrot.slane %v3844_v46, 2 }
  0x63   : > { %4502 = vmatpush3.bf16.msra.mxu1 %v4881_v53  ;;  %4481 = vmatprep.subr.bf16.mxu0 %v4882_v54  ;;  %v1349_v53 = vrot.slane %v3845_v47, 2  ;;  %v4932_v54 = vld [vmem:[%s6139_s1 + $0x438] sm:$0xff]  }
  0x64   : > { %4503 = vmatprep.subr.bf16.mxu1 %v4883_v55  ;;  %v4933_v55 = vld [vmem:[%s6139_s1 + $0x4b8] sm:$0xff]  }
  0x65   : > { %v4969_v47 = vld [vmem:[%s6139_s1 + $0x5b8] sm:$0xff]  }
  0x66   : > { %4482 = vmatpush3.bf16.msra.mxu0 %v4884_v56  ;;  %v4934_v56 = vld [vmem:[%s6139_s1 + $0x470] sm:$0xff]  }
  0x67   : > { %4504 = vmatpush3.bf16.msra.mxu1 %v4885_v57  ;;  %4483 = vmatprep.subr.bf16.mxu0 %v4886_v58  ;;  %v4935_v57 = vld [vmem:[%s6139_s1 + $0x4f0] sm:$0xff]  }
  0x68   : > { %4505 = vmatprep.subr.bf16.mxu1 %v4887_v59  ;;  %v4936_v58 = vld [vmem:[%s6139_s1 + $0x430] sm:$0xff]  }
  0x69   : > { %v4937_v59 = vld [vmem:[%s6139_s1 + $0x4b0] sm:$0xff]  }
  0x6a   : > { %4484 = vmatpush3.bf16.msra.mxu0 %v4888_v60  ;;  %v4938_v60 = vld [vmem:[%s6139_s1 + $0x468] sm:$0xff]  }
  0x6b   : > { %4506 = vmatpush3.bf16.msra.mxu1 %v4889_v1  ;;  %4513 = vmatprep.subr.bf16.mxu0 %v4894_v6  ;;  %v4943_v1 = vld [vmem:[%s6139_s1 + $0x4e0] sm:$0xff]   ;;  %v4948_v6 = vld [vmem:[%s6139_s1 + $0x418] sm:$0xff]  }
  0x6c   : > { %4535 = vmatprep.subr.bf16.mxu1 %v4895_v33  ;;  %v4949_v33 = vld [vmem:[%s6139_s1 + $0x498] sm:$0xff]  }
  0x6d   : > { %1213 = vmatmul.mubr.bf16.vlgmr.msra.gmra.mxu0 %v980_v4  ;;  %v4946_v4 = vld [vmem:[%s6139_s1 + $0x458] sm:$0xff]  }
  0x6e   : > { %1253 = vmatmul.mubr.bf16.vlgmr.msra.gmra.mxu1 %v982_v9  ;;  %4514 = vmatpush3.bf16.msra.mxu0 %v4896_v8  ;;  %v4951_v8 = vld [vmem:[%s6139_s1 + $0x4d0] sm:$0xff]  }
  0x6f   : > { %4536 = vmatpush3.bf16.msra.mxu1 %v4897_v36  ;;  %4515 = vmatprep.subr.bf16.mxu0 %v4898_v10  ;;  %v4952_v9 = vld [vmem:[%s6139_s1 + $0x410] sm:$0xff]   ;;  %v4954_v10 = vld [vmem:[%s6139_s1 + $0x448] sm:$0xff]  }
  0x70   : > { %4537 = vmatprep.subr.bf16.mxu1 %v4899_v11  ;;  %1578 = vmatprep.mubr.bf16.mxu0 %v1347_v51  ;;  %v4953_v36 = vld [vmem:[%s6139_s1 + $0x490] sm:$0xff]   ;;  %v4955_v11 = vld [vmem:[%s6139_s1 + $0x4c8] sm:$0xff]  }
  0x71   : > { %1618 = vmatprep.mubr.bf16.mxu1 %v1349_v53  ;;  %v4971_v51 = vld [vmem:[%s6139_s1 + $0x5f0] sm:$0xff]  }
  0x72   : > { %4516 = vmatpush3.bf16.msra.mxu0 %v4900_v12  ;;  %v4956_v12 = vld [vmem:[%s6139_s1 + $0x408] sm:$0xff]   ;;  %v4973_v53 = vld [vmem:[%s6139_s1 + $0x5b0] sm:$0xff]  }
  0x73   : > { %4538 = vmatpush3.bf16.msra.mxu1 %v4901_v13  ;;  %4517 = vmatprep.subr.bf16.mxu0 %v4902_v14  ;;  %v4957_v13 = vld [vmem:[%s6139_s1 + $0x488] sm:$0xff]   ;;  %v4958_v14 = vld [vmem:[%s6139_s1 + $0x440] sm:$0xff]  }
  0x74   : > { %4539 = vmatprep.subr.bf16.mxu1 %v4903_v15  ;;  %v4959_v15 = vld [vmem:[%s6139_s1 + $0x4c0] sm:$0xff]  }
  0x76   : > { %4518 = vmatpush3.bf16.msra.mxu0 %v4904_v16  ;;  %v4960_v16 = vld [vmem:[%s6139_s1 + $0x400] sm:$0xff]  }
  0x77   : > { %4540 = vmatpush3.bf16.msra.mxu1 %v4905_v17  ;;  %4519 = vmatprep.subr.bf16.mxu0 %v4906_v18  ;;  %v4961_v17 = vld [vmem:[%s6139_s1 + $0x480] sm:$0xff]   ;;  %v5685_v18 = vld [vmem:[%s5246_s27 + $0x10] sm:$0x77] }
  0x78   : > { %4541 = vmatprep.subr.bf16.mxu1 %v4907_v19  ;;  %v3943_v19 = vcombine.high %v5577_v40, %v5685_v18 }
  0x7a   : > { %4520 = vmatpush3.bf16.msra.mxu0 %v4908_v20  ;;  %v5690_v20 = vld [vmem:[%s5246_s27 + $0x18] sm:$0x77] }
  0x7b   : > { %4542 = vmatpush3.bf16.msra.mxu1 %v4909_v21  ;;  %4521 = vmatprep.subr.bf16.mxu0 %v4910_v22  ;;  %v3942_v21 = vcombine.low %v5577_v40, %v5685_v18  ;;  %v3945_v22 = vcombine.high %v5581_v42, %v5690_v20  ;;  %v4968_v40 = vld [vmem:[%s6139_s1 + $0x538] sm:$0xff]  }
  0x7c   : > { %4543 = vmatprep.subr.bf16.mxu1 %v4911_v23  ;;  %v3944_v23 = vcombine.low %v5581_v42, %v5690_v20 }
  0x7e   : > { %4522 = vmatpush3.bf16.msra.mxu0 %v4912_v24  ;;  %v4966_v24 = vld [vmem:[%s6139_s1 + $0x578] sm:$0xff]  }
  0x7f   : > { %4544 = vmatpush3.bf16.msra.mxu1 %v4913_v25  ;;  %4523 = vmatprep.subr.bf16.mxu0 %v4914_v26  ;;  %v1713_v25 = vshrl.u32 %v3943_v19, 16  ;;  %v1716_v26 = vshll.u32 %v3943_v19, 16  ;;  %v5002_v19 = vld [vmem:[%s6139_s1 + $0x678] sm:$0xff]  }
  0x80   : > { %4545 = vmatprep.subr.bf16.mxu1 %v4915_v27  ;;  %v1705_v27 = vshrl.u32 %v3942_v21, 16 }
  0x82   : > { %4524 = vmatpush3.bf16.msra.mxu0 %v4916_v28  ;;  %v1708_v28 = vshll.u32 %v3942_v21, 16 }
  0x83   : > { %4546 = vmatpush3.bf16.msra.mxu1 %v4917_v29  ;;  %4525 = vmatprep.subr.bf16.mxu0 %v4918_v30  ;;  %v4967_v29 = vld [vmem:[%s6139_s1 + $0x5f8] sm:$0xff]   ;;  %v1729_v30 = vshrl.u32 %v3945_v22, 16 }
  0x84   : > { %4547 = vmatprep.subr.bf16.mxu1 %v4919_v31  ;;  %v1732_v31 = vshll.u32 %v3945_v22, 16 }
  0x85   : > { %v1731_v41 = vrot.slane %v1729_v30, 2  ;;  %v5010_v30 = vld [vmem:[%s6139_s1 + $0x668] sm:$0xff]  }
  0x86   : > { %4526 = vmatpush3.bf16.msra.mxu0 %v4920_v35  ;;  %v1721_v35 = vshrl.u32 %v3944_v23, 16  ;;  %v1734_v42 = vrot.slane %v1732_v31, 3  ;;  %v5011_v31 = vld [vmem:[%s6139_s1 + $0x6e8] sm:$0xff]  }
  0x87   : > { %4548 = vmatpush3.bf16.msra.mxu1 %v4921_v32  ;;  %4527 = vmatprep.subr.bf16.mxu0 %v4922_v34  ;;  %v1724_v32 = vshll.u32 %v3944_v23, 16  ;;  %v1715_v34 = vrot.slane %v1713_v25, 2  ;;  %v5003_v23 = vld [vmem:[%s6139_s1 + $0x6f8] sm:$0xff]  }
  0x88   : > { %4549 = vmatprep.subr.bf16.mxu1 %v4923_v37  ;;  %v1718_v37 = vrot.slane %v1716_v26, 3  ;;  %v1723_v43 = vrot.slane %v1721_v35, 2  ;;  %v5006_v26 = vld [vmem:[%s6139_s1 + $0x670] sm:$0xff]   ;;  %v5012_v35 = vld [vmem:[%s6139_s1 + $0x628] sm:$0xff]  }
  0x89   : > { %v1726_v44 = vrot.slane %v1724_v32, 3  ;;  %v5013_v32 = vld [vmem:[%s6139_s1 + $0x6a8] sm:$0xff]  }
  0x8a   : > { %4528 = vmatpush3.bf16.msra.mxu0 %v4924_v38  ;;  %v1707_v38 = vrot.slane %v1705_v27, 2  ;;  %v1719_v45 = vor.u32 %v1718_v37, %v1715_v34  ;;  %v5007_v27 = vld [vmem:[%s6139_s1 + $0x6f0] sm:$0xff]   ;;  %v5014_v34 = vld [vmem:[%s6139_s1 + $0x660] sm:$0xff]  }
  0x8b   : > { %4550 = vmatpush3.bf16.msra.mxu1 %v4925_v39  ;;  %4557 = vmatprep.subr.bf16.mxu0 %v4930_v48  ;;  %v1710_v39 = vrot.slane %v1708_v28, 3  ;;  %v1735_v48 = vor.u32 %v1734_v42, %v1731_v41  ;;  %v5008_v28 = vld [vmem:[%s6139_s1 + $0x630] sm:$0xff]   ;;  %v5015_v37 = vld [vmem:[%s6139_s1 + $0x6e0] sm:$0xff]   ;;  %v5019_v41 = vld [vmem:[%s6139_s1 + $0x6d8] sm:$0xff]  }
  0x8c   : > { %4579 = vmatprep.subr.bf16.mxu1 %v4931_v49  ;;  %v1727_v49 = vor.u32 %v1726_v44, %v1723_v43  ;;  %v5020_v42 = vld [vmem:[%s6139_s1 + $0x618] sm:$0xff]   ;;  %v5022_v44 = vld [vmem:[%s6139_s1 + $0x650] sm:$0xff]  }
  0x8d   : > { %1579 = vmatmul.mubr.bf16.vlgmr.msra.gmra.mxu0 %v1346_v50  ;;  %v1711_v46 = vor.u32 %v1710_v39, %v1707_v38  ;;  %v4970_v50 = vld [vmem:[%s6139_s1 + $0x570] sm:$0xff]   ;;  %v5016_v38 = vld [vmem:[%s6139_s1 + $0x620] sm:$0xff]   ;;  %v5021_v43 = vld [vmem:[%s6139_s1 + $0x698] sm:$0xff]  }
  0x8e   : > { %1619 = vmatmul.mubr.bf16.vlgmr.msra.gmra.mxu1 %v1348_v52  ;;  %4558 = vmatpush3.bf16.msra.mxu0 %v4932_v54  ;;  %v4972_v52 = vld [vmem:[%s6139_s1 + $0x530] sm:$0xff]   ;;  %v4974_v54 = vld [vmem:[%s6139_s1 + $0x568] sm:$0xff]   ;;  %v5017_v39 = vld [vmem:[%s6139_s1 + $0x6a0] sm:$0xff]  }
  0x8f   : > { %4580 = vmatpush3.bf16.msra.mxu1 %v4933_v55  ;;  %4559 = vmatprep.subr.bf16.mxu0 %v4934_v56  ;;  %v4975_v55 = vld [vmem:[%s6139_s1 + $0x5e8] sm:$0xff]  }
  0x90   : > { %4581 = vmatprep.subr.bf16.mxu1 %v4935_v57  ;;  %1964 = vmatprep.mubr.bf16.mxu0 %v1719_v45  ;;  %v4976_v56 = vld [vmem:[%s6139_s1 + $0x528] sm:$0xff]   ;;  %v5023_v45 = vld [vmem:[%s6139_s1 + $0x6d0] sm:$0xff]  }
  0x91   : > { %2004 = vmatprep.mubr.bf16.mxu1 %v1735_v48  ;;  %v4977_v57 = vld [vmem:[%s6139_s1 + $0x5a8] sm:$0xff]  }
  0x92   : > { %4560 = vmatpush3.bf16.msra.mxu0 %v4936_v58  ;;  %v4978_v58 = vld [vmem:[%s6139_s1 + $0x560] sm:$0xff]   ;;  %v5026_v48 = vld [vmem:[%s6139_s1 + $0x648] sm:$0xff]  }
  0x93   : > { %4582 = vmatpush3.bf16.msra.mxu1 %v4937_v59  ;;  %4561 = vmatprep.subr.bf16.mxu0 %v4938_v60  ;;  %v4979_v59 = vld [vmem:[%s6139_s1 + $0x5e0] sm:$0xff]  }
  0x94   : > { %4583 = vmatprep.subr.bf16.mxu1 %v4939_v61  ;;  %v4980_v60 = vld [vmem:[%s6139_s1 + $0x520] sm:$0xff]  }
  0x95   : > { %v4981_v61 = vld [vmem:[%s6139_s1 + $0x5a0] sm:$0xff]  }
  0x96   : > { %4562 = vmatpush3.bf16.msra.mxu0 %v4940_v62  ;;  %v4982_v62 = vld [vmem:[%s6139_s1 + $0x558] sm:$0xff]  }
  0x97   : > { %4584 = vmatpush3.bf16.msra.mxu1 %v4941_v63  ;;  %4563 = vmatprep.subr.bf16.mxu0 %v4942_v0  ;;  %v4983_v63 = vld [vmem:[%s6139_s1 + $0x5d8] sm:$0xff]  }
  0x98   : > { %4585 = vmatprep.subr.bf16.mxu1 %v4943_v1  ;;  %v4984_v0 = vld [vmem:[%s6139_s1 + $0x518] sm:$0xff]  }
  0x99   : > { %v4985_v1 = vld [vmem:[%s6139_s1 + $0x598] sm:$0xff]  }
  0x9a   : > { %4564 = vmatpush3.bf16.msra.mxu0 %v4944_v2  ;;  %v4986_v2 = vld [vmem:[%s6139_s1 + $0x550] sm:$0xff]  }
  0x9b   : > { %4586 = vmatpush3.bf16.msra.mxu1 %v4945_v3  ;;  %4565 = vmatprep.subr.bf16.mxu0 %v4946_v4  ;;  %v4987_v3 = vld [vmem:[%s6139_s1 + $0x5d0] sm:$0xff]  }
  0x9c   : > { %4587 = vmatprep.subr.bf16.mxu1 %v4947_v5  ;;  %v4988_v4 = vld [vmem:[%s6139_s1 + $0x510] sm:$0xff]  }
  0x9d   : > { %v4989_v5 = vld [vmem:[%s6139_s1 + $0x590] sm:$0xff]  }
  0x9e   : > { %4566 = vmatpush3.bf16.msra.mxu0 %v4948_v6  ;;  %v4990_v6 = vld [vmem:[%s6139_s1 + $0x548] sm:$0xff]  }
  0x9f   : > { %4588 = vmatpush3.bf16.msra.mxu1 %v4949_v33  ;;  %4567 = vmatprep.subr.bf16.mxu0 %v4950_v7  ;;  %v4991_v33 = vld [vmem:[%s6139_s1 + $0x5c8] sm:$0xff]  }
  0xa0   : > { %4589 = vmatprep.subr.bf16.mxu1 %v4951_v8  ;;  %v4992_v7 = vld [vmem:[%s6139_s1 + $0x508] sm:$0xff]  }
  0xa1   : > { %v4993_v8 = vld [vmem:[%s6139_s1 + $0x588] sm:$0xff]  }
  0xa2   : > { %4568 = vmatpush3.bf16.msra.mxu0 %v4952_v9  ;;  %v4994_v9 = vld [vmem:[%s6139_s1 + $0x540] sm:$0xff]  }
  0xa3   : > { %4590 = vmatpush3.bf16.msra.mxu1 %v4953_v36  ;;  %4569 = vmatprep.subr.bf16.mxu0 %v4954_v10  ;;  %v4995_v36 = vld [vmem:[%s6139_s1 + $0x5c0] sm:$0xff]  }
  0xa4   : > { %4591 = vmatprep.subr.bf16.mxu1 %v4955_v11  ;;  %v4996_v10 = vld [vmem:[%s6139_s1 + $0x500] sm:$0xff]  }
  0xa5   : > { %v4997_v11 = vld [vmem:[%s6139_s1 + $0x580] sm:$0xff]  }
  0xa6   : > { %4570 = vmatpush3.bf16.msra.mxu0 %v4956_v12  ;;  %v2013_v12 = vld [vmem:[%s5246_s27] sm:$0x88] }
  0xa7   : > { %4592 = vmatpush3.bf16.msra.mxu1 %v4957_v13  ;;  %4571 = vmatprep.subr.bf16.mxu0 %v4958_v14  ;;  %v4042_v13 = vcombine.low %v2013_v12, %v5685_v18  ;;  %v4043_v14 = vcombine.high %v2013_v12, %v5685_v18  ;;  %v5004_v18 = vld [vmem:[%s6139_s1 + $0x638] sm:$0xff]   ;;  %v5044_v12 = vld [vmem:[%s6139_s1 + $0x730] sm:$0xff]  }
  0xa8   : > { %4593 = vmatprep.subr.bf16.mxu1 %v4959_v15  ;;  %v2014_v15 = vld [vmem:[%s5246_s27 + $0x8] sm:$0x88] }
  0xa9   : > { %v2090_v21 = vrot.slane %v4042_v13, 3  ;;  %v2091_v22 = vrot.slane %v4043_v14, 3  ;;  %v5045_v14 = vld [vmem:[%s6139_s1 + $0x7b0] sm:$0xff]  }
  0xaa   : > { %4572 = vmatpush3.bf16.msra.mxu0 %v4960_v16  ;;  %v4044_v16 = vcombine.low %v2014_v15, %v5690_v20 }
  0xab   : > { %4594 = vmatpush3.bf16.msra.mxu1 %v4961_v17  ;;  %4601 = vmatprep.subr.bf16.mxu0 %v4966_v24  ;;  %v4045_v17 = vcombine.high %v2014_v15, %v5690_v20  ;;  %v5005_v20 = vld [vmem:[%s6139_s1 + $0x6b8] sm:$0xff]   ;;  %v5046_v15 = vld [vmem:[%s6139_s1 + $0x768] sm:$0xff]  }
  0xac   : > { %4623 = vmatprep.subr.bf16.mxu1 %v4967_v29  ;;  %v2092_v24 = vrot.slane %v4044_v16, 3  ;;  %v5009_v29 = vld [vmem:[%s6139_s1 + $0x6b0] sm:$0xff]   ;;  %v5047_v16 = vld [vmem:[%s6139_s1 + $0x7e8] sm:$0xff]  }
  0xad   : > { %1965 = vmatmul.mubr.bf16.vlgmr.msra.gmra.mxu0 %v1711_v46  ;;  %v2093_v25 = vrot.slane %v4045_v17, 3  ;;  %v5024_v46 = vld [vmem:[%s6139_s1 + $0x610] sm:$0xff]   ;;  %v5048_v17 = vld [vmem:[%s6139_s1 + $0x728] sm:$0xff]  }
  0xae   : > { %2005 = vmatmul.mubr.bf16.vlgmr.msra.gmra.mxu1 %v1727_v49  ;;  %4602 = vmatpush3.bf16.msra.mxu0 %v4968_v40  ;;  %v5018_v40 = vld [vmem:[%s6139_s1 + $0x658] sm:$0xff]   ;;  %v5027_v49 = vld [vmem:[%s6139_s1 + $0x6c8] sm:$0xff]  }
  0xaf   : > { %4624 = vmatpush3.bf16.msra.mxu1 %v4969_v47  ;;  %4603 = vmatprep.subr.bf16.mxu0 %v4970_v50  ;;  %v5025_v47 = vld [vmem:[%s6139_s1 + $0x690] sm:$0xff]   ;;  %v5028_v50 = vld [vmem:[%s6139_s1 + $0x608] sm:$0xff]  }
  0xb0   : > { %4625 = vmatprep.subr.bf16.mxu1 %v4971_v51  ;;  %2322 = vmatprep.mubr.bf16.mxu0 %v2091_v22  ;;  %v5029_v51 = vld [vmem:[%s6139_s1 + $0x688] sm:$0xff]   ;;  %v5051_v22 = vld [vmem:[%s6139_s1 + $0x7e0] sm:$0xff]  }
  0xb1   : > { %2362 = vmatprep.mubr.bf16.mxu1 %v2093_v25  ;;  %v5055_v25 = vld [vmem:[%s6139_s1 + $0x7d8] sm:$0xff]  }
  0xb2   : > { %4604 = vmatpush3.bf16.msra.mxu0 %v4972_v52  ;;  %v5030_v52 = vld [vmem:[%s6139_s1 + $0x640] sm:$0xff]  }
  0xb3   : > { %4626 = vmatpush3.bf16.msra.mxu1 %v4973_v53  ;;  %4605 = vmatprep.subr.bf16.mxu0 %v4974_v54  ;;  %v5031_v53 = vld [vmem:[%s6139_s1 + $0x6c0] sm:$0xff]  }
  0xb4   : > { %4627 = vmatprep.subr.bf16.mxu1 %v4975_v55  ;;  %v5032_v54 = vld [vmem:[%s6139_s1 + $0x600] sm:$0xff]  }
  0xb5   : > { %v5033_v55 = vld [vmem:[%s6139_s1 + $0x680] sm:$0xff]  }
  0xb6   : > { %4606 = vmatpush3.bf16.msra.mxu0 %v4976_v56  ;;  %v5897_v56 = vld [vmem:[%s5246_s27 + $0x10] sm:$0xff] }
  0xb7   : > { %4628 = vmatpush3.bf16.msra.mxu1 %v4977_v57  ;;  %4607 = vmatprep.subr.bf16.mxu0 %v4978_v58  ;;  %v4143_v57 = vcombine.high %v5897_v56, %v5897_v56  ;;  %v5902_v58 = vld [vmem:[%s5246_s27 + $0x18] sm:$0xff] }
  0xb8   : > { %4629 = vmatprep.subr.bf16.mxu1 %v4979_v59 }
  0xba   : > { %4608 = vmatpush3.bf16.msra.mxu0 %v4980_v60  ;;  %v4142_v60 = vcombine.low %v5897_v56, %v5897_v56 }
  0xbb   : > { %4630 = vmatpush3.bf16.msra.mxu1 %v4981_v61  ;;  %4609 = vmatprep.subr.bf16.mxu0 %v4982_v62  ;;  %v4145_v61 = vcombine.high %v5902_v58, %v5902_v58 }
  0xbc   : > { %4631 = vmatprep.subr.bf16.mxu1 %v4983_v63  ;;  %v5038_v63 = vld [vmem:[%s6139_s1 + $0x778] sm:$0xff]  }
  0xbe   : > { %4610 = vmatpush3.bf16.msra.mxu0 %v4984_v0  ;;  %v4144_v0 = vcombine.low %v5902_v58, %v5902_v58 }
  0xbf   : > { %4632 = vmatpush3.bf16.msra.mxu1 %v4985_v1  ;;  %4611 = vmatprep.subr.bf16.mxu0 %v4986_v2  ;;  %v5039_v1 = vld [vmem:[%s6139_s1 + $0x7f8] sm:$0xff]  }
  0xc0   : > { %4633 = vmatprep.subr.bf16.mxu1 %v4987_v3  ;;  %v5040_v3 = vld [vmem:[%s6139_s1 + $0x738] sm:$0xff]  }
  0xc2   : > { %4612 = vmatpush3.bf16.msra.mxu0 %v4988_v4 }
  0xc3   : > { %4634 = vmatpush3.bf16.msra.mxu1 %v4989_v5  ;;  %4613 = vmatprep.subr.bf16.mxu0 %v4990_v6  ;;  %v5041_v6 = vld [vmem:[%s6139_s1 + $0x7b8] sm:$0xff]  }
  0xc4   : > { %4635 = vmatprep.subr.bf16.mxu1 %v4991_v33 }
  0xc6   : > { %4614 = vmatpush3.bf16.msra.mxu0 %v4992_v7 }
  0xc7   : > { %4636 = vmatpush3.bf16.msra.mxu1 %v4993_v8  ;;  %4615 = vmatprep.subr.bf16.mxu0 %v4994_v9  ;;  %v5042_v9 = vld [vmem:[%s6139_s1 + $0x770] sm:$0xff]  }
  0xc8   : > { %4637 = vmatprep.subr.bf16.mxu1 %v4995_v36 }
  0xca   : > { %4616 = vmatpush3.bf16.msra.mxu0 %v4996_v10  ;;  %v5043_v10 = vld [vmem:[%s6139_s1 + $0x7f0] sm:$0xff]  }
  0xcb   : > { %4638 = vmatpush3.bf16.msra.mxu1 %v4997_v11  ;;  %4645 = vmatprep.subr.bf16.mxu0 %v5002_v19  ;;  %v5049_v19 = vld [vmem:[%s6139_s1 + $0x7a8] sm:$0xff]  }
  0xcc   : > { %4667 = vmatprep.subr.bf16.mxu1 %v5003_v23  ;;  %v5052_v23 = vld [vmem:[%s6139_s1 + $0x720] sm:$0xff]  }
  0xcd   : > { %2323 = vmatmul.mubr.bf16.vlgmr.msra.gmra.mxu0 %v2090_v21  ;;  %v5050_v21 = vld [vmem:[%s6139_s1 + $0x760] sm:$0xff]  }
  0xce   : > { %2363 = vmatmul.mubr.bf16.vlgmr.msra.gmra.mxu1 %v2092_v24  ;;  %4646 = vmatpush3.bf16.msra.mxu0 %v5004_v18  ;;  %v5053_v18 = vld [vmem:[%s6139_s1 + $0x7a0] sm:$0xff]   ;;  %v5054_v24 = vld [vmem:[%s6139_s1 + $0x758] sm:$0xff]  }
  0xcf   : > { %4668 = vmatpush3.bf16.msra.mxu1 %v5005_v20  ;;  %4647 = vmatprep.subr.bf16.mxu0 %v5006_v26  ;;  %v5056_v20 = vld [vmem:[%s6139_s1 + $0x718] sm:$0xff]  }
  0xd0   : > { %4669 = vmatprep.subr.bf16.mxu1 %v5007_v27  ;;  %2676 = vmatprep.mubr.bf16.mxu0 %v4143_v57  ;;  %v5057_v26 = vld [vmem:[%s6139_s1 + $0x798] sm:$0xff]   ;;  %v5058_v27 = vld [vmem:[%s6139_s1 + $0x750] sm:$0xff]  }
  0xd1   : > { %2716 = vmatprep.mubr.bf16.mxu1 %v4145_v61 }
  0xd2   : > { %4648 = vmatpush3.bf16.msra.mxu0 %v5008_v28  ;;  %v5059_v28 = vld [vmem:[%s6139_s1 + $0x7d0] sm:$0xff]  }
  0xd3   : > { %4670 = vmatpush3.bf16.msra.mxu1 %v5009_v29  ;;  %4649 = vmatprep.subr.bf16.mxu0 %v5010_v30  ;;  %v5060_v29 = vld [vmem:[%s6139_s1 + $0x710] sm:$0xff]  }
  0xd4   : > { %4671 = vmatprep.subr.bf16.mxu1 %v5011_v31  ;;  %v5061_v30 = vld [vmem:[%s6139_s1 + $0x790] sm:$0xff]   ;;  %v5062_v31 = vld [vmem:[%s6139_s1 + $0x748] sm:$0xff]  }
  0xd6   : > { %4650 = vmatpush3.bf16.msra.mxu0 %v5012_v35  ;;  %v5063_v35 = vld [vmem:[%s6139_s1 + $0x7c8] sm:$0xff]  }
  0xd7   : > { %4672 = vmatpush3.bf16.msra.mxu1 %v5013_v32  ;;  %4651 = vmatprep.subr.bf16.mxu0 %v5014_v34  ;;  %v5064_v32 = vld [vmem:[%s6139_s1 + $0x708] sm:$0xff]  }
  0xd8   : > { %4673 = vmatprep.subr.bf16.mxu1 %v5015_v37  ;;  %v5065_v34 = vld [vmem:[%s6139_s1 + $0x788] sm:$0xff]   ;;  %v5066_v37 = vld [vmem:[%s6139_s1 + $0x740] sm:$0xff]  }
  0xda   : > { %4652 = vmatpush3.bf16.msra.mxu0 %v5016_v38  ;;  %v5067_v38 = vld [vmem:[%s6139_s1 + $0x7c0] sm:$0xff]  }
  0xdb   : > { %4674 = vmatpush3.bf16.msra.mxu1 %v5017_v39  ;;  %4653 = vmatprep.subr.bf16.mxu0 %v5018_v40  ;;  %v5068_v39 = vld [vmem:[%s6139_s1 + $0x700] sm:$0xff]  }
  0xdc   : > { %4675 = vmatprep.subr.bf16.mxu1 %v5019_v41  ;;  %v5069_v40 = vld [vmem:[%s6139_s1 + $0x780] sm:$0xff]  }
  0xdd   : > { %v6009_v41 = vld [vmem:[%s5246_s27 + $0x20] sm:$0x11] }
  0xde   : > { %4654 = vmatpush3.bf16.msra.mxu0 %v5020_v42  ;;  %v6012_v42 = vld [vmem:[%s5246_s27 + $0x28] sm:$0x11] }
  0xdf   : > { %4676 = vmatpush3.bf16.msra.mxu1 %v5021_v43  ;;  %4655 = vmatprep.subr.bf16.mxu0 %v5022_v44  ;;  %v4242_v44 = vcombine.low %v5897_v56, %v6009_v41 }
  0xe0   : > { %4677 = vmatprep.subr.bf16.mxu1 %v5023_v45  ;;  %v4243_v45 = vcombine.high %v5897_v56, %v6009_v41 }
  0xe1   : > { %v2811_v57 = vshrl.u32 %v4242_v44, 16 }
  0xe2   : > { %4656 = vmatpush3.bf16.msra.mxu0 %v5024_v46  ;;  %v4244_v46 = vcombine.low %v5902_v58, %v6012_v42 }
  0xe3   : > { %4678 = vmatpush3.bf16.msra.mxu1 %v5025_v47  ;;  %4657 = vmatprep.subr.bf16.mxu0 %v5026_v48  ;;  %v4245_v47 = vcombine.high %v5902_v58, %v6012_v42  ;;  %v2813_v58 = vshll.u32 %v4242_v44, 16 }
  0xe4   : > { %4679 = vmatprep.subr.bf16.mxu1 %v5027_v49  ;;  %v5074_v49 = vld [vmem:[%s6139_s1 + $0x878] sm:$0xff]  }
  0xe6   : > { %4658 = vmatpush3.bf16.msra.mxu0 %v5028_v50  ;;  %v5075_v50 = vld [vmem:[%s6139_s1 + $0x8f8] sm:$0xff]  }
  0xe7   : > { %4680 = vmatpush3.bf16.msra.mxu1 %v5029_v51  ;;  %4659 = vmatprep.subr.bf16.mxu0 %v5030_v52  ;;  %v2818_v52 = vshrl.u32 %v4243_v45, 16 }
  0xe8   : > { %4681 = vmatprep.subr.bf16.mxu1 %v5031_v53  ;;  %v2820_v53 = vshll.u32 %v4243_v45, 16  ;;  %v3115_v45 = vld [vmem:[%s5246_s27 + $0x10] sm:$0xee] }
  0xea   : > { %4660 = vmatpush3.bf16.msra.mxu0 %v5032_v54  ;;  %v2832_v54 = vshrl.u32 %v4245_v47, 16 }
  0xeb   : > { %4682 = vmatpush3.bf16.msra.mxu1 %v5033_v55  ;;  %4689 = vmatprep.subr.bf16.mxu0 %v5038_v63  ;;  %v2834_v55 = vshll.u32 %v4245_v47, 16  ;;  %v5104_v47 = vld [vmem:[%s6139_s1 + $0x800] sm:$0xff]  }
  0xec   : > { %4711 = vmatprep.subr.bf16.mxu1 %v5039_v1  ;;  %v5077_v1 = vld [vmem:[%s6139_s1 + $0x8b8] sm:$0xff]  }
  0xed   : > { %v4397_v59 = vpop.f32.mrf.mxu0  ;;  %2677 = vmatmul.mubr.bf16.vlgmr.msra.gmra.mxu0 %v4142_v60  ;;  %v2827_v60 = vshll.u32 %v4244_v46, 16  ;;  %v2836_v63 = vrot.slane %v2834_v55, 1 }
  0xee   : > { %v4419_v62 = vpop.f32.mrf.mxu1  ;;  %2717 = vmatmul.mubr.bf16.vlgmr.msra.gmra.mxu1 %v4144_v0  ;;  %4690 = vmatpush3.bf16.msra.mxu0 %v5040_v3  ;;  %v5076_v0 = vld [vmem:[%s6139_s1 + $0x838] sm:$0xff]  }
  0xef   : > { %v4398_v2 = vpop.f32.mrf.mxu0  ;;  %4712 = vmatpush3.bf16.msra.mxu1 %v5041_v6  ;;  %4691 = vmatprep.subr.bf16.mxu0 %v5042_v9  ;;  %v2829_v6 = vrot.slane %v2827_v60, 1 }
  0xf0   : > { %v4399_v4 = vadd.f32 %v4398_v2, %v4397_v59  ;;  %v4420_v5 = vpop.f32.mrf.mxu1  ;;  %4713 = vmatprep.subr.bf16.mxu1 %v5043_v10  ;;  %v2825_v59 = vshrl.u32 %v4244_v46, 16  ;;  %v5078_v10 = vld [vmem:[%s6139_s1 + $0x870] sm:$0xff]  }
  0xf1   : > { %v4421_v33 = vadd.f32 %v4420_v5, %v4419_v62  ;;  %v4400_v7 = vpop.f32.mrf.mxu0  ;;  %v2822_v62 = vrot.slane %v2820_v53, 1  ;;  %v2815_v5 = vrot.slane %v2813_v58, 1 }
  0xf2   : > { %v4422_v8 = vpop.f32.mrf.mxu1  ;;  %4692 = vmatpush3.bf16.msra.mxu0 %v5044_v12 }
  0xf3   : > { %v5925_v36 = vadd.f32 %v4421_v33, %v4399_v4  ;;  %v4401_v11 = vpop.f32.mrf.mxu0  ;;  %4714 = vmatpush3.bf16.msra.mxu1 %v5045_v14  ;;  %4693 = vmatprep.subr.bf16.mxu0 %v5046_v15  ;;  %v2823_v7 = vor.u32 %v2822_v62, %v2818_v52  ;;  %v2837_v8 = vor.u32 %v2836_v63, %v2832_v54  ;;  %v5079_v14 = vld [vmem:[%s6139_s1 + $0x8f0] sm:$0xff]  }
  0xf4   : > { %v4423_v13 = vpop.f32.mrf.mxu1  ;;  %4715 = vmatprep.subr.bf16.mxu1 %v5047_v16  ;;  %v2816_v12 = vor.u32 %v2815_v5, %v2811_v57  ;;  %v5080_v16 = vld [vmem:[%s6139_s1 + $0x830] sm:$0xff]  }
  0xf5   : > { %v2830_v13 = vor.u32 %v2829_v6, %v2825_v59  ;;  %3066 = vmatprep.mubr.bf16.mxu0 %v2823_v7  ;;  %3106 = vmatprep.mubr.bf16.mxu1 %v2837_v8 }
  0xf6   : > { %4694 = vmatpush3.bf16.msra.mxu0 %v5048_v17  ;;  %v5082_v17 = vld [vmem:[%s6139_s1 + $0x868] sm:$0xff]  }
  0xf7   : > { %4716 = vmatpush3.bf16.msra.mxu1 %v5049_v19  ;;  %4695 = vmatprep.subr.bf16.mxu0 %v5050_v21  ;;  %v5083_v19 = vld [vmem:[%s6139_s1 + $0x8e8] sm:$0xff]  }
  0xf8   : > { %4717 = vmatprep.subr.bf16.mxu1 %v5051_v22  ;;  %v5084_v21 = vld [vmem:[%s6139_s1 + $0x828] sm:$0xff]  }
  0xf9   : > { %v5085_v22 = vld [vmem:[%s6139_s1 + $0x8a8] sm:$0xff]  }
  0xfa   : > { %4696 = vmatpush3.bf16.msra.mxu0 %v5052_v23  ;;  %v5086_v23 = vld [vmem:[%s6139_s1 + $0x860] sm:$0xff]  }
  0xfb   : > { %4718 = vmatpush3.bf16.msra.mxu1 %v5053_v18  ;;  %4697 = vmatprep.subr.bf16.mxu0 %v5054_v24  ;;  %v5087_v18 = vld [vmem:[%s6139_s1 + $0x8e0] sm:$0xff]  }
  0xfc   : > { %4719 = vmatprep.subr.bf16.mxu1 %v5055_v25  ;;  %v5088_v24 = vld [vmem:[%s6139_s1 + $0x820] sm:$0xff]  }
  0xfd   : > { %v5089_v25 = vld [vmem:[%s6139_s1 + $0x8a0] sm:$0xff]  }
  0xfe   : > { %4698 = vmatpush3.bf16.msra.mxu0 %v5056_v20  ;;  %v5090_v20 = vld [vmem:[%s6139_s1 + $0x858] sm:$0xff]  }
  0xff   : > { %4720 = vmatpush3.bf16.msra.mxu1 %v5057_v26  ;;  %4699 = vmatprep.subr.bf16.mxu0 %v5058_v27  ;;  %v5091_v26 = vld [vmem:[%s6139_s1 + $0x8d8] sm:$0xff]  }
 0x100   : > { %4721 = vmatprep.subr.bf16.mxu1 %v5059_v28  ;;  %v5092_v27 = vld [vmem:[%s6139_s1 + $0x818] sm:$0xff]  }
 0x101   : > { %v5093_v28 = vld [vmem:[%s6139_s1 + $0x898] sm:$0xff]  }
 0x102   : > { %4700 = vmatpush3.bf16.msra.mxu0 %v5060_v29  ;;  %v5094_v29 = vld [vmem:[%s6139_s1 + $0x850] sm:$0xff]  }
 0x103   : > { %4722 = vmatpush3.bf16.msra.mxu1 %v5061_v30  ;;  %4701 = vmatprep.subr.bf16.mxu0 %v5062_v31  ;;  %v5095_v30 = vld [vmem:[%s6139_s1 + $0x8d0] sm:$0xff]  }
 0x104   : > { %4723 = vmatprep.subr.bf16.mxu1 %v5063_v35  ;;  %v5096_v31 = vld [vmem:[%s6139_s1 + $0x810] sm:$0xff]  }
 0x105   : > { %v5097_v35 = vld [vmem:[%s6139_s1 + $0x890] sm:$0xff]  }
 0x106   : > { %4702 = vmatpush3.bf16.msra.mxu0 %v5064_v32  ;;  %v5098_v32 = vld [vmem:[%s6139_s1 + $0x848] sm:$0xff]  }
 0x107   : > { %4724 = vmatpush3.bf16.msra.mxu1 %v5065_v34  ;;  %4703 = vmatprep.subr.bf16.mxu0 %v5066_v37  ;;  %v5099_v34 = vld [vmem:[%s6139_s1 + $0x8c8] sm:$0xff]  }
 0x108   : > { %4725 = vmatprep.subr.bf16.mxu1 %v5067_v38  ;;  %v5100_v37 = vld [vmem:[%s6139_s1 + $0x808] sm:$0xff]  }
 0x109   : > { %v5101_v38 = vld [vmem:[%s6139_s1 + $0x888] sm:$0xff]  }
 0x10a   : > { %4704 = vmatpush3.bf16.msra.mxu0 %v5068_v39  ;;  %v5102_v39 = vld [vmem:[%s6139_s1 + $0x840] sm:$0xff]  }
 0x10b   : > { %4726 = vmatpush3.bf16.msra.mxu1 %v5069_v40  ;;  %4733 = vmatprep.subr.bf16.mxu0 %v5074_v49  ;;  %v5103_v40 = vld [vmem:[%s6139_s1 + $0x8c0] sm:$0xff]   ;;  %v4342_v49 = vcombine.low %v3115_v45, %v6009_v41 }
 0x10c   : > { %4755 = vmatprep.subr.bf16.mxu1 %v5075_v50  ;;  %v4343_v50 = vcombine.high %v3115_v45, %v6009_v41 }
 0x10d   : > { %v4441_v43 = vpop.f32.mrf.mxu0  ;;  %3067 = vmatmul.mubr.bf16.vlgmr.msra.gmra.mxu0 %v2816_v12  ;;  %v3192_v60 = vrot.slane %v4342_v49, 1 }
 0x10e   : > { %v4463_v48 = vpop.f32.mrf.mxu1  ;;  %3107 = vmatmul.mubr.bf16.vlgmr.msra.gmra.mxu1 %v2830_v13  ;;  %4734 = vmatpush3.bf16.msra.mxu0 %v5076_v0  ;;  %v3193_v58 = vrot.slane %v4343_v50, 1 }
 0x10f   : > { %v4442_v51 = vpop.f32.mrf.mxu0  ;;  %4756 = vmatpush3.bf16.msra.mxu1 %v5077_v1  ;;  %4735 = vmatprep.subr.bf16.mxu0 %v5078_v10 }
 0x110   : > { %v4464_v56 = vpop.f32.mrf.mxu1  ;;  %v4443_v2 = vadd.f32 %v4442_v51, %v4441_v43  ;;  %4757 = vmatprep.subr.bf16.mxu1 %v5079_v14  ;;  %v3116_v51 = vld [vmem:[%s5246_s27 + $0x18] sm:$0xee]  ;;  %3424 = vmatprep.mubr.bf16.mxu0 %v3193_v58  ;;  %s3541_s27 = sshll.u32 %s6143_s13, 3 }
 0x111   : > { %v4444_v61 = vpop.f32.mrf.mxu0  ;;  %v4465_v3 = vadd.f32 %v4464_v56, %v4463_v48  ;;  %v5105_v48 = vld [vmem:[%s6139_s1 + $0x880] sm:$0xff]   ;;  %v4344_v54 = vcombine.low %v3116_v51, %v6012_v42  ;;  %v4345_v55 = vcombine.high %v3116_v51, %v6012_v42  ;;  %s168_s19 = scalar_lea.vmem %s6141_s3, %s3541_s27 }
 0x112   : > { %v4466_v4 = vpop.f32.mrf.mxu1  ;;  %v858_v9 = vadd.f32 %v4443_v2, %v5925_v36  ;;  %v5081_v36 = vld [vmem:[%s6139_s1 + $0x8b0] sm:$0xff]   ;;  %4736 = vmatpush3.bf16.msra.mxu0 %v5080_v16 }
 0x113   : > { %v4445_v33 = vpop.f32.mrf.mxu0  ;;  %4758 = vmatpush3.bf16.msra.mxu1 %v5081_v36  ;;  %4737 = vmatprep.subr.bf16.mxu0 %v5082_v17  ;;  %v3194_v61 = vrot.slane %v4344_v54, 1  ;;  %v3195_v62 = vrot.slane %v4345_v55, 1 }
 0x114   : > { %v4467_v11 = vpop.f32.mrf.mxu1  ;;  %v6041_v15 = vadd.f32 %v4465_v3, %v858_v9  ;;  %4759 = vmatprep.subr.bf16.mxu1 %v5083_v19 }
 0x115   : > { %3464 = vmatprep.mubr.bf16.mxu1 %v3195_v62 }
 0x116   : > { %4738 = vmatpush3.bf16.msra.mxu0 %v5084_v21 }
 0x117   : > { %4760 = vmatpush3.bf16.msra.mxu1 %v5085_v22  ;;  %4739 = vmatprep.subr.bf16.mxu0 %v5086_v23 }
 0x118   : > { %4761 = vmatprep.subr.bf16.mxu1 %v5087_v18 }
 0x11a   : > { %4740 = vmatpush3.bf16.msra.mxu0 %v5088_v24 }
 0x11b   : > { %4762 = vmatpush3.bf16.msra.mxu1 %v5089_v25  ;;  %4741 = vmatprep.subr.bf16.mxu0 %v5090_v20 }
 0x11c   : > { %4763 = vmatprep.subr.bf16.mxu1 %v5091_v26 }
 0x11e   : > { %4742 = vmatpush3.bf16.msra.mxu0 %v5092_v27 }
 0x11f   : > { %4764 = vmatpush3.bf16.msra.mxu1 %v5093_v28  ;;  %4743 = vmatprep.subr.bf16.mxu0 %v5094_v29 }
 0x120   : > { %4765 = vmatprep.subr.bf16.mxu1 %v5095_v30 }
 0x122   : > { %4744 = vmatpush3.bf16.msra.mxu0 %v5096_v31 }
 0x123   : > { %4766 = vmatpush3.bf16.msra.mxu1 %v5097_v35  ;;  %4745 = vmatprep.subr.bf16.mxu0 %v5098_v32 }
 0x124   : > { %4767 = vmatprep.subr.bf16.mxu1 %v5099_v34 }
 0x126   : > { %4746 = vmatpush3.bf16.msra.mxu0 %v5100_v37 }
 0x127   : > { %4768 = vmatpush3.bf16.msra.mxu1 %v5101_v38  ;;  %4747 = vmatprep.subr.bf16.mxu0 %v5102_v39 }
 0x128   : > { %4769 = vmatprep.subr.bf16.mxu1 %v5103_v40 }
 0x12a   : > { %4748 = vmatpush3.bf16.msra.mxu0 %v5104_v47 }
 0x12b   : > { %4770 = vmatpush3.bf16.msra.mxu1 %v5105_v48 }
 0x12d   : > { %v4485_v43 = vpop.f32.mrf.mxu0  ;;  %3425 = vmatmul.mubr.bf16.vlgmr.msra.gmra.mxu0 %v3192_v60 }
 0x12e   : > { %v4507_v44 = vpop.f32.mrf.mxu1  ;;  %3465 = vmatmul.mubr.bf16.vlgmr.msra.gmra.mxu1 %v3194_v61 }
 0x12f   : > { %v4486_v46 = vpop.f32.mrf.mxu0 }
 0x130   : > { %v4487_v52 = vadd.f32 %v4486_v46, %v4485_v43  ;;  %v4508_v53 = vpop.f32.mrf.mxu1 }
 0x131   : > { %v4509_v56 = vadd.f32 %v4508_v53, %v4507_v44  ;;  %v4488_v57 = vpop.f32.mrf.mxu0 }
 0x132   : > { %v4510_v59 = vpop.f32.mrf.mxu1 }
 0x133   : > { %v1255_v63 = vadd.f32 %v4509_v56, %v4487_v52  ;;  %v4489_v0 = vpop.f32.mrf.mxu0 }
 0x134   : > { %v4511_v41 = vpop.f32.mrf.mxu1 }
 0x135   : > { %v1260_v1 = vadd.f32 %v1255_v63, %v6041_v15 }
 0x14d   : > { %v4529_v2 = vpop.f32.mrf.mxu0 }
 0x14e   : > { %v4551_v42 = vpop.f32.mrf.mxu1 }
 0x14f   : > { %v4530_v3 = vpop.f32.mrf.mxu0 }
 0x150   : > { %v4531_v4 = vadd.f32 %v4530_v3, %v4529_v2  ;;  %v4552_v5 = vpop.f32.mrf.mxu1 }
 0x151   : > { %v4553_v6 = vadd.f32 %v4552_v5, %v4551_v42  ;;  %v4532_v33 = vpop.f32.mrf.mxu0 }
 0x152   : > { %v4554_v7 = vpop.f32.mrf.mxu1 }
 0x153   : > { %v1621_v8 = vadd.f32 %v4553_v6, %v4531_v4  ;;  %v4533_v9 = vpop.f32.mrf.mxu0  ;;  %v4378_v6 = vld [vmem:[%s6140_s2] ss:$0 sm:$0xff] }
 0x154   : > { %v4555_v10 = vpop.f32.mrf.mxu1 }
 0x155   : > { %v1626_v11 = vadd.f32 %v1621_v8, %v1260_v1 }
 0x16d   : > { %v4573_v12 = vpop.f32.mrf.mxu0 }
 0x16e   : > { %v4595_v13 = vpop.f32.mrf.mxu1 }
 0x16f   : > { %v4574_v14 = vpop.f32.mrf.mxu0 }
 0x170   : > { %v4575_v16 = vadd.f32 %v4574_v14, %v4573_v12  ;;  %v4596_v36 = vpop.f32.mrf.mxu1 }
 0x171   : > { %v4597_v15 = vadd.f32 %v4596_v36, %v4595_v13  ;;  %v4576_v17 = vpop.f32.mrf.mxu0 }
 0x172   : > { %v4598_v19 = vpop.f32.mrf.mxu1 }
 0x173   : > { %v2007_v21 = vadd.f32 %v4597_v15, %v4575_v16  ;;  %v4577_v22 = vpop.f32.mrf.mxu0 }
 0x174   : > { %v4599_v23 = vpop.f32.mrf.mxu1 }
 0x175   : > { %v2012_v18 = vadd.f32 %v2007_v21, %v1626_v11 }
 0x18d   : > { %v4617_v24 = vpop.f32.mrf.mxu0 }
 0x18e   : > { %v4639_v25 = vpop.f32.mrf.mxu1 }
 0x18f   : > { %v4618_v20 = vpop.f32.mrf.mxu0 }
 0x190   : > { %v4619_v26 = vadd.f32 %v4618_v20, %v4617_v24  ;;  %v4640_v27 = vpop.f32.mrf.mxu1 }
 0x191   : > { %v4641_v28 = vadd.f32 %v4640_v27, %v4639_v25  ;;  %v4620_v29 = vpop.f32.mrf.mxu0 }
 0x192   : > { %v4642_v30 = vpop.f32.mrf.mxu1 }
 0x193   : > { %v2365_v31 = vadd.f32 %v4641_v28, %v4619_v26  ;;  %v4621_v35 = vpop.f32.mrf.mxu0 }
 0x194   : > { %v4643_v32 = vpop.f32.mrf.mxu1 }
 0x195   : > { %v2370_v34 = vadd.f32 %v2365_v31, %v2012_v18 }
 0x1ad   : > { %v4661_v37 = vpop.f32.mrf.mxu0 }
 0x1ae   : > { %v4683_v38 = vpop.f32.mrf.mxu1 }
 0x1af   : > { %v4662_v39 = vpop.f32.mrf.mxu0 }
 0x1b0   : > { %v4663_v40 = vadd.f32 %v4662_v39, %v4661_v37  ;;  %v4684_v43 = vpop.f32.mrf.mxu1 }
 0x1b1   : > { %v4685_v44 = vadd.f32 %v4684_v43, %v4683_v38  ;;  %v4664_v45 = vpop.f32.mrf.mxu0 }
 0x1b2   : > { %v4686_v46 = vpop.f32.mrf.mxu1 }
 0x1b3   : > { %v2719_v47 = vadd.f32 %v4685_v44, %v4663_v40  ;;  %v4665_v48 = vpop.f32.mrf.mxu0 }
 0x1b4   : > { %v4687_v49 = vpop.f32.mrf.mxu1 }
 0x1b5   : > { %v2724_v50 = vadd.f32 %v2719_v47, %v2370_v34 }
 0x1cd   : > { %v4705_v51 = vpop.f32.mrf.mxu0 }
 0x1ce   : > { %v4727_v52 = vpop.f32.mrf.mxu1 }
 0x1cf   : > { %v4706_v53 = vpop.f32.mrf.mxu0 }
 0x1d0   : > { %v4728_v54 = vpop.f32.mrf.mxu1  ;;  %v4707_v59 = vadd.f32 %v4706_v53, %v4705_v51 }
 0x1d1   : > { %v4708_v55 = vpop.f32.mrf.mxu0  ;;  %v4729_v60 = vadd.f32 %v4728_v54, %v4727_v52 }
 0x1d2   : > { %v4730_v56 = vpop.f32.mrf.mxu1 }
 0x1d3   : > { %v4709_v57 = vpop.f32.mrf.mxu0  ;;  %v3109_v63 = vadd.f32 %v4729_v60, %v4707_v59 }
 0x1d4   : > { %v4731_v58 = vpop.f32.mrf.mxu1 }
 0x1d5   : > { %v3114_v4 = vadd.f32 %v3109_v63, %v2724_v50 }
 0x1ed   : > { %v4749_v61 = vpop.f32.mrf.mxu0 }
 0x1ee   : > { %v4771_v62 = vpop.f32.mrf.mxu1 }
 0x1ef   : > { %v4750_v0 = vpop.f32.mrf.mxu0 }
 0x1f0   : > { %v4772_v41 = vpop.f32.mrf.mxu1  ;;  %v4751_v1 = vadd.f32 %v4750_v0, %v4749_v61 }
 0x1f1   : > { %v4773_v2 = vadd.f32 %v4772_v41, %v4771_v62  ;;  %v4752_v42 = vpop.f32.mrf.mxu0 }
 0x1f2   : > { %v4774_v3 = vpop.f32.mrf.mxu1 }
 0x1f3   : > { %v3467_v5 = vadd.f32 %v4773_v2, %v4751_v1  ;;  %v4753_v33 = vpop.f32.mrf.mxu0 }
 0x1f4   : > { %v4775_v7 = vpop.f32.mrf.mxu1 }
 0x1f5   : > { %v3472_v8 = vadd.f32 %v3467_v5, %v3114_v4 }
 0x1f7   : > { %v3480_v9 = vadd.f32 %v4378_v6, %v3472_v8 }
 0x1f9   : > { %3481 = vst [vmem:[%s168_s19] sm:$0xff] %v3480_v9 }
 0x1fa PF: > { %s13_s12 = sadd.s32 1, %s5116_s12  }
 0x1fb   : > { %p10_p4 = scmp.ge.s32.totalorder %s13_s12, 4  }
 0x1fd   :  { %12 = sbr.rel (!%p10_p4) target bundleno = 1 (0x1), region = 70 }

// kernel: _lambda_.8
= control target key start
LH: loop header
LB: loop body
LE: loop exit
PB: predicated region body
PF: predicated region fallthrough
CT: control target
= control target key end

     0   :  { %s6827_s15 = smov 0   ;;  %s8734_s0 = inlined_call_operand.vmem [shape: bf16[2,20,256], index: 0, kind: input, shape index: {}]   ;;  %s8735_s1 = inlined_call_operand.vmem [shape: bf16[9,256,512], index: 1, kind: input, shape index: {}]   ;;  %s8736_s2 = inlined_call_operand.vmem [shape: f32[1,512], index: 2, kind: input, shape index: {}]   ;;  %s8737_s3 = inlined_call_operand.vmem [shape: f32[8,1], index: 3, kind: input, shape index: {}]   ;;  %s8738_s4 = inlined_call_operand.vmem [shape: bf16[2,8,512], index: 4, kind: output, shape index: {}]  }
   0x1 LB: > { %s4769_s16 = sadd.s32 4294967295, %s6799_s15   ;;  %p4773_p0 = scmp.ge.s32.totalorder %s6799_s15, 1  ;;  %s6799_s15 = sphi %s6827_s15, %s14_s15  }
   0x2   : > { %p162_p1 = scmp.lt.s32.totalorder %s6799_s15, 3 }
   0x4   : > { %p163_p2 = pnand %p4773_p0, %p162_p1 }
   0x5   : > { %p188_p3 = scmp.lt.s32.totalorder (!%p163_p2), %s4769_s16, 1 }
   0x6   : > { %166 = sbr.rel (%p163_p2) target bundleno = 835 (0x343), region = 36 }
   0xb   : > { %v5901_v0 = vld [vmem:[%s8735_s1 + $0x2e4] ss:$16 sps:$4 sm:$0xff]   ;;  %v5903_v1 = vld [vmem:[%s8735_s1 + $0x2ec] ss:$16 sps:$4 sm:$0xff]   ;;  %v5905_v2 = vld [vmem:[%s8735_s1 + $0x2e0] ss:$16 sps:$4 sm:$0xff]  }
   0xc   : > { %673 = vmatprep.subr.bf16.mxu0 %v5901_v0  ;;  %v5906_v3 = vld [vmem:[%s8735_s1 + $0x2e8] ss:$16 sps:$4 sm:$0xff]   ;;  %714 = vmatprep.subr.bf16.mxu1 %v5903_v1  ;;  %v5907_v4 = vld [vmem:[%s8735_s1 + $0x2c4] ss:$16 sps:$4 sm:$0xff]   ;;  %v5909_v5 = vld [vmem:[%s8735_s1 + $0x2cc] ss:$16 sps:$4 sm:$0xff]  }
   0xd   : > { %674 = vmatpush1.bf16.msra.mxu0 %v5905_v2  ;;  %715 = vmatpush1.bf16.msra.mxu1 %v5906_v3  ;;  %v5911_v6 = vld [vmem:[%s8735_s1 + $0x2c0] ss:$16 sps:$4 sm:$0xff]   ;;  %v5912_v7 = vld [vmem:[%s8735_s1 + $0x2c8] ss:$16 sps:$4 sm:$0xff]   ;;  %v5913_v8 = vld [vmem:[%s8735_s1 + $0x2a4] ss:$16 sps:$4 sm:$0xff]  }
   0xe   : > { %675 = vmatprep.subr.bf16.mxu0 %v5907_v4  ;;  %716 = vmatprep.subr.bf16.mxu1 %v5909_v5  ;;  %v5915_v9 = vld [vmem:[%s8735_s1 + $0x2ac] ss:$16 sps:$4 sm:$0xff]   ;;  %v5917_v10 = vld [vmem:[%s8735_s1 + $0x2a0] ss:$16 sps:$4 sm:$0xff]   ;;  %v5918_v11 = vld [vmem:[%s8735_s1 + $0x2a8] ss:$16 sps:$4 sm:$0xff]  }
   0xf   : > { %v5919_v12 = vld [vmem:[%s8735_s1 + $0x284] ss:$16 sps:$4 sm:$0xff]   ;;  %v5921_v13 = vld [vmem:[%s8735_s1 + $0x28c] ss:$16 sps:$4 sm:$0xff]   ;;  %v5923_v14 = vld [vmem:[%s8735_s1 + $0x280] ss:$16 sps:$4 sm:$0xff]  }
  0x10   : > { %v5924_v15 = vld [vmem:[%s8735_s1 + $0x288] ss:$16 sps:$4 sm:$0xff]   ;;  %v5925_v16 = vld [vmem:[%s8735_s1 + $0x264] ss:$16 sps:$4 sm:$0xff]   ;;  %v5927_v17 = vld [vmem:[%s8735_s1 + $0x26c] ss:$16 sps:$4 sm:$0xff]  }
  0x11   : > { %676 = vmatpush1.bf16.msra.mxu0 %v5911_v6  ;;  %717 = vmatpush1.bf16.msra.mxu1 %v5912_v7  ;;  %v5929_v18 = vld [vmem:[%s8735_s1 + $0x260] ss:$16 sps:$4 sm:$0xff]   ;;  %v5930_v19 = vld [vmem:[%s8735_s1 + $0x268] ss:$16 sps:$4 sm:$0xff]   ;;  %v5931_v20 = vld [vmem:[%s8735_s1 + $0x244] ss:$16 sps:$4 sm:$0xff]  }
  0x12   : > { %677 = vmatprep.subr.bf16.mxu0 %v5913_v8  ;;  %718 = vmatprep.subr.bf16.mxu1 %v5915_v9  ;;  %v5933_v21 = vld [vmem:[%s8735_s1 + $0x24c] ss:$16 sps:$4 sm:$0xff]   ;;  %v5935_v22 = vld [vmem:[%s8735_s1 + $0x240] ss:$16 sps:$4 sm:$0xff]   ;;  %v5936_v23 = vld [vmem:[%s8735_s1 + $0x248] ss:$16 sps:$4 sm:$0xff]  }
  0x13   : > { %v5937_v24 = vld [vmem:[%s8735_s1 + $0x224] ss:$16 sps:$4 sm:$0xff]   ;;  %v5939_v25 = vld [vmem:[%s8735_s1 + $0x22c] ss:$16 sps:$4 sm:$0xff]   ;;  %v5941_v26 = vld [vmem:[%s8735_s1 + $0x220] ss:$16 sps:$4 sm:$0xff]  }
  0x14   : > { %v5942_v27 = vld [vmem:[%s8735_s1 + $0x228] ss:$16 sps:$4 sm:$0xff]   ;;  %v5943_v28 = vld [vmem:[%s8735_s1 + $0x204] ss:$16 sps:$4 sm:$0xff]   ;;  %v5945_v29 = vld [vmem:[%s8735_s1 + $0x20c] ss:$16 sps:$4 sm:$0xff]  }
  0x15   : > { %678 = vmatpush1.bf16.msra.mxu0 %v5917_v10  ;;  %719 = vmatpush1.bf16.msra.mxu1 %v5918_v11  ;;  %v5947_v30 = vld [vmem:[%s8735_s1 + $0x200] ss:$16 sps:$4 sm:$0xff]   ;;  %v5948_v31 = vld [vmem:[%s8735_s1 + $0x208] ss:$16 sps:$4 sm:$0xff]   ;;  %v5949_v32 = vld [vmem:[%s8735_s1 + $0x3e4] ss:$16 sps:$4 sm:$0xff]  }
  0x16   : > { %679 = vmatprep.subr.bf16.mxu0 %v5919_v12  ;;  %720 = vmatprep.subr.bf16.mxu1 %v5921_v13  ;;  %v5951_v33 = vld [vmem:[%s8735_s1 + $0x3ec] ss:$16 sps:$4 sm:$0xff]   ;;  %v5953_v34 = vld [vmem:[%s8735_s1 + $0x3e0] ss:$16 sps:$4 sm:$0xff]   ;;  %v5954_v35 = vld [vmem:[%s8735_s1 + $0x3e8] ss:$16 sps:$4 sm:$0xff]  }
  0x17   : > { %s8740_s16 = smov (!%p188_p3, %s4769_s16), 1  ;;  %v5955_v36 = vld [vmem:[%s8735_s1 + $0x3c4] ss:$16 sps:$4 sm:$0xff]   ;;  %v5957_v37 = vld [vmem:[%s8735_s1 + $0x3cc] ss:$16 sps:$4 sm:$0xff]  }
  0x18   : > { %v5959_v38 = vld [vmem:[%s8735_s1 + $0x3c0] ss:$16 sps:$4 sm:$0xff]   ;;  %s5890_s23 = smul.u32 24, %s8740_s16  ;;  %v5960_v39 = vld [vmem:[%s8735_s1 + $0x3c8] ss:$16 sps:$4 sm:$0xff]   ;;  %s5887_s17 = sshll.u32 %s8740_s16, 4 }
  0x19   : > { %680 = vmatpush1.bf16.msra.mxu0 %v5923_v14  ;;  %721 = vmatpush1.bf16.msra.mxu1 %v5924_v15  ;;  %v5961_v40 = vld [vmem:[%s8735_s1 + $0x3a4] ss:$16 sps:$4 sm:$0xff]   ;;  %v5963_v41 = vld [vmem:[%s8735_s1 + $0x3ac] ss:$16 sps:$4 sm:$0xff]   ;;  %v5965_v42 = vld [vmem:[%s8735_s1 + $0x3a0] ss:$16 sps:$4 sm:$0xff]   ;;  %s197_s20 = scalar_lea.vmem %s8738_s4, %s5887_s17 }
  0x1a   : > { %681 = vmatprep.subr.bf16.mxu0 %v5925_v16  ;;  %722 = vmatprep.subr.bf16.mxu1 %v5927_v17  ;;  %v5966_v43 = vld [vmem:[%s8735_s1 + $0x3a8] ss:$16 sps:$4 sm:$0xff]   ;;  %s6977_s10 = scalar_lea.vmem %s8734_s0, %s5890_s23  ;;  %v5967_v44 = vld [vmem:[%s8735_s1 + $0x384] ss:$16 sps:$4 sm:$0xff]   ;;  %v5969_v45 = vld [vmem:[%s8735_s1 + $0x38c] ss:$16 sps:$4 sm:$0xff]  }
  0x1b   : > { %v6986_v46 = vld [vmem:[%s6977_s10] sm:$0xff]  ;;  %v6989_v47 = vld [vmem:[%s6977_s10 + $0x8] sm:$0x11] }
  0x1c   : > { %v5971_v48 = vld [vmem:[%s8735_s1 + $0x380] ss:$16 sps:$4 sm:$0xff]   ;;  %v5972_v49 = vld [vmem:[%s8735_s1 + $0x388] ss:$16 sps:$4 sm:$0xff]   ;;  %v4842_v50 = vcombine.high %v6986_v46, %v6989_v47  ;;  %v5973_v51 = vld [vmem:[%s8735_s1 + $0x364] ss:$16 sps:$4 sm:$0xff]   ;;  %v4841_v62 = vcombine.low %v6986_v46, %v6989_v47 }
  0x1d   : > { %682 = vmatpush1.bf16.msra.mxu0 %v5929_v18  ;;  %723 = vmatpush1.bf16.msra.mxu1 %v5930_v19  ;;  %v5975_v52 = vld [vmem:[%s8735_s1 + $0x36c] ss:$16 sps:$4 sm:$0xff]   ;;  %v5977_v55 = vld [vmem:[%s8735_s1 + $0x360] ss:$16 sps:$4 sm:$0xff]   ;;  %v5978_v56 = vld [vmem:[%s8735_s1 + $0x368] ss:$16 sps:$4 sm:$0xff]   ;;  %v4908_v18 = vcombine.high %v6986_v46, %v6986_v46 }
  0x1e   : > { %683 = vmatprep.subr.bf16.mxu0 %v5931_v20  ;;  %724 = vmatprep.subr.bf16.mxu1 %v5933_v21  ;;  %v345_v53 = vshrl.u32 %v4842_v50, 16  ;;  %v347_v54 = vshll.u32 %v4842_v50, 16  ;;  %v5979_v58 = vld [vmem:[%s8735_s1 + $0x344] ss:$16 sps:$4 sm:$0xff]   ;;  %v5981_v59 = vld [vmem:[%s8735_s1 + $0x34c] ss:$16 sps:$4 sm:$0xff]  }
  0x1f   : > { %v5983_v61 = vld [vmem:[%s8735_s1 + $0x340] ss:$16 sps:$4 sm:$0xff]   ;;  %v5984_v63 = vld [vmem:[%s8735_s1 + $0x348] ss:$16 sps:$4 sm:$0xff]   ;;  %v5985_v0 = vld [vmem:[%s8735_s1 + $0x324] ss:$16 sps:$4 sm:$0xff]  }
  0x20   : > { %v349_v57 = vrot.slane %v347_v54, 1  ;;  %v5987_v1 = vld [vmem:[%s8735_s1 + $0x32c] ss:$16 sps:$4 sm:$0xff]   ;;  %v5989_v2 = vld [vmem:[%s8735_s1 + $0x320] ss:$16 sps:$4 sm:$0xff]   ;;  %v340_v3 = vshll.u32 %v4841_v62, 16 }
  0x21   : > { %684 = vmatpush1.bf16.msra.mxu0 %v5935_v22  ;;  %725 = vmatpush1.bf16.msra.mxu1 %v5936_v23  ;;  %v5990_v4 = vld [vmem:[%s8735_s1 + $0x328] ss:$16 sps:$4 sm:$0xff]   ;;  %v5991_v5 = vld [vmem:[%s8735_s1 + $0x304] ss:$16 sps:$4 sm:$0xff]   ;;  %v5993_v6 = vld [vmem:[%s8735_s1 + $0x30c] ss:$16 sps:$4 sm:$0xff]  }
  0x22   : > { %685 = vmatprep.subr.bf16.mxu0 %v5937_v24  ;;  %726 = vmatprep.subr.bf16.mxu1 %v5939_v25  ;;  %v350_v60 = vor.u32 %v349_v57, %v345_v53  ;;  %v5995_v7 = vld [vmem:[%s8735_s1 + $0x300] ss:$16 sps:$4 sm:$0xff]   ;;  %v338_v8 = vshrl.u32 %v4841_v62, 16  ;;  %v342_v9 = vrot.slane %v340_v3, 1  ;;  %v5996_v10 = vld [vmem:[%s8735_s1 + $0x308] ss:$16 sps:$4 sm:$0xff]  }
  0x23   : > { %v6001_v11 = vld [vmem:[%s8735_s1 + $0xe4] ss:$16 sps:$4 sm:$0xff]   ;;  %v6004_v12 = vld [vmem:[%s8735_s1 + $0xec] ss:$16 sps:$4 sm:$0xff]   ;;  %v5999_v14 = vld [vmem:[%s8735_s1 + $0xe0] ss:$16 sps:$4 sm:$0xff]  }
  0x24   : > { %705 = vmatprep.mubr.bf16.mxu0 %v350_v60  ;;  %746 = vmatprep.mubr.bf16.mxu1 %v350_v60  ;;  %v343_v13 = vor.u32 %v342_v9, %v338_v8  ;;  %v6002_v15 = vld [vmem:[%s8735_s1 + $0xe8] ss:$16 sps:$4 sm:$0xff]   ;;  %v6007_v16 = vld [vmem:[%s8735_s1 + $0xc4] ss:$16 sps:$4 sm:$0xff]   ;;  %v6010_v17 = vld [vmem:[%s8735_s1 + $0xcc] ss:$16 sps:$4 sm:$0xff]  }
  0x25   : > { %686 = vmatpush1.bf16.msra.mxu0 %v5941_v26  ;;  %727 = vmatpush1.bf16.msra.mxu1 %v5942_v27  ;;  %v6005_v19 = vld [vmem:[%s8735_s1 + $0xc0] ss:$16 sps:$4 sm:$0xff]   ;;  %v6008_v20 = vld [vmem:[%s8735_s1 + $0xc8] ss:$16 sps:$4 sm:$0xff]   ;;  %v6013_v21 = vld [vmem:[%s8735_s1 + $0xa4] ss:$16 sps:$4 sm:$0xff]  }
  0x26   : > { %687 = vmatprep.subr.bf16.mxu0 %v5943_v28  ;;  %728 = vmatprep.subr.bf16.mxu1 %v5945_v29  ;;  %v6016_v22 = vld [vmem:[%s8735_s1 + $0xac] ss:$16 sps:$4 sm:$0xff]   ;;  %v6011_v23 = vld [vmem:[%s8735_s1 + $0xa0] ss:$16 sps:$4 sm:$0xff]   ;;  %v6014_v24 = vld [vmem:[%s8735_s1 + $0xa8] ss:$16 sps:$4 sm:$0xff]  }
  0x27   : > { %v6019_v25 = vld [vmem:[%s8735_s1 + $0x84] ss:$16 sps:$4 sm:$0xff]   ;;  %v6022_v26 = vld [vmem:[%s8735_s1 + $0x8c] ss:$16 sps:$4 sm:$0xff]   ;;  %v6017_v27 = vld [vmem:[%s8735_s1 + $0x80] ss:$16 sps:$4 sm:$0xff]  }
  0x28   : > { %v6020_v28 = vld [vmem:[%s8735_s1 + $0x88] ss:$16 sps:$4 sm:$0xff]   ;;  %v6025_v29 = vld [vmem:[%s8735_s1 + $0x64] ss:$16 sps:$4 sm:$0xff]   ;;  %v6053_v53 = vld [vmem:[%s8735_s1 + $0x1c0] ss:$16 sps:$4 sm:$0xff]  }
  0x29   : > { %688 = vmatpush1.bf16.msra.mxu0 %v5947_v30  ;;  %729 = vmatpush1.bf16.msra.mxu1 %v5948_v31  ;;  %v6028_v30 = vld [vmem:[%s8735_s1 + $0x6c] ss:$16 sps:$4 sm:$0xff]   ;;  %v6023_v31 = vld [vmem:[%s8735_s1 + $0x60] ss:$16 sps:$4 sm:$0xff]   ;;  %v6050_v50 = vld [vmem:[%s8735_s1 + $0x1e8] ss:$16 sps:$4 sm:$0xff]  }
  0x2a   : > { %689 = vmatprep.subr.bf16.mxu0 %v5949_v32  ;;  %730 = vmatprep.subr.bf16.mxu1 %v5951_v33  ;;  %v6026_v32 = vld [vmem:[%s8735_s1 + $0x68] ss:$16 sps:$4 sm:$0xff]   ;;  %v6031_v33 = vld [vmem:[%s8735_s1 + $0x44] ss:$16 sps:$4 sm:$0xff]   ;;  %v6059_v57 = vld [vmem:[%s8735_s1 + $0x1a0] ss:$16 sps:$4 sm:$0xff]  }
  0x2b   : > { %v6056_v54 = vld [vmem:[%s8735_s1 + $0x1c8] ss:$16 sps:$4 sm:$0xff]   ;;  %v6070_v60 = vld [vmem:[%s8735_s1 + $0x18c] ss:$16 sps:$4 sm:$0xff]   ;;  %v6079_v3 = vld [vmem:[%s8735_s1 + $0x144] ss:$16 sps:$4 sm:$0xff]  }
  0x2c   : > { %v6068_v62 = vld [vmem:[%s8735_s1 + $0x188] ss:$16 sps:$4 sm:$0xff]   ;;  %v6088_v8 = vld [vmem:[%s8735_s1 + $0x12c] ss:$16 sps:$4 sm:$0xff]   ;;  %v6083_v9 = vld [vmem:[%s8735_s1 + $0x120] ss:$16 sps:$4 sm:$0xff]  }
  0x2d   : > { %690 = vmatpush2.bf16.msra.mxu0 %v5953_v34  ;;  %731 = vmatpush2.bf16.msra.mxu1 %v5954_v35  ;;  %v6034_v34 = vld [vmem:[%s8735_s1 + $0x4c] ss:$16 sps:$4 sm:$0xff]   ;;  %v6029_v35 = vld [vmem:[%s8735_s1 + $0x40] ss:$16 sps:$4 sm:$0xff]  }
  0x2e   : > { %691 = vmatprep.subr.bf16.mxu0 %v5955_v36  ;;  %732 = vmatprep.subr.bf16.mxu1 %v5957_v37  ;;  %v6032_v36 = vld [vmem:[%s8735_s1 + $0x48] ss:$16 sps:$4 sm:$0xff]   ;;  %v6037_v37 = vld [vmem:[%s8735_s1 + $0x24] ss:$16 sps:$4 sm:$0xff]  }
  0x31   : > { %692 = vmatpush2.bf16.msra.mxu0 %v5959_v38  ;;  %733 = vmatpush2.bf16.msra.mxu1 %v5960_v39  ;;  %v6040_v38 = vld [vmem:[%s8735_s1 + $0x2c] ss:$16 sps:$4 sm:$0xff]   ;;  %v6035_v39 = vld [vmem:[%s8735_s1 + $0x20] ss:$16 sps:$4 sm:$0xff]  }
  0x32   : > { %693 = vmatprep.subr.bf16.mxu0 %v5961_v40  ;;  %734 = vmatprep.subr.bf16.mxu1 %v5963_v41  ;;  %v6038_v40 = vld [vmem:[%s8735_s1 + $0x28] ss:$16 sps:$4 sm:$0xff]   ;;  %v6043_v41 = vld [vmem:[%s8735_s1 + $0x4] ss:$16 sps:$4 sm:$0xff]  }
  0x35   : > { %694 = vmatpush2.bf16.msra.mxu0 %v5965_v42  ;;  %735 = vmatpush2.bf16.msra.mxu1 %v5966_v43  ;;  %v6046_v42 = vld [vmem:[%s8735_s1 + $0xc] ss:$16 sps:$4 sm:$0xff]   ;;  %v6041_v43 = vld [vmem:[%s8735_s1] ss:$16 sps:$4 sm:$0xff]  }
  0x36   : > { %695 = vmatprep.subr.bf16.mxu0 %v5967_v44  ;;  %736 = vmatprep.subr.bf16.mxu1 %v5969_v45  ;;  %v6044_v44 = vld [vmem:[%s8735_s1 + $0x8] ss:$16 sps:$4 sm:$0xff]   ;;  %v6049_v45 = vld [vmem:[%s8735_s1 + $0x1e4] ss:$16 sps:$4 sm:$0xff]  }
  0x39   : > { %696 = vmatpush2.bf16.msra.mxu0 %v5971_v48  ;;  %737 = vmatpush2.bf16.msra.mxu1 %v5972_v49  ;;  %v6052_v48 = vld [vmem:[%s8735_s1 + $0x1ec] ss:$16 sps:$4 sm:$0xff]   ;;  %v6047_v49 = vld [vmem:[%s8735_s1 + $0x1e0] ss:$16 sps:$4 sm:$0xff]  }
  0x3a   : > { %697 = vmatprep.subr.bf16.mxu0 %v5973_v51  ;;  %738 = vmatprep.subr.bf16.mxu1 %v5975_v52  ;;  %v6055_v51 = vld [vmem:[%s8735_s1 + $0x1c4] ss:$16 sps:$4 sm:$0xff]   ;;  %v6058_v52 = vld [vmem:[%s8735_s1 + $0x1cc] ss:$16 sps:$4 sm:$0xff]  }
  0x3d   : > { %698 = vmatpush2.bf16.msra.mxu0 %v5977_v55  ;;  %739 = vmatpush2.bf16.msra.mxu1 %v5978_v56  ;;  %v6061_v55 = vld [vmem:[%s8735_s1 + $0x1a4] ss:$16 sps:$4 sm:$0xff]   ;;  %v6064_v56 = vld [vmem:[%s8735_s1 + $0x1ac] ss:$16 sps:$4 sm:$0xff]  }
  0x3e   : > { %699 = vmatprep.subr.bf16.mxu0 %v5979_v58  ;;  %740 = vmatprep.subr.bf16.mxu1 %v5981_v59  ;;  %v6062_v58 = vld [vmem:[%s8735_s1 + $0x1a8] ss:$16 sps:$4 sm:$0xff]   ;;  %v6067_v59 = vld [vmem:[%s8735_s1 + $0x184] ss:$16 sps:$4 sm:$0xff]  }
  0x41   : > { %700 = vmatpush2.bf16.msra.mxu0 %v5983_v61  ;;  %741 = vmatpush2.bf16.msra.mxu1 %v5984_v63  ;;  %v6065_v61 = vld [vmem:[%s8735_s1 + $0x180] ss:$16 sps:$4 sm:$0xff]   ;;  %v6073_v63 = vld [vmem:[%s8735_s1 + $0x164] ss:$16 sps:$4 sm:$0xff]  }
  0x42   : > { %701 = vmatprep.subr.bf16.mxu0 %v5985_v0  ;;  %742 = vmatprep.subr.bf16.mxu1 %v5987_v1  ;;  %v6076_v0 = vld [vmem:[%s8735_s1 + $0x16c] ss:$16 sps:$4 sm:$0xff]   ;;  %v6071_v1 = vld [vmem:[%s8735_s1 + $0x160] ss:$16 sps:$4 sm:$0xff]  }
  0x45   : > { %702 = vmatpush2.bf16.msra.mxu0 %v5989_v2  ;;  %743 = vmatpush2.bf16.msra.mxu1 %v5990_v4  ;;  %v6074_v2 = vld [vmem:[%s8735_s1 + $0x168] ss:$16 sps:$4 sm:$0xff]   ;;  %v6082_v4 = vld [vmem:[%s8735_s1 + $0x14c] ss:$16 sps:$4 sm:$0xff]  }
  0x46   : > { %703 = vmatprep.subr.bf16.mxu0 %v5991_v5  ;;  %744 = vmatprep.subr.bf16.mxu1 %v5993_v6  ;;  %v6077_v5 = vld [vmem:[%s8735_s1 + $0x140] ss:$16 sps:$4 sm:$0xff]   ;;  %v6080_v6 = vld [vmem:[%s8735_s1 + $0x148] ss:$16 sps:$4 sm:$0xff]  }
  0x49   : > { %704 = vmatpush2.bf16.msra.mxu0 %v5995_v7  ;;  %745 = vmatpush2.bf16.msra.mxu1 %v5996_v10  ;;  %v6085_v7 = vld [vmem:[%s8735_s1 + $0x124] ss:$16 sps:$4 sm:$0xff]   ;;  %v6086_v10 = vld [vmem:[%s8735_s1 + $0x128] ss:$16 sps:$4 sm:$0xff]  }
  0x4a   : > { %1079 = vmatprep.subr.bf16.mxu0 %v6001_v11  ;;  %1120 = vmatprep.subr.bf16.mxu1 %v6004_v12  ;;  %v6091_v11 = vld [vmem:[%s8735_s1 + $0x104] ss:$16 sps:$4 sm:$0xff]   ;;  %v6094_v12 = vld [vmem:[%s8735_s1 + $0x10c] ss:$16 sps:$4 sm:$0xff]  }
  0x4c   : > { %706 = vmatmul.mubr.bf16.vlgmr.msra.gmra.mxu0 %v343_v13  ;;  %747 = vmatmul.mubr.bf16.vlgmr.msra.gmra.mxu1 %v343_v13  ;;  %v6089_v13 = vld [vmem:[%s8735_s1 + $0x100] ss:$16 sps:$4 sm:$0xff]  }
  0x4d   : > { %1080 = vmatpush1.bf16.msra.mxu0 %v5999_v14  ;;  %1121 = vmatpush1.bf16.msra.mxu1 %v6002_v15  ;;  %v6092_v14 = vld [vmem:[%s8735_s1 + $0x108] ss:$16 sps:$4 sm:$0xff]   ;;  %v6099_v15 = vld [vmem:[%s8735_s1 + $0x4e4] ss:$16 sps:$4 sm:$0xff]  }
  0x4e   : > { %1081 = vmatprep.subr.bf16.mxu0 %v6007_v16  ;;  %1122 = vmatprep.subr.bf16.mxu1 %v6010_v17  ;;  %v6102_v16 = vld [vmem:[%s8735_s1 + $0x4ec] ss:$16 sps:$4 sm:$0xff]   ;;  %v4907_v17 = vcombine.low %v6986_v46, %v6986_v46  ;;  %v7264_v46 = vld [vmem:[%s6977_s10] sm:$0xee] }
  0x4f   : > { %1111 = vmatprep.mubr.bf16.mxu0 %v4908_v18  ;;  %1152 = vmatprep.mubr.bf16.mxu1 %v4908_v18  ;;  %v6097_v18 = vld [vmem:[%s8735_s1 + $0x4e0] ss:$16 sps:$4 sm:$0xff]  }
  0x51   : > { %1082 = vmatpush1.bf16.msra.mxu0 %v6005_v19  ;;  %1123 = vmatpush1.bf16.msra.mxu1 %v6008_v20  ;;  %v6100_v19 = vld [vmem:[%s8735_s1 + $0x4e8] ss:$16 sps:$4 sm:$0xff]   ;;  %v6105_v20 = vld [vmem:[%s8735_s1 + $0x4c4] ss:$16 sps:$4 sm:$0xff]  }
  0x52   : > { %1083 = vmatprep.subr.bf16.mxu0 %v6013_v21  ;;  %1124 = vmatprep.subr.bf16.mxu1 %v6016_v22  ;;  %v6108_v21 = vld [vmem:[%s8735_s1 + $0x4cc] ss:$16 sps:$4 sm:$0xff]   ;;  %v5038_v22 = vcombine.high %v7264_v46, %v6989_v47 }
  0x53   : > { %v6114_v47 = vld [vmem:[%s8735_s1 + $0x4ac] ss:$16 sps:$4 sm:$0xff]  }
  0x55   : > { %1084 = vmatpush1.bf16.msra.mxu0 %v6011_v23  ;;  %1125 = vmatpush1.bf16.msra.mxu1 %v6014_v24  ;;  %v6103_v23 = vld [vmem:[%s8735_s1 + $0x4c0] ss:$16 sps:$4 sm:$0xff]   ;;  %v6106_v24 = vld [vmem:[%s8735_s1 + $0x4c8] ss:$16 sps:$4 sm:$0xff]  }
  0x56   : > { %1085 = vmatprep.subr.bf16.mxu0 %v6019_v25  ;;  %1126 = vmatprep.subr.bf16.mxu1 %v6022_v26  ;;  %v6111_v25 = vld [vmem:[%s8735_s1 + $0x4a4] ss:$16 sps:$4 sm:$0xff]   ;;  %v1233_v26 = vrot.slane %v5038_v22, 1  ;;  %v6190_v22 = vld [vmem:[%s8735_s1 + $0x508] ss:$16 sps:$4 sm:$0xff]  }
  0x59   : > { %1086 = vmatpush1.bf16.msra.mxu0 %v6017_v27  ;;  %1127 = vmatpush1.bf16.msra.mxu1 %v6020_v28  ;;  %v6109_v27 = vld [vmem:[%s8735_s1 + $0x4a0] ss:$16 sps:$4 sm:$0xff]   ;;  %v6112_v28 = vld [vmem:[%s8735_s1 + $0x4a8] ss:$16 sps:$4 sm:$0xff]  }
  0x5a   : > { %1087 = vmatprep.subr.bf16.mxu0 %v6025_v29  ;;  %1128 = vmatprep.subr.bf16.mxu1 %v6028_v30  ;;  %v6117_v29 = vld [vmem:[%s8735_s1 + $0x484] ss:$16 sps:$4 sm:$0xff]   ;;  %v6120_v30 = vld [vmem:[%s8735_s1 + $0x48c] ss:$16 sps:$4 sm:$0xff]  }
  0x5d   : > { %1088 = vmatpush1.bf16.msra.mxu0 %v6023_v31  ;;  %1129 = vmatpush1.bf16.msra.mxu1 %v6026_v32  ;;  %v6115_v31 = vld [vmem:[%s8735_s1 + $0x480] ss:$16 sps:$4 sm:$0xff]   ;;  %v6118_v32 = vld [vmem:[%s8735_s1 + $0x488] ss:$16 sps:$4 sm:$0xff]  }
  0x5e   : > { %1089 = vmatprep.subr.bf16.mxu0 %v6031_v33  ;;  %1130 = vmatprep.subr.bf16.mxu1 %v6034_v34  ;;  %v6123_v33 = vld [vmem:[%s8735_s1 + $0x464] ss:$16 sps:$4 sm:$0xff]   ;;  %v6126_v34 = vld [vmem:[%s8735_s1 + $0x46c] ss:$16 sps:$4 sm:$0xff]  }
  0x61   : > { %1090 = vmatpush1.bf16.msra.mxu0 %v6029_v35  ;;  %1131 = vmatpush1.bf16.msra.mxu1 %v6032_v36  ;;  %v6121_v35 = vld [vmem:[%s8735_s1 + $0x460] ss:$16 sps:$4 sm:$0xff]   ;;  %v6124_v36 = vld [vmem:[%s8735_s1 + $0x468] ss:$16 sps:$4 sm:$0xff]  }
  0x62   : > { %1091 = vmatprep.subr.bf16.mxu0 %v6037_v37  ;;  %1132 = vmatprep.subr.bf16.mxu1 %v6040_v38  ;;  %v6129_v37 = vld [vmem:[%s8735_s1 + $0x444] ss:$16 sps:$4 sm:$0xff]   ;;  %v6132_v38 = vld [vmem:[%s8735_s1 + $0x44c] ss:$16 sps:$4 sm:$0xff]  }
  0x65   : > { %1092 = vmatpush1.bf16.msra.mxu0 %v6035_v39  ;;  %1133 = vmatpush1.bf16.msra.mxu1 %v6038_v40  ;;  %v6127_v39 = vld [vmem:[%s8735_s1 + $0x440] ss:$16 sps:$4 sm:$0xff]   ;;  %v6130_v40 = vld [vmem:[%s8735_s1 + $0x448] ss:$16 sps:$4 sm:$0xff]  }
  0x66   : > { %1093 = vmatprep.subr.bf16.mxu0 %v6043_v41  ;;  %1134 = vmatprep.subr.bf16.mxu1 %v6046_v42  ;;  %v6135_v41 = vld [vmem:[%s8735_s1 + $0x424] ss:$16 sps:$4 sm:$0xff]   ;;  %v6138_v42 = vld [vmem:[%s8735_s1 + $0x42c] ss:$16 sps:$4 sm:$0xff]  }
  0x69   : > { %1094 = vmatpush1.bf16.msra.mxu0 %v6041_v43  ;;  %1135 = vmatpush1.bf16.msra.mxu1 %v6044_v44  ;;  %v6133_v43 = vld [vmem:[%s8735_s1 + $0x420] ss:$16 sps:$4 sm:$0xff]   ;;  %v6136_v44 = vld [vmem:[%s8735_s1 + $0x428] ss:$16 sps:$4 sm:$0xff]  }
  0x6a   : > { %1095 = vmatprep.subr.bf16.mxu0 %v6049_v45  ;;  %1136 = vmatprep.subr.bf16.mxu1 %v6052_v48  ;;  %v6141_v45 = vld [vmem:[%s8735_s1 + $0x404] ss:$16 sps:$4 sm:$0xff]   ;;  %v6144_v48 = vld [vmem:[%s8735_s1 + $0x40c] ss:$16 sps:$4 sm:$0xff]  }
  0x6d   : > { %1096 = vmatpush2.bf16.msra.mxu0 %v6047_v49  ;;  %1137 = vmatpush2.bf16.msra.mxu1 %v6050_v50  ;;  %v6139_v49 = vld [vmem:[%s8735_s1 + $0x400] ss:$16 sps:$4 sm:$0xff]   ;;  %v6142_v50 = vld [vmem:[%s8735_s1 + $0x408] ss:$16 sps:$4 sm:$0xff]  }
  0x6e   : > { %1097 = vmatprep.subr.bf16.mxu0 %v6055_v51  ;;  %1138 = vmatprep.subr.bf16.mxu1 %v6058_v52  ;;  %v6147_v51 = vld [vmem:[%s8735_s1 + $0x5e4] ss:$16 sps:$4 sm:$0xff]   ;;  %v6150_v52 = vld [vmem:[%s8735_s1 + $0x5ec] ss:$16 sps:$4 sm:$0xff]  }
  0x71   : > { %1098 = vmatpush2.bf16.msra.mxu0 %v6053_v53  ;;  %1139 = vmatpush2.bf16.msra.mxu1 %v6056_v54  ;;  %v6145_v53 = vld [vmem:[%s8735_s1 + $0x5e0] ss:$16 sps:$4 sm:$0xff]   ;;  %v6148_v54 = vld [vmem:[%s8735_s1 + $0x5e8] ss:$16 sps:$4 sm:$0xff]  }
  0x72   : > { %1099 = vmatprep.subr.bf16.mxu0 %v6061_v55  ;;  %1140 = vmatprep.subr.bf16.mxu1 %v6064_v56  ;;  %v6153_v55 = vld [vmem:[%s8735_s1 + $0x5c4] ss:$16 sps:$4 sm:$0xff]   ;;  %v6156_v56 = vld [vmem:[%s8735_s1 + $0x5cc] ss:$16 sps:$4 sm:$0xff]  }
  0x75   : > { %1100 = vmatpush2.bf16.msra.mxu0 %v6059_v57  ;;  %1141 = vmatpush2.bf16.msra.mxu1 %v6062_v58  ;;  %v6151_v57 = vld [vmem:[%s8735_s1 + $0x5c0] ss:$16 sps:$4 sm:$0xff]   ;;  %v6154_v58 = vld [vmem:[%s8735_s1 + $0x5c8] ss:$16 sps:$4 sm:$0xff]  }
  0x76   : > { %1101 = vmatprep.subr.bf16.mxu0 %v6067_v59  ;;  %1142 = vmatprep.subr.bf16.mxu1 %v6070_v60  ;;  %v6159_v59 = vld [vmem:[%s8735_s1 + $0x5a4] ss:$16 sps:$4 sm:$0xff]   ;;  %v6162_v60 = vld [vmem:[%s8735_s1 + $0x5ac] ss:$16 sps:$4 sm:$0xff]  }
  0x79   : > { %1102 = vmatpush2.bf16.msra.mxu0 %v6065_v61  ;;  %1143 = vmatpush2.bf16.msra.mxu1 %v6068_v62  ;;  %v6157_v61 = vld [vmem:[%s8735_s1 + $0x5a0] ss:$16 sps:$4 sm:$0xff]   ;;  %v6160_v62 = vld [vmem:[%s8735_s1 + $0x5a8] ss:$16 sps:$4 sm:$0xff]  }
  0x7a   : > { %1103 = vmatprep.subr.bf16.mxu0 %v6073_v63  ;;  %1144 = vmatprep.subr.bf16.mxu1 %v6076_v0  ;;  %v6165_v63 = vld [vmem:[%s8735_s1 + $0x584] ss:$16 sps:$4 sm:$0xff]   ;;  %v6168_v0 = vld [vmem:[%s8735_s1 + $0x58c] ss:$16 sps:$4 sm:$0xff]  }
  0x7d   : > { %1104 = vmatpush2.bf16.msra.mxu0 %v6071_v1  ;;  %1145 = vmatpush2.bf16.msra.mxu1 %v6074_v2  ;;  %v6163_v1 = vld [vmem:[%s8735_s1 + $0x580] ss:$16 sps:$4 sm:$0xff]   ;;  %v6166_v2 = vld [vmem:[%s8735_s1 + $0x588] ss:$16 sps:$4 sm:$0xff]  }
  0x7e   : > { %1105 = vmatprep.subr.bf16.mxu0 %v6079_v3  ;;  %1146 = vmatprep.subr.bf16.mxu1 %v6082_v4  ;;  %v6171_v3 = vld [vmem:[%s8735_s1 + $0x564] ss:$16 sps:$4 sm:$0xff]   ;;  %v6174_v4 = vld [vmem:[%s8735_s1 + $0x56c] ss:$16 sps:$4 sm:$0xff]  }
  0x81   : > { %1106 = vmatpush2.bf16.msra.mxu0 %v6077_v5  ;;  %1147 = vmatpush2.bf16.msra.mxu1 %v6080_v6  ;;  %v6169_v5 = vld [vmem:[%s8735_s1 + $0x560] ss:$16 sps:$4 sm:$0xff]   ;;  %v6172_v6 = vld [vmem:[%s8735_s1 + $0x568] ss:$16 sps:$4 sm:$0xff]  }
  0x82   : > { %1107 = vmatprep.subr.bf16.mxu0 %v6085_v7  ;;  %1148 = vmatprep.subr.bf16.mxu1 %v6088_v8  ;;  %v6177_v7 = vld [vmem:[%s8735_s1 + $0x544] ss:$16 sps:$4 sm:$0xff]   ;;  %v6180_v8 = vld [vmem:[%s8735_s1 + $0x54c] ss:$16 sps:$4 sm:$0xff]  }
  0x85   : > { %1108 = vmatpush2.bf16.msra.mxu0 %v6083_v9  ;;  %1149 = vmatpush2.bf16.msra.mxu1 %v6086_v10  ;;  %v6175_v9 = vld [vmem:[%s8735_s1 + $0x540] ss:$16 sps:$4 sm:$0xff]   ;;  %v6178_v10 = vld [vmem:[%s8735_s1 + $0x548] ss:$16 sps:$4 sm:$0xff]  }
  0x86   : > { %1109 = vmatprep.subr.bf16.mxu0 %v6091_v11  ;;  %1150 = vmatprep.subr.bf16.mxu1 %v6094_v12  ;;  %v6183_v11 = vld [vmem:[%s8735_s1 + $0x524] ss:$16 sps:$4 sm:$0xff]   ;;  %v6186_v12 = vld [vmem:[%s8735_s1 + $0x52c] ss:$16 sps:$4 sm:$0xff]  }
  0x89   : > { %1110 = vmatpush2.bf16.msra.mxu0 %v6089_v13  ;;  %1151 = vmatpush2.bf16.msra.mxu1 %v6092_v14  ;;  %v6181_v13 = vld [vmem:[%s8735_s1 + $0x520] ss:$16 sps:$4 sm:$0xff]   ;;  %v6184_v14 = vld [vmem:[%s8735_s1 + $0x528] ss:$16 sps:$4 sm:$0xff]  }
  0x8a   : > { %1556 = vmatprep.subr.bf16.mxu0 %v6099_v15  ;;  %1597 = vmatprep.subr.bf16.mxu1 %v6102_v16  ;;  %v6189_v15 = vld [vmem:[%s8735_s1 + $0x504] ss:$16 sps:$4 sm:$0xff]   ;;  %v6192_v16 = vld [vmem:[%s8735_s1 + $0x50c] ss:$16 sps:$4 sm:$0xff]  }
  0x8c   : > { %1112 = vmatmul.mubr.bf16.vlgmr.msra.gmra.mxu0 %v4907_v17  ;;  %1153 = vmatmul.mubr.bf16.vlgmr.msra.gmra.mxu1 %v4907_v17  ;;  %v7437_v17 = vld [vmem:[%s6977_s10] sm:$0xcc] }
  0x8d   : > { %1557 = vmatpush1.bf16.msra.mxu0 %v6097_v18  ;;  %1598 = vmatpush1.bf16.msra.mxu1 %v6100_v19  ;;  %v6791_v18 = vld [vmem:[%s6977_s10 + $0x8] sm:$0x11] }
  0x8e   : > { %1558 = vmatprep.subr.bf16.mxu0 %v6105_v20  ;;  %1599 = vmatprep.subr.bf16.mxu1 %v6108_v21  ;;  %v5037_v19 = vcombine.low %v7264_v46, %v6791_v18  ;;  %v7442_v20 = vld [vmem:[%s6977_s10 + $0x8] sm:$0x33]  ;;  %v6187_v21 = vld [vmem:[%s8735_s1 + $0x500] ss:$16 sps:$4 sm:$0xff]  }
  0x8f   : > { %1588 = vmatprep.mubr.bf16.mxu0 %v1233_v26  ;;  %1629 = vmatprep.mubr.bf16.mxu1 %v1233_v26  ;;  %v6200_v46 = vld [vmem:[%s8735_s1 + $0x6ec] ss:$16 sps:$4 sm:$0xff]   ;;  %v6195_v26 = vld [vmem:[%s8735_s1 + $0x6e0] ss:$16 sps:$4 sm:$0xff]  }
  0x90   : > { %v7618_v18 = vld [vmem:[%s6977_s10 + $0x8] sm:$0x77] }
  0x91   : > { %1559 = vmatpush1.bf16.msra.mxu0 %v6103_v23  ;;  %1600 = vmatpush1.bf16.msra.mxu1 %v6106_v24  ;;  %v6197_v23 = vld [vmem:[%s8735_s1 + $0x6e4] ss:$16 sps:$4 sm:$0xff]   ;;  %v5168_v24 = vcombine.high %v7437_v17, %v7442_v20 }
  0x92   : > { %1560 = vmatprep.subr.bf16.mxu0 %v6111_v25  ;;  %1601 = vmatprep.subr.bf16.mxu1 %v6114_v47  ;;  %v1232_v25 = vrot.slane %v5037_v19, 1  ;;  %v6198_v47 = vld [vmem:[%s8735_s1 + $0x6e8] ss:$16 sps:$4 sm:$0xff]  }
  0x93   : > { %v6276_v19 = vld [vmem:[%s8735_s1 + $0x748] ss:$16 sps:$4 sm:$0xff]  }
  0x95   : > { %1561 = vmatpush1.bf16.msra.mxu0 %v6109_v27  ;;  %1602 = vmatpush1.bf16.msra.mxu1 %v6112_v28  ;;  %v6203_v27 = vld [vmem:[%s8735_s1 + $0x6c4] ss:$16 sps:$4 sm:$0xff]   ;;  %v6206_v28 = vld [vmem:[%s8735_s1 + $0x6cc] ss:$16 sps:$4 sm:$0xff]  }
  0x96   : > { %1562 = vmatprep.subr.bf16.mxu0 %v6117_v29  ;;  %1603 = vmatprep.subr.bf16.mxu1 %v6120_v30  ;;  %v1718_v29 = vrot.slane %v5168_v24, 2  ;;  %v6201_v30 = vld [vmem:[%s8735_s1 + $0x6c0] ss:$16 sps:$4 sm:$0xff]   ;;  %v6282_v24 = vld [vmem:[%s8735_s1 + $0x728] ss:$16 sps:$4 sm:$0xff]  }
  0x99   : > { %1563 = vmatpush1.bf16.msra.mxu0 %v6115_v31  ;;  %1604 = vmatpush1.bf16.msra.mxu1 %v6118_v32  ;;  %v6204_v31 = vld [vmem:[%s8735_s1 + $0x6c8] ss:$16 sps:$4 sm:$0xff]   ;;  %v6209_v32 = vld [vmem:[%s8735_s1 + $0x6a4] ss:$16 sps:$4 sm:$0xff]  }
  0x9a   : > { %1564 = vmatprep.subr.bf16.mxu0 %v6123_v33  ;;  %1605 = vmatprep.subr.bf16.mxu1 %v6126_v34  ;;  %v6212_v33 = vld [vmem:[%s8735_s1 + $0x6ac] ss:$16 sps:$4 sm:$0xff]   ;;  %v6207_v34 = vld [vmem:[%s8735_s1 + $0x6a0] ss:$16 sps:$4 sm:$0xff]  }
  0x9d   : > { %1565 = vmatpush1.bf16.msra.mxu0 %v6121_v35  ;;  %1606 = vmatpush1.bf16.msra.mxu1 %v6124_v36  ;;  %v6210_v35 = vld [vmem:[%s8735_s1 + $0x6a8] ss:$16 sps:$4 sm:$0xff]   ;;  %v6215_v36 = vld [vmem:[%s8735_s1 + $0x684] ss:$16 sps:$4 sm:$0xff]  }
  0x9e   : > { %1566 = vmatprep.subr.bf16.mxu0 %v6129_v37  ;;  %1607 = vmatprep.subr.bf16.mxu1 %v6132_v38  ;;  %v6218_v37 = vld [vmem:[%s8735_s1 + $0x68c] ss:$16 sps:$4 sm:$0xff]   ;;  %v6213_v38 = vld [vmem:[%s8735_s1 + $0x680] ss:$16 sps:$4 sm:$0xff]  }
  0xa1   : > { %1567 = vmatpush1.bf16.msra.mxu0 %v6127_v39  ;;  %1608 = vmatpush1.bf16.msra.mxu1 %v6130_v40  ;;  %v6216_v39 = vld [vmem:[%s8735_s1 + $0x688] ss:$16 sps:$4 sm:$0xff]   ;;  %v6221_v40 = vld [vmem:[%s8735_s1 + $0x664] ss:$16 sps:$4 sm:$0xff]  }
  0xa2   : > { %1568 = vmatprep.subr.bf16.mxu0 %v6135_v41  ;;  %1609 = vmatprep.subr.bf16.mxu1 %v6138_v42  ;;  %v6224_v41 = vld [vmem:[%s8735_s1 + $0x66c] ss:$16 sps:$4 sm:$0xff]   ;;  %v6219_v42 = vld [vmem:[%s8735_s1 + $0x660] ss:$16 sps:$4 sm:$0xff]  }
  0xa5   : > { %1569 = vmatpush1.bf16.msra.mxu0 %v6133_v43  ;;  %1610 = vmatpush1.bf16.msra.mxu1 %v6136_v44  ;;  %v6222_v43 = vld [vmem:[%s8735_s1 + $0x668] ss:$16 sps:$4 sm:$0xff]   ;;  %v6227_v44 = vld [vmem:[%s8735_s1 + $0x644] ss:$16 sps:$4 sm:$0xff]  }
  0xa6   : > { %1570 = vmatprep.subr.bf16.mxu0 %v6141_v45  ;;  %1611 = vmatprep.subr.bf16.mxu1 %v6144_v48  ;;  %v6230_v45 = vld [vmem:[%s8735_s1 + $0x64c] ss:$16 sps:$4 sm:$0xff]   ;;  %v6225_v48 = vld [vmem:[%s8735_s1 + $0x640] ss:$16 sps:$4 sm:$0xff]  }
  0xa9   : > { %1571 = vmatpush1.bf16.msra.mxu0 %v6139_v49  ;;  %1612 = vmatpush1.bf16.msra.mxu1 %v6142_v50  ;;  %v6228_v49 = vld [vmem:[%s8735_s1 + $0x648] ss:$16 sps:$4 sm:$0xff]   ;;  %v6233_v50 = vld [vmem:[%s8735_s1 + $0x624] ss:$16 sps:$4 sm:$0xff]  }
  0xaa   : > { %1572 = vmatprep.subr.bf16.mxu0 %v6147_v51  ;;  %1613 = vmatprep.subr.bf16.mxu1 %v6150_v52  ;;  %v6236_v51 = vld [vmem:[%s8735_s1 + $0x62c] ss:$16 sps:$4 sm:$0xff]   ;;  %v6231_v52 = vld [vmem:[%s8735_s1 + $0x620] ss:$16 sps:$4 sm:$0xff]  }
  0xad   : > { %1573 = vmatpush2.bf16.msra.mxu0 %v6145_v53  ;;  %1614 = vmatpush2.bf16.msra.mxu1 %v6148_v54  ;;  %v6234_v53 = vld [vmem:[%s8735_s1 + $0x628] ss:$16 sps:$4 sm:$0xff]   ;;  %v6239_v54 = vld [vmem:[%s8735_s1 + $0x604] ss:$16 sps:$4 sm:$0xff]  }
  0xae   : > { %1574 = vmatprep.subr.bf16.mxu0 %v6153_v55  ;;  %1615 = vmatprep.subr.bf16.mxu1 %v6156_v56  ;;  %v6242_v55 = vld [vmem:[%s8735_s1 + $0x60c] ss:$16 sps:$4 sm:$0xff]   ;;  %v6237_v56 = vld [vmem:[%s8735_s1 + $0x600] ss:$16 sps:$4 sm:$0xff]  }
  0xb1   : > { %1575 = vmatpush2.bf16.msra.mxu0 %v6151_v57  ;;  %1616 = vmatpush2.bf16.msra.mxu1 %v6154_v58  ;;  %v6240_v57 = vld [vmem:[%s8735_s1 + $0x608] ss:$16 sps:$4 sm:$0xff]   ;;  %v6245_v58 = vld [vmem:[%s8735_s1 + $0x7e4] ss:$16 sps:$4 sm:$0xff]  }
  0xb2   : > { %1576 = vmatprep.subr.bf16.mxu0 %v6159_v59  ;;  %1617 = vmatprep.subr.bf16.mxu1 %v6162_v60  ;;  %v6248_v59 = vld [vmem:[%s8735_s1 + $0x7ec] ss:$16 sps:$4 sm:$0xff]   ;;  %v6243_v60 = vld [vmem:[%s8735_s1 + $0x7e0] ss:$16 sps:$4 sm:$0xff]  }
  0xb5   : > { %1577 = vmatpush2.bf16.msra.mxu0 %v6157_v61  ;;  %1618 = vmatpush2.bf16.msra.mxu1 %v6160_v62  ;;  %v6246_v61 = vld [vmem:[%s8735_s1 + $0x7e8] ss:$16 sps:$4 sm:$0xff]   ;;  %v6251_v62 = vld [vmem:[%s8735_s1 + $0x7c4] ss:$16 sps:$4 sm:$0xff]  }
  0xb6   : > { %1578 = vmatprep.subr.bf16.mxu0 %v6165_v63  ;;  %1619 = vmatprep.subr.bf16.mxu1 %v6168_v0  ;;  %v6254_v63 = vld [vmem:[%s8735_s1 + $0x7cc] ss:$16 sps:$4 sm:$0xff]   ;;  %v6249_v0 = vld [vmem:[%s8735_s1 + $0x7c0] ss:$16 sps:$4 sm:$0xff]  }
  0xb9   : > { %1579 = vmatpush2.bf16.msra.mxu0 %v6163_v1  ;;  %1620 = vmatpush2.bf16.msra.mxu1 %v6166_v2  ;;  %v6252_v1 = vld [vmem:[%s8735_s1 + $0x7c8] ss:$16 sps:$4 sm:$0xff]   ;;  %v6257_v2 = vld [vmem:[%s8735_s1 + $0x7a4] ss:$16 sps:$4 sm:$0xff]  }
  0xba   : > { %1580 = vmatprep.subr.bf16.mxu0 %v6171_v3  ;;  %1621 = vmatprep.subr.bf16.mxu1 %v6174_v4  ;;  %v6260_v3 = vld [vmem:[%s8735_s1 + $0x7ac] ss:$16 sps:$4 sm:$0xff]   ;;  %v6255_v4 = vld [vmem:[%s8735_s1 + $0x7a0] ss:$16 sps:$4 sm:$0xff]  }
  0xbd   : > { %1581 = vmatpush2.bf16.msra.mxu0 %v6169_v5  ;;  %1622 = vmatpush2.bf16.msra.mxu1 %v6172_v6  ;;  %v6258_v5 = vld [vmem:[%s8735_s1 + $0x7a8] ss:$16 sps:$4 sm:$0xff]   ;;  %v6263_v6 = vld [vmem:[%s8735_s1 + $0x784] ss:$16 sps:$4 sm:$0xff]  }
  0xbe   : > { %1582 = vmatprep.subr.bf16.mxu0 %v6177_v7  ;;  %1623 = vmatprep.subr.bf16.mxu1 %v6180_v8  ;;  %v6266_v7 = vld [vmem:[%s8735_s1 + $0x78c] ss:$16 sps:$4 sm:$0xff]   ;;  %v6261_v8 = vld [vmem:[%s8735_s1 + $0x780] ss:$16 sps:$4 sm:$0xff]  }
  0xc1   : > { %1583 = vmatpush2.bf16.msra.mxu0 %v6175_v9  ;;  %1624 = vmatpush2.bf16.msra.mxu1 %v6178_v10  ;;  %v6264_v9 = vld [vmem:[%s8735_s1 + $0x788] ss:$16 sps:$4 sm:$0xff]   ;;  %v6269_v10 = vld [vmem:[%s8735_s1 + $0x764] ss:$16 sps:$4 sm:$0xff]  }
  0xc2   : > { %1584 = vmatprep.subr.bf16.mxu0 %v6183_v11  ;;  %1625 = vmatprep.subr.bf16.mxu1 %v6186_v12  ;;  %v6272_v11 = vld [vmem:[%s8735_s1 + $0x76c] ss:$16 sps:$4 sm:$0xff]   ;;  %v6267_v12 = vld [vmem:[%s8735_s1 + $0x760] ss:$16 sps:$4 sm:$0xff]  }
  0xc5   : > { %1585 = vmatpush2.bf16.msra.mxu0 %v6181_v13  ;;  %1626 = vmatpush2.bf16.msra.mxu1 %v6184_v14  ;;  %v6270_v13 = vld [vmem:[%s8735_s1 + $0x768] ss:$16 sps:$4 sm:$0xff]   ;;  %v6275_v14 = vld [vmem:[%s8735_s1 + $0x744] ss:$16 sps:$4 sm:$0xff]  }
  0xc6   : > { %1586 = vmatprep.subr.bf16.mxu0 %v6189_v15  ;;  %1627 = vmatprep.subr.bf16.mxu1 %v6192_v16  ;;  %v6278_v15 = vld [vmem:[%s8735_s1 + $0x74c] ss:$16 sps:$4 sm:$0xff]   ;;  %v6273_v16 = vld [vmem:[%s8735_s1 + $0x740] ss:$16 sps:$4 sm:$0xff]  }
  0xc9   : > { %1587 = vmatpush2.bf16.msra.mxu0 %v6187_v21  ;;  %1628 = vmatpush2.bf16.msra.mxu1 %v6190_v22  ;;  %v6281_v21 = vld [vmem:[%s8735_s1 + $0x724] ss:$16 sps:$4 sm:$0xff]   ;;  %v6284_v22 = vld [vmem:[%s8735_s1 + $0x72c] ss:$16 sps:$4 sm:$0xff]  }
  0xca   : > { %2041 = vmatprep.subr.bf16.mxu0 %v6197_v23  ;;  %2082 = vmatprep.subr.bf16.mxu1 %v6200_v46  ;;  %v5298_v23 = vcombine.high %v7437_v17, %v7618_v18  ;;  %v6279_v46 = vld [vmem:[%s8735_s1 + $0x720] ss:$16 sps:$4 sm:$0xff]  }
  0xcc   : > { %1589 = vmatmul.mubr.bf16.vlgmr.msra.gmra.mxu0 %v1232_v25  ;;  %1630 = vmatmul.mubr.bf16.vlgmr.msra.gmra.mxu1 %v1232_v25  ;;  %v6287_v25 = vld [vmem:[%s8735_s1 + $0x704] ss:$16 sps:$4 sm:$0xff]  }
  0xcd   : > { %2042 = vmatpush1.bf16.msra.mxu0 %v6195_v26  ;;  %2083 = vmatpush1.bf16.msra.mxu1 %v6198_v47  ;;  %v6290_v26 = vld [vmem:[%s8735_s1 + $0x70c] ss:$16 sps:$4 sm:$0xff]   ;;  %v2207_v47 = vshrl.u32 %v5298_v23, 16 }
  0xce   : > { %2043 = vmatprep.subr.bf16.mxu0 %v6203_v27  ;;  %2084 = vmatprep.subr.bf16.mxu1 %v6206_v28  ;;  %v2210_v27 = vshll.u32 %v5298_v23, 16  ;;  %v6285_v28 = vld [vmem:[%s8735_s1 + $0x700] ss:$16 sps:$4 sm:$0xff]   ;;  %v6355_v23 = vld [vmem:[%s8735_s1 + $0x9a4] ss:$16 sps:$4 sm:$0xff]  }
  0xcf   : > { %2073 = vmatprep.mubr.bf16.mxu0 %v1718_v29  ;;  %2114 = vmatprep.mubr.bf16.mxu1 %v1718_v29  ;;  %v5167_v29 = vcombine.low %v7437_v17, %v7442_v20  ;;  %v6293_v20 = vld [vmem:[%s8735_s1 + $0x8e0] ss:$16 sps:$4 sm:$0xff]  }
  0xd1   : > { %2044 = vmatpush1.bf16.msra.mxu0 %v6201_v30  ;;  %2085 = vmatpush1.bf16.msra.mxu1 %v6204_v31  ;;  %v6288_v30 = vld [vmem:[%s8735_s1 + $0x708] ss:$16 sps:$4 sm:$0xff]   ;;  %v6295_v31 = vld [vmem:[%s8735_s1 + $0x8e4] ss:$16 sps:$4 sm:$0xff]  }
  0xd2   : > { %2045 = vmatprep.subr.bf16.mxu0 %v6209_v32  ;;  %2086 = vmatprep.subr.bf16.mxu1 %v6212_v33  ;;  %v6298_v32 = vld [vmem:[%s8735_s1 + $0x8ec] ss:$16 sps:$4 sm:$0xff]   ;;  %v2209_v33 = vrot.slane %v2207_v47, 2 }
  0xd3   : > { %v6364_v47 = vld [vmem:[%s8735_s1 + $0x98c] ss:$16 sps:$4 sm:$0xff]  }
  0xd5   : > { %2046 = vmatpush1.bf16.msra.mxu0 %v6207_v34  ;;  %2087 = vmatpush1.bf16.msra.mxu1 %v6210_v35  ;;  %v2212_v34 = vrot.slane %v2210_v27, 3  ;;  %v1717_v35 = vrot.slane %v5167_v29, 2  ;;  %v6359_v27 = vld [vmem:[%s8735_s1 + $0x980] ss:$16 sps:$4 sm:$0xff]   ;;  %v6367_v29 = vld [vmem:[%s8735_s1 + $0x964] ss:$16 sps:$4 sm:$0xff]  }
  0xd6   : > { %2047 = vmatprep.subr.bf16.mxu0 %v6215_v36  ;;  %2088 = vmatprep.subr.bf16.mxu1 %v6218_v37  ;;  %v6296_v36 = vld [vmem:[%s8735_s1 + $0x8e8] ss:$16 sps:$4 sm:$0xff]   ;;  %v6301_v37 = vld [vmem:[%s8735_s1 + $0x8c4] ss:$16 sps:$4 sm:$0xff]  }
  0xd9   : > { %2048 = vmatpush1.bf16.msra.mxu0 %v6213_v38  ;;  %2089 = vmatpush1.bf16.msra.mxu1 %v6216_v39  ;;  %v6304_v38 = vld [vmem:[%s8735_s1 + $0x8cc] ss:$16 sps:$4 sm:$0xff]   ;;  %v2213_v39 = vor.u32 %v2212_v34, %v2209_v33  ;;  %v6373_v33 = vld [vmem:[%s8735_s1 + $0x944] ss:$16 sps:$4 sm:$0xff]  }
  0xda   : > { %2049 = vmatprep.subr.bf16.mxu0 %v6221_v40  ;;  %2090 = vmatprep.subr.bf16.mxu1 %v6224_v41  ;;  %v6376_v34 = vld [vmem:[%s8735_s1 + $0x94c] ss:$16 sps:$4 sm:$0xff]  }
  0xdd   : > { %2050 = vmatpush1.bf16.msra.mxu0 %v6219_v42  ;;  %2091 = vmatpush1.bf16.msra.mxu1 %v6222_v43  ;;  %v6299_v42 = vld [vmem:[%s8735_s1 + $0x8c0] ss:$16 sps:$4 sm:$0xff]   ;;  %v6302_v43 = vld [vmem:[%s8735_s1 + $0x8c8] ss:$16 sps:$4 sm:$0xff]  }
  0xde   : > { %2051 = vmatprep.subr.bf16.mxu0 %v6227_v44  ;;  %2092 = vmatprep.subr.bf16.mxu1 %v6230_v45  ;;  %v6307_v44 = vld [vmem:[%s8735_s1 + $0x8a4] ss:$16 sps:$4 sm:$0xff]  }
  0xe1   : > { %2052 = vmatpush1.bf16.msra.mxu0 %v6225_v48  ;;  %2093 = vmatpush1.bf16.msra.mxu1 %v6228_v49  ;;  %v6310_v49 = vld [vmem:[%s8735_s1 + $0x8ac] ss:$16 sps:$4 sm:$0xff]  }
  0xe2   : > { %2053 = vmatprep.subr.bf16.mxu0 %v6233_v50  ;;  %2094 = vmatprep.subr.bf16.mxu1 %v6236_v51 }
  0xe5   : > { %2054 = vmatpush1.bf16.msra.mxu0 %v6231_v52  ;;  %2095 = vmatpush1.bf16.msra.mxu1 %v6234_v53  ;;  %v6305_v52 = vld [vmem:[%s8735_s1 + $0x8a0] ss:$16 sps:$4 sm:$0xff]   ;;  %v6308_v53 = vld [vmem:[%s8735_s1 + $0x8a8] ss:$16 sps:$4 sm:$0xff]  }
  0xe6   : > { %2055 = vmatprep.subr.bf16.mxu0 %v6239_v54  ;;  %2096 = vmatprep.subr.bf16.mxu1 %v6242_v55 }
  0xe9   : > { %2056 = vmatpush1.bf16.msra.mxu0 %v6237_v56  ;;  %2097 = vmatpush1.bf16.msra.mxu1 %v6240_v57  ;;  %v6313_v56 = vld [vmem:[%s8735_s1 + $0x884] ss:$16 sps:$4 sm:$0xff]   ;;  %v6316_v57 = vld [vmem:[%s8735_s1 + $0x88c] ss:$16 sps:$4 sm:$0xff]  }
  0xea   : > { %2057 = vmatprep.subr.bf16.mxu0 %v6245_v58  ;;  %2098 = vmatprep.subr.bf16.mxu1 %v6248_v59  ;;  %v6311_v58 = vld [vmem:[%s8735_s1 + $0x880] ss:$16 sps:$4 sm:$0xff]   ;;  %v6314_v59 = vld [vmem:[%s8735_s1 + $0x888] ss:$16 sps:$4 sm:$0xff]  }
  0xed   : > { %2058 = vmatpush2.bf16.msra.mxu0 %v6243_v60  ;;  %2099 = vmatpush2.bf16.msra.mxu1 %v6246_v61  ;;  %v6319_v60 = vld [vmem:[%s8735_s1 + $0x864] ss:$16 sps:$4 sm:$0xff]   ;;  %v6322_v61 = vld [vmem:[%s8735_s1 + $0x86c] ss:$16 sps:$4 sm:$0xff]  }
  0xee   : > { %2059 = vmatprep.subr.bf16.mxu0 %v6251_v62  ;;  %2100 = vmatprep.subr.bf16.mxu1 %v6254_v63  ;;  %v6317_v62 = vld [vmem:[%s8735_s1 + $0x860] ss:$16 sps:$4 sm:$0xff]   ;;  %v6320_v63 = vld [vmem:[%s8735_s1 + $0x868] ss:$16 sps:$4 sm:$0xff]  }
  0xf1   : > { %2060 = vmatpush2.bf16.msra.mxu0 %v6249_v0  ;;  %2101 = vmatpush2.bf16.msra.mxu1 %v6252_v1  ;;  %v6325_v0 = vld [vmem:[%s8735_s1 + $0x844] ss:$16 sps:$4 sm:$0xff]   ;;  %v6328_v1 = vld [vmem:[%s8735_s1 + $0x84c] ss:$16 sps:$4 sm:$0xff]  }
  0xf2   : > { %2061 = vmatprep.subr.bf16.mxu0 %v6257_v2  ;;  %2102 = vmatprep.subr.bf16.mxu1 %v6260_v3  ;;  %v6323_v2 = vld [vmem:[%s8735_s1 + $0x840] ss:$16 sps:$4 sm:$0xff]   ;;  %v6326_v3 = vld [vmem:[%s8735_s1 + $0x848] ss:$16 sps:$4 sm:$0xff]  }
  0xf5   : > { %2062 = vmatpush2.bf16.msra.mxu0 %v6255_v4  ;;  %2103 = vmatpush2.bf16.msra.mxu1 %v6258_v5  ;;  %v6331_v4 = vld [vmem:[%s8735_s1 + $0x824] ss:$16 sps:$4 sm:$0xff]   ;;  %v6334_v5 = vld [vmem:[%s8735_s1 + $0x82c] ss:$16 sps:$4 sm:$0xff]  }
  0xf6   : > { %2063 = vmatprep.subr.bf16.mxu0 %v6263_v6  ;;  %2104 = vmatprep.subr.bf16.mxu1 %v6266_v7  ;;  %v6329_v6 = vld [vmem:[%s8735_s1 + $0x820] ss:$16 sps:$4 sm:$0xff]   ;;  %v6332_v7 = vld [vmem:[%s8735_s1 + $0x828] ss:$16 sps:$4 sm:$0xff]  }
  0xf9   : > { %2064 = vmatpush2.bf16.msra.mxu0 %v6261_v8  ;;  %2105 = vmatpush2.bf16.msra.mxu1 %v6264_v9  ;;  %v6337_v8 = vld [vmem:[%s8735_s1 + $0x804] ss:$16 sps:$4 sm:$0xff]   ;;  %v6340_v9 = vld [vmem:[%s8735_s1 + $0x80c] ss:$16 sps:$4 sm:$0xff]  }
  0xfa   : > { %2065 = vmatprep.subr.bf16.mxu0 %v6269_v10  ;;  %2106 = vmatprep.subr.bf16.mxu1 %v6272_v11  ;;  %v6335_v10 = vld [vmem:[%s8735_s1 + $0x800] ss:$16 sps:$4 sm:$0xff]   ;;  %v6338_v11 = vld [vmem:[%s8735_s1 + $0x808] ss:$16 sps:$4 sm:$0xff]  }
  0xfd   : > { %2066 = vmatpush2.bf16.msra.mxu0 %v6267_v12  ;;  %2107 = vmatpush2.bf16.msra.mxu1 %v6270_v13  ;;  %v6343_v12 = vld [vmem:[%s8735_s1 + $0x9e4] ss:$16 sps:$4 sm:$0xff]   ;;  %v6346_v13 = vld [vmem:[%s8735_s1 + $0x9ec] ss:$16 sps:$4 sm:$0xff]  }
  0xfe   : > { %2067 = vmatprep.subr.bf16.mxu0 %v6275_v14  ;;  %2108 = vmatprep.subr.bf16.mxu1 %v6278_v15  ;;  %v6341_v14 = vld [vmem:[%s8735_s1 + $0x9e0] ss:$16 sps:$4 sm:$0xff]   ;;  %v6344_v15 = vld [vmem:[%s8735_s1 + $0x9e8] ss:$16 sps:$4 sm:$0xff]  }
 0x101   : > { %2068 = vmatpush2.bf16.msra.mxu0 %v6273_v16  ;;  %2109 = vmatpush2.bf16.msra.mxu1 %v6276_v19  ;;  %v6349_v16 = vld [vmem:[%s8735_s1 + $0x9c4] ss:$16 sps:$4 sm:$0xff]   ;;  %v6352_v19 = vld [vmem:[%s8735_s1 + $0x9cc] ss:$16 sps:$4 sm:$0xff]  }
 0x102   : > { %2069 = vmatprep.subr.bf16.mxu0 %v6281_v21  ;;  %2110 = vmatprep.subr.bf16.mxu1 %v6284_v22  ;;  %v6347_v21 = vld [vmem:[%s8735_s1 + $0x9c0] ss:$16 sps:$4 sm:$0xff]   ;;  %v6350_v22 = vld [vmem:[%s8735_s1 + $0x9c8] ss:$16 sps:$4 sm:$0xff]  }
 0x105   : > { %2070 = vmatpush2.bf16.msra.mxu0 %v6279_v46  ;;  %2111 = vmatpush2.bf16.msra.mxu1 %v6282_v24  ;;  %v6358_v46 = vld [vmem:[%s8735_s1 + $0x9ac] ss:$16 sps:$4 sm:$0xff]   ;;  %v6353_v24 = vld [vmem:[%s8735_s1 + $0x9a0] ss:$16 sps:$4 sm:$0xff]  }
 0x106   : > { %2071 = vmatprep.subr.bf16.mxu0 %v6287_v25  ;;  %2112 = vmatprep.subr.bf16.mxu1 %v6290_v26  ;;  %v6356_v25 = vld [vmem:[%s8735_s1 + $0x9a8] ss:$16 sps:$4 sm:$0xff]   ;;  %v6361_v26 = vld [vmem:[%s8735_s1 + $0x984] ss:$16 sps:$4 sm:$0xff]  }
 0x109   : > { %2072 = vmatpush2.bf16.msra.mxu0 %v6285_v28  ;;  %2113 = vmatpush2.bf16.msra.mxu1 %v6288_v30  ;;  %v6362_v28 = vld [vmem:[%s8735_s1 + $0x988] ss:$16 sps:$4 sm:$0xff]   ;;  %v6370_v30 = vld [vmem:[%s8735_s1 + $0x96c] ss:$16 sps:$4 sm:$0xff]  }
 0x10a   : > { %2536 = vmatprep.subr.bf16.mxu0 %v6295_v31  ;;  %2577 = vmatprep.subr.bf16.mxu1 %v6298_v32  ;;  %v6365_v31 = vld [vmem:[%s8735_s1 + $0x960] ss:$16 sps:$4 sm:$0xff]   ;;  %v6368_v32 = vld [vmem:[%s8735_s1 + $0x968] ss:$16 sps:$4 sm:$0xff]  }
 0x10c   : > { %v7669_v40 = vpop.f32.mrf.mxu0  ;;  %v7671_v41 = vpop.f32.mrf.mxu1  ;;  %2074 = vmatmul.mubr.bf16.vlgmr.msra.gmra.mxu0 %v1717_v35  ;;  %2115 = vmatmul.mubr.bf16.vlgmr.msra.gmra.mxu1 %v1717_v35  ;;  %v5297_v35 = vcombine.low %v7437_v17, %v7618_v18  ;;  %v6382_v17 = vld [vmem:[%s8735_s1 + $0x92c] ss:$16 sps:$4 sm:$0xff]  }
 0x10d   : > { %2537 = vmatpush1.bf16.msra.mxu0 %v6293_v20  ;;  %2578 = vmatpush1.bf16.msra.mxu1 %v6296_v36  ;;  %v6371_v20 = vld [vmem:[%s8735_s1 + $0x940] ss:$16 sps:$4 sm:$0xff]   ;;  %v6374_v36 = vld [vmem:[%s8735_s1 + $0x948] ss:$16 sps:$4 sm:$0xff]  }
 0x10e   : > { %v7682_v45 = vpop.f32.mrf.mxu0  ;;  %v7684_v48 = vpop.f32.mrf.mxu1  ;;  %2538 = vmatprep.subr.bf16.mxu0 %v6301_v37  ;;  %2579 = vmatprep.subr.bf16.mxu1 %v6304_v38  ;;  %v6379_v37 = vld [vmem:[%s8735_s1 + $0x924] ss:$16 sps:$4 sm:$0xff]   ;;  %v6377_v38 = vld [vmem:[%s8735_s1 + $0x920] ss:$16 sps:$4 sm:$0xff]  }
 0x10f   : > { %2568 = vmatprep.mubr.bf16.mxu0 %v2213_v39  ;;  %2609 = vmatprep.mubr.bf16.mxu1 %v2213_v39  ;;  %v2199_v39 = vshrl.u32 %v5297_v35, 16 }
 0x110   : > { %v711_v50 = vpop.f32.mrf.mxu0  ;;  %v752_v51 = vpop.f32.mrf.mxu1 }
 0x111   : > { %2539 = vmatpush1.bf16.msra.mxu0 %v6299_v42  ;;  %2580 = vmatpush1.bf16.msra.mxu1 %v6302_v43  ;;  %v2202_v42 = vshll.u32 %v5297_v35, 16  ;;  %v6380_v43 = vld [vmem:[%s8735_s1 + $0x928] ss:$16 sps:$4 sm:$0xff]   ;;  %v7848_v50 = vld [vmem:[%s6977_s10] sm:$0x88]  ;;  %v2201_v51 = vrot.slane %v2199_v39, 2 }
 0x112   : > { %v712_v54 = vpop.f32.mrf.mxu0  ;;  %v753_v55 = vpop.f32.mrf.mxu1  ;;  %2540 = vmatprep.subr.bf16.mxu0 %v6307_v44  ;;  %2581 = vmatprep.subr.bf16.mxu1 %v6310_v49  ;;  %v6385_v44 = vld [vmem:[%s8735_s1 + $0x904] ss:$16 sps:$4 sm:$0xff]   ;;  %v6388_v49 = vld [vmem:[%s8735_s1 + $0x90c] ss:$16 sps:$4 sm:$0xff]   ;;  %v6448_v39 = vld [vmem:[%s8735_s1 + $0xbc8] ss:$16 sps:$4 sm:$0xff]  }
 0x113   : > { %v6386_v54 = vld [vmem:[%s8735_s1 + $0x908] ss:$16 sps:$4 sm:$0xff]   ;;  %v6393_v55 = vld [vmem:[%s8735_s1 + $0xae4] ss:$16 sps:$4 sm:$0xff]   ;;  %v6444_v35 = vld [vmem:[%s8735_s1 + $0xbec] ss:$16 sps:$4 sm:$0xff]  }
 0x115   : > { %2541 = vmatpush1.bf16.msra.mxu0 %v6305_v52  ;;  %2582 = vmatpush1.bf16.msra.mxu1 %v6308_v53  ;;  %v2204_v52 = vrot.slane %v2202_v42, 3  ;;  %v6383_v53 = vld [vmem:[%s8735_s1 + $0x900] ss:$16 sps:$4 sm:$0xff]   ;;  %v6453_v42 = vld [vmem:[%s8735_s1 + $0xba4] ss:$16 sps:$4 sm:$0xff]  }
 0x116   : > { %2542 = vmatprep.subr.bf16.mxu0 %v6313_v56  ;;  %2583 = vmatprep.subr.bf16.mxu1 %v6316_v57  ;;  %v6396_v56 = vld [vmem:[%s8735_s1 + $0xaec] ss:$16 sps:$4 sm:$0xff]   ;;  %v6391_v57 = vld [vmem:[%s8735_s1 + $0xae0] ss:$16 sps:$4 sm:$0xff]  }
 0x119   : > { %2543 = vmatpush1.bf16.msra.mxu0 %v6311_v58  ;;  %2584 = vmatpush1.bf16.msra.mxu1 %v6314_v59  ;;  %v5428_v58 = vcombine.high %v7848_v50, %v7618_v18  ;;  %v2205_v59 = vor.u32 %v2204_v52, %v2201_v51  ;;  %v6397_v18 = vld [vmem:[%s8735_s1 + $0xac0] ss:$16 sps:$4 sm:$0xff]   ;;  %v6459_v51 = vld [vmem:[%s8735_s1 + $0xb84] ss:$16 sps:$4 sm:$0xff]   ;;  %v6462_v52 = vld [vmem:[%s8735_s1 + $0xb8c] ss:$16 sps:$4 sm:$0xff]  }
 0x11a   : > { %2544 = vmatprep.subr.bf16.mxu0 %v6319_v60  ;;  %2585 = vmatprep.subr.bf16.mxu1 %v6322_v61  ;;  %v6394_v60 = vld [vmem:[%s8735_s1 + $0xae8] ss:$16 sps:$4 sm:$0xff]   ;;  %v6399_v61 = vld [vmem:[%s8735_s1 + $0xac4] ss:$16 sps:$4 sm:$0xff]  }
 0x11d   : > { %2545 = vmatpush1.bf16.msra.mxu0 %v6317_v62  ;;  %2586 = vmatpush1.bf16.msra.mxu1 %v6320_v63  ;;  %v6402_v62 = vld [vmem:[%s8735_s1 + $0xacc] ss:$16 sps:$4 sm:$0xff]   ;;  %v6400_v63 = vld [vmem:[%s8735_s1 + $0xac8] ss:$16 sps:$4 sm:$0xff]  }
 0x11e   : > { %2546 = vmatprep.subr.bf16.mxu0 %v6325_v0  ;;  %2587 = vmatprep.subr.bf16.mxu1 %v6328_v1  ;;  %v2694_v0 = vrot.slane %v5428_v58, 3  ;;  %v6466_v58 = vld [vmem:[%s8735_s1 + $0xb68] ss:$16 sps:$4 sm:$0xff]  }
 0x121   : > { %2547 = vmatpush1.bf16.msra.mxu0 %v6323_v2  ;;  %2588 = vmatpush1.bf16.msra.mxu1 %v6326_v3 }
 0x122   : > { %2548 = vmatprep.subr.bf16.mxu0 %v6331_v4  ;;  %2589 = vmatprep.subr.bf16.mxu1 %v6334_v5 }
 0x125   : > { %2549 = vmatpush1.bf16.msra.mxu0 %v6329_v6  ;;  %2590 = vmatpush1.bf16.msra.mxu1 %v6332_v7  ;;  %v6405_v7 = vld [vmem:[%s8735_s1 + $0xaa4] ss:$16 sps:$4 sm:$0xff]  }
 0x126   : > { %2550 = vmatprep.subr.bf16.mxu0 %v6337_v8  ;;  %2591 = vmatprep.subr.bf16.mxu1 %v6340_v9  ;;  %v6408_v8 = vld [vmem:[%s8735_s1 + $0xaac] ss:$16 sps:$4 sm:$0xff]   ;;  %v6403_v9 = vld [vmem:[%s8735_s1 + $0xaa0] ss:$16 sps:$4 sm:$0xff]  }
 0x129   : > { %2551 = vmatpush1.bf16.msra.mxu0 %v6335_v10  ;;  %2592 = vmatpush1.bf16.msra.mxu1 %v6338_v11  ;;  %v6406_v10 = vld [vmem:[%s8735_s1 + $0xaa8] ss:$16 sps:$4 sm:$0xff]  }
 0x12a   : > { %2552 = vmatprep.subr.bf16.mxu0 %v6343_v12  ;;  %2593 = vmatprep.subr.bf16.mxu1 %v6346_v13 }
 0x12d   : > { %2553 = vmatpush2.bf16.msra.mxu0 %v6341_v14  ;;  %2594 = vmatpush2.bf16.msra.mxu1 %v6344_v15  ;;  %v6414_v14 = vld [vmem:[%s8735_s1 + $0xa8c] ss:$16 sps:$4 sm:$0xff]   ;;  %v6409_v15 = vld [vmem:[%s8735_s1 + $0xa80] ss:$16 sps:$4 sm:$0xff]  }
 0x12e   : > { %2554 = vmatprep.subr.bf16.mxu0 %v6349_v16  ;;  %2595 = vmatprep.subr.bf16.mxu1 %v6352_v19  ;;  %v6412_v16 = vld [vmem:[%s8735_s1 + $0xa88] ss:$16 sps:$4 sm:$0xff]   ;;  %v6417_v19 = vld [vmem:[%s8735_s1 + $0xa64] ss:$16 sps:$4 sm:$0xff]  }
 0x131   : > { %2555 = vmatpush2.bf16.msra.mxu0 %v6347_v21  ;;  %2596 = vmatpush2.bf16.msra.mxu1 %v6350_v22  ;;  %v6420_v21 = vld [vmem:[%s8735_s1 + $0xa6c] ss:$16 sps:$4 sm:$0xff]   ;;  %v6415_v22 = vld [vmem:[%s8735_s1 + $0xa60] ss:$16 sps:$4 sm:$0xff]  }
 0x132   : > { %2556 = vmatprep.subr.bf16.mxu0 %v6355_v23  ;;  %2597 = vmatprep.subr.bf16.mxu1 %v6358_v46  ;;  %v6418_v23 = vld [vmem:[%s8735_s1 + $0xa68] ss:$16 sps:$4 sm:$0xff]   ;;  %v6423_v46 = vld [vmem:[%s8735_s1 + $0xa44] ss:$16 sps:$4 sm:$0xff]  }
 0x135   : > { %2557 = vmatpush2.bf16.msra.mxu0 %v6353_v24  ;;  %2598 = vmatpush2.bf16.msra.mxu1 %v6356_v25  ;;  %v6426_v24 = vld [vmem:[%s8735_s1 + $0xa4c] ss:$16 sps:$4 sm:$0xff]   ;;  %v6421_v25 = vld [vmem:[%s8735_s1 + $0xa40] ss:$16 sps:$4 sm:$0xff]  }
 0x136   : > { %2558 = vmatprep.subr.bf16.mxu0 %v6361_v26  ;;  %2599 = vmatprep.subr.bf16.mxu1 %v6364_v47  ;;  %v6424_v26 = vld [vmem:[%s8735_s1 + $0xa48] ss:$16 sps:$4 sm:$0xff]   ;;  %v6429_v47 = vld [vmem:[%s8735_s1 + $0xa24] ss:$16 sps:$4 sm:$0xff]  }
 0x139   : > { %2559 = vmatpush2.bf16.msra.mxu0 %v6359_v27  ;;  %2600 = vmatpush2.bf16.msra.mxu1 %v6362_v28  ;;  %v6432_v27 = vld [vmem:[%s8735_s1 + $0xa2c] ss:$16 sps:$4 sm:$0xff]   ;;  %v6427_v28 = vld [vmem:[%s8735_s1 + $0xa20] ss:$16 sps:$4 sm:$0xff]  }
 0x13a   : > { %2560 = vmatprep.subr.bf16.mxu0 %v6367_v29  ;;  %2601 = vmatprep.subr.bf16.mxu1 %v6370_v30  ;;  %v6430_v29 = vld [vmem:[%s8735_s1 + $0xa28] ss:$16 sps:$4 sm:$0xff]   ;;  %v6435_v30 = vld [vmem:[%s8735_s1 + $0xa04] ss:$16 sps:$4 sm:$0xff]  }
 0x13d   : > { %2561 = vmatpush2.bf16.msra.mxu0 %v6365_v31  ;;  %2602 = vmatpush2.bf16.msra.mxu1 %v6368_v32  ;;  %v6438_v31 = vld [vmem:[%s8735_s1 + $0xa0c] ss:$16 sps:$4 sm:$0xff]   ;;  %v6433_v32 = vld [vmem:[%s8735_s1 + $0xa00] ss:$16 sps:$4 sm:$0xff]  }
 0x13e   : > { %2562 = vmatprep.subr.bf16.mxu0 %v6373_v33  ;;  %2603 = vmatprep.subr.bf16.mxu1 %v6376_v34  ;;  %v6436_v33 = vld [vmem:[%s8735_s1 + $0xa08] ss:$16 sps:$4 sm:$0xff]   ;;  %v6441_v34 = vld [vmem:[%s8735_s1 + $0xbe4] ss:$16 sps:$4 sm:$0xff]  }
 0x141   : > { %2563 = vmatpush2.bf16.msra.mxu0 %v6371_v20  ;;  %2604 = vmatpush2.bf16.msra.mxu1 %v6374_v36  ;;  %v6439_v20 = vld [vmem:[%s8735_s1 + $0xbe0] ss:$16 sps:$4 sm:$0xff]   ;;  %v6442_v36 = vld [vmem:[%s8735_s1 + $0xbe8] ss:$16 sps:$4 sm:$0xff]  }
 0x142   : > { %2564 = vmatprep.subr.bf16.mxu0 %v6379_v37  ;;  %2605 = vmatprep.subr.bf16.mxu1 %v6382_v17  ;;  %v6447_v37 = vld [vmem:[%s8735_s1 + $0xbc4] ss:$16 sps:$4 sm:$0xff]   ;;  %v6450_v17 = vld [vmem:[%s8735_s1 + $0xbcc] ss:$16 sps:$4 sm:$0xff]  }
 0x145   : > { %2565 = vmatpush2.bf16.msra.mxu0 %v6377_v38  ;;  %2606 = vmatpush2.bf16.msra.mxu1 %v6380_v43  ;;  %v6445_v38 = vld [vmem:[%s8735_s1 + $0xbc0] ss:$16 sps:$4 sm:$0xff]   ;;  %v6456_v43 = vld [vmem:[%s8735_s1 + $0xbac] ss:$16 sps:$4 sm:$0xff]  }
 0x146   : > { %2566 = vmatprep.subr.bf16.mxu0 %v6385_v44  ;;  %2607 = vmatprep.subr.bf16.mxu1 %v6388_v49  ;;  %v6451_v44 = vld [vmem:[%s8735_s1 + $0xba0] ss:$16 sps:$4 sm:$0xff]   ;;  %v6454_v49 = vld [vmem:[%s8735_s1 + $0xba8] ss:$16 sps:$4 sm:$0xff]  }
 0x149   : > { %2567 = vmatpush2.bf16.msra.mxu0 %v6383_v53  ;;  %2608 = vmatpush2.bf16.msra.mxu1 %v6386_v54  ;;  %v6457_v53 = vld [vmem:[%s8735_s1 + $0xb80] ss:$16 sps:$4 sm:$0xff]   ;;  %v6460_v54 = vld [vmem:[%s8735_s1 + $0xb88] ss:$16 sps:$4 sm:$0xff]  }
 0x14a   : > { %3017 = vmatprep.subr.bf16.mxu0 %v6393_v55  ;;  %3058 = vmatprep.subr.bf16.mxu1 %v6396_v56  ;;  %v6465_v55 = vld [vmem:[%s8735_s1 + $0xb64] ss:$16 sps:$4 sm:$0xff]   ;;  %v6468_v56 = vld [vmem:[%s8735_s1 + $0xb6c] ss:$16 sps:$4 sm:$0xff]  }
 0x14c   : > { %v1113_v1 = vpop.f32.mrf.mxu0  ;;  %v1154_v2 = vpop.f32.mrf.mxu1  ;;  %2569 = vmatmul.mubr.bf16.vlgmr.msra.gmra.mxu0 %v2205_v59  ;;  %2610 = vmatmul.mubr.bf16.vlgmr.msra.gmra.mxu1 %v2205_v59  ;;  %v6471_v59 = vld [vmem:[%s8735_s1 + $0xb44] ss:$16 sps:$4 sm:$0xff]  }
 0x14d   : > { %v7883_v3 = vadd.f32 %v1113_v1, %v7669_v40  ;;  %v7886_v4 = vadd.f32 %v1154_v2, %v7671_v41  ;;  %3018 = vmatpush1.bf16.msra.mxu0 %v6391_v57  ;;  %3059 = vmatpush1.bf16.msra.mxu1 %v6394_v60  ;;  %v6463_v57 = vld [vmem:[%s8735_s1 + $0xb60] ss:$16 sps:$4 sm:$0xff]   ;;  %v6474_v60 = vld [vmem:[%s8735_s1 + $0xb4c] ss:$16 sps:$4 sm:$0xff]   ;;  %v6478_v1 = vld [vmem:[%s8735_s1 + $0xb28] ss:$16 sps:$4 sm:$0xff]  }
 0x14e   : > { %v1115_v5 = vpop.f32.mrf.mxu0  ;;  %v1156_v6 = vpop.f32.mrf.mxu1  ;;  %3019 = vmatprep.subr.bf16.mxu0 %v6399_v61  ;;  %3060 = vmatprep.subr.bf16.mxu1 %v6402_v62  ;;  %v6469_v61 = vld [vmem:[%s8735_s1 + $0xb40] ss:$16 sps:$4 sm:$0xff]   ;;  %v6472_v62 = vld [vmem:[%s8735_s1 + $0xb48] ss:$16 sps:$4 sm:$0xff]   ;;  %v6483_v2 = vld [vmem:[%s8735_s1 + $0xb04] ss:$16 sps:$4 sm:$0xff]  }
 0x14f   : > { %v7895_v40 = vadd.f32 %v1115_v5, %v7682_v45  ;;  %v7898_v41 = vadd.f32 %v1156_v6, %v7684_v48  ;;  %3049 = vmatprep.mubr.bf16.mxu0 %v2694_v0  ;;  %3090 = vmatprep.mubr.bf16.mxu1 %v2694_v0  ;;  %v6411_v48 = vld [vmem:[%s8735_s1 + $0xa84] ss:$16 sps:$4 sm:$0xff]   ;;  %v6475_v0 = vld [vmem:[%s8735_s1 + $0xb20] ss:$16 sps:$4 sm:$0xff]   ;;  %v6486_v5 = vld [vmem:[%s8735_s1 + $0xb0c] ss:$16 sps:$4 sm:$0xff]  }
 0x150   : > { %v1117_v11 = vpop.f32.mrf.mxu0  ;;  %v1158_v12 = vpop.f32.mrf.mxu1  ;;  %v6792_v6 = vld [vmem:[%s6977_s10 + $0x8] sm:$0x77] }
 0x151   : > { %3020 = vmatpush1.bf16.msra.mxu0 %v6397_v18  ;;  %3061 = vmatpush1.bf16.msra.mxu1 %v6400_v63  ;;  %v6477_v18 = vld [vmem:[%s8735_s1 + $0xb24] ss:$16 sps:$4 sm:$0xff]   ;;  %v6480_v63 = vld [vmem:[%s8735_s1 + $0xb2c] ss:$16 sps:$4 sm:$0xff]  }
 0x152   : > { %v1118_v13 = vpop.f32.mrf.mxu0  ;;  %v1159_v45 = vpop.f32.mrf.mxu1  ;;  %3021 = vmatprep.subr.bf16.mxu0 %v6405_v7  ;;  %3062 = vmatprep.subr.bf16.mxu1 %v6408_v8  ;;  %v5427_v7 = vcombine.low %v7848_v50, %v6792_v6  ;;  %v6481_v8 = vld [vmem:[%s8735_s1 + $0xb00] ss:$16 sps:$4 sm:$0xff]   ;;  %v6494_v50 = vld [vmem:[%s8735_s1 + $0xcec] ss:$16 sps:$4 sm:$0xff]  }
 0x153   : > { %v8071_v12 = vld [vmem:[%s6977_s10 + $0x8] sm:$0xff]  ;;  %v6489_v13 = vld [vmem:[%s8735_s1 + $0xce0] ss:$16 sps:$4 sm:$0xff]  }
 0x154   : > { %v2693_v11 = vrot.slane %v5427_v7, 3  ;;  %v6492_v45 = vld [vmem:[%s8735_s1 + $0xce8] ss:$16 sps:$4 sm:$0xff]   ;;  %v6560_v6 = vld [vmem:[%s8735_s1 + $0xd8c] ss:$16 sps:$4 sm:$0xff]  }
 0x155   : > { %3022 = vmatpush1.bf16.msra.mxu0 %v6403_v9  ;;  %3063 = vmatpush1.bf16.msra.mxu1 %v6406_v10  ;;  %v6484_v9 = vld [vmem:[%s8735_s1 + $0xb08] ss:$16 sps:$4 sm:$0xff]   ;;  %v6491_v10 = vld [vmem:[%s8735_s1 + $0xce4] ss:$16 sps:$4 sm:$0xff]   ;;  %v6555_v7 = vld [vmem:[%s8735_s1 + $0xd80] ss:$16 sps:$4 sm:$0xff]  }
 0x156   : > { %3023 = vmatprep.subr.bf16.mxu0 %v6411_v48  ;;  %3064 = vmatprep.subr.bf16.mxu1 %v6414_v14  ;;  %v6497_v48 = vld [vmem:[%s8735_s1 + $0xcc4] ss:$16 sps:$4 sm:$0xff]   ;;  %v6500_v14 = vld [vmem:[%s8735_s1 + $0xccc] ss:$16 sps:$4 sm:$0xff]  }
 0x159   : > { %3024 = vmatpush1.bf16.msra.mxu0 %v6409_v15  ;;  %3065 = vmatpush1.bf16.msra.mxu1 %v6412_v16  ;;  %v5558_v15 = vcombine.high %v8071_v12, %v8071_v12 }
 0x15a   : > { %3025 = vmatprep.subr.bf16.mxu0 %v6417_v19  ;;  %3066 = vmatprep.subr.bf16.mxu1 %v6420_v21 }
 0x15d   : > { %3026 = vmatpush1.bf16.msra.mxu0 %v6415_v22  ;;  %3067 = vmatpush1.bf16.msra.mxu1 %v6418_v23  ;;  %v6495_v23 = vld [vmem:[%s8735_s1 + $0xcc0] ss:$16 sps:$4 sm:$0xff]  }
 0x15e   : > { %3027 = vmatprep.subr.bf16.mxu0 %v6423_v46  ;;  %3068 = vmatprep.subr.bf16.mxu1 %v6426_v24  ;;  %v6498_v46 = vld [vmem:[%s8735_s1 + $0xcc8] ss:$16 sps:$4 sm:$0xff]  }
 0x161   : > { %3028 = vmatpush1.bf16.msra.mxu0 %v6421_v25  ;;  %3069 = vmatpush1.bf16.msra.mxu1 %v6424_v26 }
 0x162   : > { %3029 = vmatprep.subr.bf16.mxu0 %v6429_v47  ;;  %3070 = vmatprep.subr.bf16.mxu1 %v6432_v27 }
 0x165   : > { %3030 = vmatpush1.bf16.msra.mxu0 %v6427_v28  ;;  %3071 = vmatpush1.bf16.msra.mxu1 %v6430_v29  ;;  %v6501_v29 = vld [vmem:[%s8735_s1 + $0xca0] ss:$16 sps:$4 sm:$0xff]  }
 0x166   : > { %3031 = vmatprep.subr.bf16.mxu0 %v6435_v30  ;;  %3072 = vmatprep.subr.bf16.mxu1 %v6438_v31  ;;  %v6504_v30 = vld [vmem:[%s8735_s1 + $0xca8] ss:$16 sps:$4 sm:$0xff]  }
 0x169   : > { %3032 = vmatpush1.bf16.msra.mxu0 %v6433_v32  ;;  %3073 = vmatpush1.bf16.msra.mxu1 %v6436_v33  ;;  %v6512_v32 = vld [vmem:[%s8735_s1 + $0xc8c] ss:$16 sps:$4 sm:$0xff]   ;;  %v6507_v33 = vld [vmem:[%s8735_s1 + $0xc80] ss:$16 sps:$4 sm:$0xff]  }
 0x16a   : > { %3033 = vmatprep.subr.bf16.mxu0 %v6441_v34  ;;  %3074 = vmatprep.subr.bf16.mxu1 %v6444_v35  ;;  %v6510_v34 = vld [vmem:[%s8735_s1 + $0xc88] ss:$16 sps:$4 sm:$0xff]   ;;  %v6515_v35 = vld [vmem:[%s8735_s1 + $0xc64] ss:$16 sps:$4 sm:$0xff]  }
 0x16d   : > { %3034 = vmatpush2.bf16.msra.mxu0 %v6439_v20  ;;  %3075 = vmatpush2.bf16.msra.mxu1 %v6442_v36  ;;  %v6518_v20 = vld [vmem:[%s8735_s1 + $0xc6c] ss:$16 sps:$4 sm:$0xff]   ;;  %v6513_v36 = vld [vmem:[%s8735_s1 + $0xc60] ss:$16 sps:$4 sm:$0xff]  }
 0x16e   : > { %3035 = vmatprep.subr.bf16.mxu0 %v6447_v37  ;;  %3076 = vmatprep.subr.bf16.mxu1 %v6450_v17  ;;  %v6516_v37 = vld [vmem:[%s8735_s1 + $0xc68] ss:$16 sps:$4 sm:$0xff]   ;;  %v6521_v17 = vld [vmem:[%s8735_s1 + $0xc44] ss:$16 sps:$4 sm:$0xff]  }
 0x171   : > { %3036 = vmatpush2.bf16.msra.mxu0 %v6445_v38  ;;  %3077 = vmatpush2.bf16.msra.mxu1 %v6448_v39  ;;  %v6524_v38 = vld [vmem:[%s8735_s1 + $0xc4c] ss:$16 sps:$4 sm:$0xff]   ;;  %v6519_v39 = vld [vmem:[%s8735_s1 + $0xc40] ss:$16 sps:$4 sm:$0xff]  }
 0x172   : > { %3037 = vmatprep.subr.bf16.mxu0 %v6453_v42  ;;  %3078 = vmatprep.subr.bf16.mxu1 %v6456_v43  ;;  %v6522_v42 = vld [vmem:[%s8735_s1 + $0xc48] ss:$16 sps:$4 sm:$0xff]   ;;  %v6527_v43 = vld [vmem:[%s8735_s1 + $0xc24] ss:$16 sps:$4 sm:$0xff]  }
 0x175   : > { %3038 = vmatpush2.bf16.msra.mxu0 %v6451_v44  ;;  %3079 = vmatpush2.bf16.msra.mxu1 %v6454_v49  ;;  %v6530_v44 = vld [vmem:[%s8735_s1 + $0xc2c] ss:$16 sps:$4 sm:$0xff]   ;;  %v6525_v49 = vld [vmem:[%s8735_s1 + $0xc20] ss:$16 sps:$4 sm:$0xff]  }
 0x176   : > { %3039 = vmatprep.subr.bf16.mxu0 %v6459_v51  ;;  %3080 = vmatprep.subr.bf16.mxu1 %v6462_v52  ;;  %v6528_v51 = vld [vmem:[%s8735_s1 + $0xc28] ss:$16 sps:$4 sm:$0xff]   ;;  %v6533_v52 = vld [vmem:[%s8735_s1 + $0xc04] ss:$16 sps:$4 sm:$0xff]  }
 0x179   : > { %3040 = vmatpush2.bf16.msra.mxu0 %v6457_v53  ;;  %3081 = vmatpush2.bf16.msra.mxu1 %v6460_v54  ;;  %v6536_v53 = vld [vmem:[%s8735_s1 + $0xc0c] ss:$16 sps:$4 sm:$0xff]   ;;  %v6531_v54 = vld [vmem:[%s8735_s1 + $0xc00] ss:$16 sps:$4 sm:$0xff]  }
 0x17a   : > { %3041 = vmatprep.subr.bf16.mxu0 %v6465_v55  ;;  %3082 = vmatprep.subr.bf16.mxu1 %v6468_v56  ;;  %v6534_v55 = vld [vmem:[%s8735_s1 + $0xc08] ss:$16 sps:$4 sm:$0xff]   ;;  %v6539_v56 = vld [vmem:[%s8735_s1 + $0xde4] ss:$16 sps:$4 sm:$0xff]  }
 0x17d   : > { %3042 = vmatpush2.bf16.msra.mxu0 %v6463_v57  ;;  %3083 = vmatpush2.bf16.msra.mxu1 %v6466_v58  ;;  %v6542_v57 = vld [vmem:[%s8735_s1 + $0xdec] ss:$16 sps:$4 sm:$0xff]   ;;  %v6537_v58 = vld [vmem:[%s8735_s1 + $0xde0] ss:$16 sps:$4 sm:$0xff]  }
 0x17e   : > { %3043 = vmatprep.subr.bf16.mxu0 %v6471_v59  ;;  %3084 = vmatprep.subr.bf16.mxu1 %v6474_v60  ;;  %v6540_v59 = vld [vmem:[%s8735_s1 + $0xde8] ss:$16 sps:$4 sm:$0xff]   ;;  %v6545_v60 = vld [vmem:[%s8735_s1 + $0xdc4] ss:$16 sps:$4 sm:$0xff]  }
 0x181   : > { %3044 = vmatpush2.bf16.msra.mxu0 %v6469_v61  ;;  %3085 = vmatpush2.bf16.msra.mxu1 %v6472_v62  ;;  %v6548_v61 = vld [vmem:[%s8735_s1 + $0xdcc] ss:$16 sps:$4 sm:$0xff]   ;;  %v6543_v62 = vld [vmem:[%s8735_s1 + $0xdc0] ss:$16 sps:$4 sm:$0xff]  }
 0x182   : > { %3045 = vmatprep.subr.bf16.mxu0 %v6477_v18  ;;  %3086 = vmatprep.subr.bf16.mxu1 %v6480_v63  ;;  %v6546_v18 = vld [vmem:[%s8735_s1 + $0xdc8] ss:$16 sps:$4 sm:$0xff]   ;;  %v6551_v63 = vld [vmem:[%s8735_s1 + $0xda4] ss:$16 sps:$4 sm:$0xff]  }
 0x185   : > { %3046 = vmatpush2.bf16.msra.mxu0 %v6475_v0  ;;  %3087 = vmatpush2.bf16.msra.mxu1 %v6478_v1  ;;  %v6554_v0 = vld [vmem:[%s8735_s1 + $0xdac] ss:$16 sps:$4 sm:$0xff]   ;;  %v6549_v1 = vld [vmem:[%s8735_s1 + $0xda0] ss:$16 sps:$4 sm:$0xff]  }
 0x186   : > { %3047 = vmatprep.subr.bf16.mxu0 %v6483_v2  ;;  %3088 = vmatprep.subr.bf16.mxu1 %v6486_v5  ;;  %v6552_v2 = vld [vmem:[%s8735_s1 + $0xda8] ss:$16 sps:$4 sm:$0xff]   ;;  %v6557_v5 = vld [vmem:[%s8735_s1 + $0xd84] ss:$16 sps:$4 sm:$0xff]  }
 0x189   : > { %3048 = vmatpush2.bf16.msra.mxu0 %v6481_v8  ;;  %3089 = vmatpush2.bf16.msra.mxu1 %v6484_v9  ;;  %v6558_v8 = vld [vmem:[%s8735_s1 + $0xd88] ss:$16 sps:$4 sm:$0xff]   ;;  %v6563_v9 = vld [vmem:[%s8735_s1 + $0xd64] ss:$16 sps:$4 sm:$0xff]  }
 0x18a   : > { %3496 = vmatprep.subr.bf16.mxu0 %v6491_v10  ;;  %3537 = vmatprep.subr.bf16.mxu1 %v6494_v50  ;;  %v6566_v10 = vld [vmem:[%s8735_s1 + $0xd6c] ss:$16 sps:$4 sm:$0xff]   ;;  %v6561_v50 = vld [vmem:[%s8735_s1 + $0xd60] ss:$16 sps:$4 sm:$0xff]  }
 0x18c   : > { %v1590_v16 = vpop.f32.mrf.mxu0  ;;  %v1631_v19 = vpop.f32.mrf.mxu1  ;;  %3050 = vmatmul.mubr.bf16.vlgmr.msra.gmra.mxu0 %v2693_v11  ;;  %3091 = vmatmul.mubr.bf16.vlgmr.msra.gmra.mxu1 %v2693_v11  ;;  %v6564_v11 = vld [vmem:[%s8735_s1 + $0xd68] ss:$16 sps:$4 sm:$0xff]  }
 0x18d   : > { %v8088_v21 = vadd.f32 %v1590_v16, %v7883_v3  ;;  %v8091_v22 = vadd.f32 %v1631_v19, %v7886_v4  ;;  %3497 = vmatpush1.bf16.msra.mxu0 %v6489_v13  ;;  %3538 = vmatpush1.bf16.msra.mxu1 %v6492_v45  ;;  %v6503_v3 = vld [vmem:[%s8735_s1 + $0xca4] ss:$16 sps:$4 sm:$0xff]   ;;  %v6506_v4 = vld [vmem:[%s8735_s1 + $0xcac] ss:$16 sps:$4 sm:$0xff]  }
 0x18e   : > { %v1592_v24 = vpop.f32.mrf.mxu0  ;;  %v1633_v25 = vpop.f32.mrf.mxu1  ;;  %3498 = vmatprep.subr.bf16.mxu0 %v6497_v48  ;;  %3539 = vmatprep.subr.bf16.mxu1 %v6500_v14  ;;  %v6569_v13 = vld [vmem:[%s8735_s1 + $0xd44] ss:$16 sps:$4 sm:$0xff]   ;;  %v6572_v45 = vld [vmem:[%s8735_s1 + $0xd4c] ss:$16 sps:$4 sm:$0xff]   ;;  %v6567_v14 = vld [vmem:[%s8735_s1 + $0xd40] ss:$16 sps:$4 sm:$0xff]  }
 0x18f   : > { %v8106_v26 = vadd.f32 %v1592_v24, %v7895_v40  ;;  %v8109_v47 = vadd.f32 %v1633_v25, %v7898_v41  ;;  %3528 = vmatprep.mubr.bf16.mxu0 %v5558_v15  ;;  %3569 = vmatprep.mubr.bf16.mxu1 %v5558_v15  ;;  %v6509_v41 = vld [vmem:[%s8735_s1 + $0xc84] ss:$16 sps:$4 sm:$0xff]   ;;  %v6570_v15 = vld [vmem:[%s8735_s1 + $0xd48] ss:$16 sps:$4 sm:$0xff]   ;;  %v6578_v19 = vld [vmem:[%s8735_s1 + $0xd2c] ss:$16 sps:$4 sm:$0xff]  }
 0x190   : > { %v1594_v27 = vpop.f32.mrf.mxu0  ;;  %v1635_v28 = vpop.f32.mrf.mxu1  ;;  %v8244_v48 = vld [vmem:[%s6977_s10 + $0x10] sm:$0x11]  ;;  %v6576_v24 = vld [vmem:[%s8735_s1 + $0xd28] ss:$16 sps:$4 sm:$0xff]  }
 0x191   : > { %3499 = vmatpush1.bf16.msra.mxu0 %v6495_v23  ;;  %3540 = vmatpush1.bf16.msra.mxu1 %v6498_v46  ;;  %v6575_v16 = vld [vmem:[%s8735_s1 + $0xd24] ss:$16 sps:$4 sm:$0xff]   ;;  %v5688_v23 = vcombine.high %v8071_v12, %v8244_v48  ;;  %v6573_v46 = vld [vmem:[%s8735_s1 + $0xd20] ss:$16 sps:$4 sm:$0xff]   ;;  %v6582_v28 = vld [vmem:[%s8735_s1 + $0xd08] ss:$16 sps:$4 sm:$0xff]  }
 0x192   : > { %v1595_v31 = vpop.f32.mrf.mxu0  ;;  %v1636_v40 = vpop.f32.mrf.mxu1  ;;  %3500 = vmatprep.subr.bf16.mxu0 %v6503_v3  ;;  %3541 = vmatprep.subr.bf16.mxu1 %v6506_v4  ;;  %v6581_v25 = vld [vmem:[%s8735_s1 + $0xd04] ss:$16 sps:$4 sm:$0xff]   ;;  %v6584_v3 = vld [vmem:[%s8735_s1 + $0xd0c] ss:$16 sps:$4 sm:$0xff]   ;;  %v6579_v27 = vld [vmem:[%s8735_s1 + $0xd00] ss:$16 sps:$4 sm:$0xff]  }
 0x193   : > { %v3667_v4 = vshll.u32 %v5688_v23, 16  ;;  %v3665_v31 = vshrl.u32 %v5688_v23, 16  ;;  %v6641_v23 = vld [vmem:[%s8735_s1 + $0xfc0] ss:$16 sps:$4 sm:$0xff]  }
 0x195   : > { %3501 = vmatpush1.bf16.msra.mxu0 %v6501_v29  ;;  %3542 = vmatpush1.bf16.msra.mxu1 %v6504_v30  ;;  %v6589_v29 = vld [vmem:[%s8735_s1 + $0xee4] ss:$16 sps:$4 sm:$0xff]   ;;  %v6592_v30 = vld [vmem:[%s8735_s1 + $0xeec] ss:$16 sps:$4 sm:$0xff]   ;;  %v3669_v40 = vrot.slane %v3667_v4, 1 }
 0x196   : > { %3502 = vmatprep.subr.bf16.mxu0 %v6509_v41  ;;  %3543 = vmatprep.subr.bf16.mxu1 %v6512_v32  ;;  %v5557_v41 = vcombine.low %v8071_v12, %v8071_v12  ;;  %v6587_v32 = vld [vmem:[%s8735_s1 + $0xee0] ss:$16 sps:$4 sm:$0xff]   ;;  %v6650_v4 = vld [vmem:[%s8735_s1 + $0xfa8] ss:$16 sps:$4 sm:$0xff]  }
 0x199   : > { %3503 = vmatpush1.bf16.msra.mxu0 %v6507_v33  ;;  %3544 = vmatpush1.bf16.msra.mxu1 %v6510_v34  ;;  %v6590_v33 = vld [vmem:[%s8735_s1 + $0xee8] ss:$16 sps:$4 sm:$0xff]   ;;  %v6595_v34 = vld [vmem:[%s8735_s1 + $0xec4] ss:$16 sps:$4 sm:$0xff]  }
 0x19a   : > { %3504 = vmatprep.subr.bf16.mxu0 %v6515_v35  ;;  %3545 = vmatprep.subr.bf16.mxu1 %v6518_v20  ;;  %v6598_v35 = vld [vmem:[%s8735_s1 + $0xecc] ss:$16 sps:$4 sm:$0xff]   ;;  %v3670_v20 = vor.u32 %v3669_v40, %v3665_v31  ;;  %v6661_v31 = vld [vmem:[%s8735_s1 + $0xf64] ss:$16 sps:$4 sm:$0xff]  }
 0x19b   : > { %v6664_v40 = vld [vmem:[%s8735_s1 + $0xf6c] ss:$16 sps:$4 sm:$0xff]  }
 0x19d   : > { %3505 = vmatpush1.bf16.msra.mxu0 %v6513_v36  ;;  %3546 = vmatpush1.bf16.msra.mxu1 %v6516_v37 }
 0x19e   : > { %3506 = vmatprep.subr.bf16.mxu0 %v6521_v17  ;;  %3547 = vmatprep.subr.bf16.mxu1 %v6524_v38 }
 0x1a1   : > { %3507 = vmatpush1.bf16.msra.mxu0 %v6519_v39  ;;  %3548 = vmatpush1.bf16.msra.mxu1 %v6522_v42  ;;  %v6593_v39 = vld [vmem:[%s8735_s1 + $0xec0] ss:$16 sps:$4 sm:$0xff]   ;;  %v6596_v42 = vld [vmem:[%s8735_s1 + $0xec8] ss:$16 sps:$4 sm:$0xff]  }
 0x1a2   : > { %3508 = vmatprep.subr.bf16.mxu0 %v6527_v43  ;;  %3549 = vmatprep.subr.bf16.mxu1 %v6530_v44 }
 0x1a5   : > { %3509 = vmatpush1.bf16.msra.mxu0 %v6525_v49  ;;  %3550 = vmatpush1.bf16.msra.mxu1 %v6528_v51 }
 0x1a6   : > { %3510 = vmatprep.subr.bf16.mxu0 %v6533_v52  ;;  %3551 = vmatprep.subr.bf16.mxu1 %v6536_v53 }
 0x1a9   : > { %3511 = vmatpush1.bf16.msra.mxu0 %v6531_v54  ;;  %3552 = vmatpush1.bf16.msra.mxu1 %v6534_v55  ;;  %v6599_v54 = vld [vmem:[%s8735_s1 + $0xea0] ss:$16 sps:$4 sm:$0xff]   ;;  %v6602_v55 = vld [vmem:[%s8735_s1 + $0xea8] ss:$16 sps:$4 sm:$0xff]  }
 0x1aa   : > { %3512 = vmatprep.subr.bf16.mxu0 %v6539_v56  ;;  %3553 = vmatprep.subr.bf16.mxu1 %v6542_v57  ;;  %v6610_v57 = vld [vmem:[%s8735_s1 + $0xe8c] ss:$16 sps:$4 sm:$0xff]  }
 0x1ad   : > { %3513 = vmatpush2.bf16.msra.mxu0 %v6537_v58  ;;  %3554 = vmatpush2.bf16.msra.mxu1 %v6540_v59  ;;  %v6605_v58 = vld [vmem:[%s8735_s1 + $0xe80] ss:$16 sps:$4 sm:$0xff]   ;;  %v6608_v59 = vld [vmem:[%s8735_s1 + $0xe88] ss:$16 sps:$4 sm:$0xff]  }
 0x1ae   : > { %3514 = vmatprep.subr.bf16.mxu0 %v6545_v60  ;;  %3555 = vmatprep.subr.bf16.mxu1 %v6548_v61  ;;  %v6613_v60 = vld [vmem:[%s8735_s1 + $0xe64] ss:$16 sps:$4 sm:$0xff]   ;;  %v6616_v61 = vld [vmem:[%s8735_s1 + $0xe6c] ss:$16 sps:$4 sm:$0xff]  }
 0x1b1   : > { %3515 = vmatpush2.bf16.msra.mxu0 %v6543_v62  ;;  %3556 = vmatpush2.bf16.msra.mxu1 %v6546_v18  ;;  %v6611_v62 = vld [vmem:[%s8735_s1 + $0xe60] ss:$16 sps:$4 sm:$0xff]   ;;  %v6614_v18 = vld [vmem:[%s8735_s1 + $0xe68] ss:$16 sps:$4 sm:$0xff]  }
 0x1b2   : > { %3516 = vmatprep.subr.bf16.mxu0 %v6551_v63  ;;  %3557 = vmatprep.subr.bf16.mxu1 %v6554_v0  ;;  %v6619_v63 = vld [vmem:[%s8735_s1 + $0xe44] ss:$16 sps:$4 sm:$0xff]   ;;  %v6622_v0 = vld [vmem:[%s8735_s1 + $0xe4c] ss:$16 sps:$4 sm:$0xff]  }
 0x1b5   : > { %3517 = vmatpush2.bf16.msra.mxu0 %v6549_v1  ;;  %3558 = vmatpush2.bf16.msra.mxu1 %v6552_v2  ;;  %v6617_v1 = vld [vmem:[%s8735_s1 + $0xe40] ss:$16 sps:$4 sm:$0xff]   ;;  %v6620_v2 = vld [vmem:[%s8735_s1 + $0xe48] ss:$16 sps:$4 sm:$0xff]  }
 0x1b6   : > { %3518 = vmatprep.subr.bf16.mxu0 %v6557_v5  ;;  %3559 = vmatprep.subr.bf16.mxu1 %v6560_v6  ;;  %v6625_v5 = vld [vmem:[%s8735_s1 + $0xe24] ss:$16 sps:$4 sm:$0xff]   ;;  %v6628_v6 = vld [vmem:[%s8735_s1 + $0xe2c] ss:$16 sps:$4 sm:$0xff]  }
 0x1b9   : > { %3519 = vmatpush2.bf16.msra.mxu0 %v6555_v7  ;;  %3560 = vmatpush2.bf16.msra.mxu1 %v6558_v8  ;;  %v6623_v7 = vld [vmem:[%s8735_s1 + $0xe20] ss:$16 sps:$4 sm:$0xff]   ;;  %v6626_v8 = vld [vmem:[%s8735_s1 + $0xe28] ss:$16 sps:$4 sm:$0xff]  }
 0x1ba   : > { %3520 = vmatprep.subr.bf16.mxu0 %v6563_v9  ;;  %3561 = vmatprep.subr.bf16.mxu1 %v6566_v10  ;;  %v6631_v9 = vld [vmem:[%s8735_s1 + $0xe04] ss:$16 sps:$4 sm:$0xff]   ;;  %v6634_v10 = vld [vmem:[%s8735_s1 + $0xe0c] ss:$16 sps:$4 sm:$0xff]  }
 0x1bd   : > { %3521 = vmatpush2.bf16.msra.mxu0 %v6561_v50  ;;  %3562 = vmatpush2.bf16.msra.mxu1 %v6564_v11  ;;  %v6629_v50 = vld [vmem:[%s8735_s1 + $0xe00] ss:$16 sps:$4 sm:$0xff]   ;;  %v6632_v11 = vld [vmem:[%s8735_s1 + $0xe08] ss:$16 sps:$4 sm:$0xff]  }
 0x1be   : > { %3522 = vmatprep.subr.bf16.mxu0 %v6569_v13  ;;  %3563 = vmatprep.subr.bf16.mxu1 %v6572_v45  ;;  %v6637_v13 = vld [vmem:[%s8735_s1 + $0xfe4] ss:$16 sps:$4 sm:$0xff]   ;;  %v6640_v45 = vld [vmem:[%s8735_s1 + $0xfec] ss:$16 sps:$4 sm:$0xff]  }
 0x1c1   : > { %3523 = vmatpush2.bf16.msra.mxu0 %v6567_v14  ;;  %3564 = vmatpush2.bf16.msra.mxu1 %v6570_v15  ;;  %v6635_v14 = vld [vmem:[%s8735_s1 + $0xfe0] ss:$16 sps:$4 sm:$0xff]   ;;  %v6638_v15 = vld [vmem:[%s8735_s1 + $0xfe8] ss:$16 sps:$4 sm:$0xff]  }
 0x1c2   : > { %3524 = vmatprep.subr.bf16.mxu0 %v6575_v16  ;;  %3565 = vmatprep.subr.bf16.mxu1 %v6578_v19  ;;  %v6643_v16 = vld [vmem:[%s8735_s1 + $0xfc4] ss:$16 sps:$4 sm:$0xff]   ;;  %v6646_v19 = vld [vmem:[%s8735_s1 + $0xfcc] ss:$16 sps:$4 sm:$0xff]  }
 0x1c5   : > { %3525 = vmatpush2.bf16.msra.mxu0 %v6573_v46  ;;  %3566 = vmatpush2.bf16.msra.mxu1 %v6576_v24  ;;  %v6644_v46 = vld [vmem:[%s8735_s1 + $0xfc8] ss:$16 sps:$4 sm:$0xff]   ;;  %v6649_v24 = vld [vmem:[%s8735_s1 + $0xfa4] ss:$16 sps:$4 sm:$0xff]  }
 0x1c6   : > { %3526 = vmatprep.subr.bf16.mxu0 %v6581_v25  ;;  %3567 = vmatprep.subr.bf16.mxu1 %v6584_v3  ;;  %v6652_v25 = vld [vmem:[%s8735_s1 + $0xfac] ss:$16 sps:$4 sm:$0xff]   ;;  %v6647_v3 = vld [vmem:[%s8735_s1 + $0xfa0] ss:$16 sps:$4 sm:$0xff]  }
 0x1c9   : > { %3527 = vmatpush2.bf16.msra.mxu0 %v6579_v27  ;;  %3568 = vmatpush2.bf16.msra.mxu1 %v6582_v28  ;;  %v6655_v27 = vld [vmem:[%s8735_s1 + $0xf84] ss:$16 sps:$4 sm:$0xff]   ;;  %v6658_v28 = vld [vmem:[%s8735_s1 + $0xf8c] ss:$16 sps:$4 sm:$0xff]  }
 0x1ca   : > { %3993 = vmatprep.subr.bf16.mxu0 %v6589_v29  ;;  %4034 = vmatprep.subr.bf16.mxu1 %v6592_v30  ;;  %v6653_v29 = vld [vmem:[%s8735_s1 + $0xf80] ss:$16 sps:$4 sm:$0xff]   ;;  %v6656_v30 = vld [vmem:[%s8735_s1 + $0xf88] ss:$16 sps:$4 sm:$0xff]  }
 0x1cc   : > { %v2075_v36 = vpop.f32.mrf.mxu0  ;;  %v2116_v37 = vpop.f32.mrf.mxu1  ;;  %3529 = vmatmul.mubr.bf16.vlgmr.msra.gmra.mxu0 %v5557_v41  ;;  %3570 = vmatmul.mubr.bf16.vlgmr.msra.gmra.mxu1 %v5557_v41  ;;  %v6659_v41 = vld [vmem:[%s8735_s1 + $0xf60] ss:$16 sps:$4 sm:$0xff]  }
 0x1cd   : > { %v8299_v17 = vadd.f32 %v2075_v36, %v8088_v21  ;;  %v8302_v38 = vadd.f32 %v2116_v37, %v8091_v22  ;;  %3994 = vmatpush1.bf16.msra.mxu0 %v6587_v32  ;;  %4035 = vmatpush1.bf16.msra.mxu1 %v6590_v33  ;;  %v6601_v21 = vld [vmem:[%s8735_s1 + $0xea4] ss:$16 sps:$4 sm:$0xff]   ;;  %v6604_v22 = vld [vmem:[%s8735_s1 + $0xeac] ss:$16 sps:$4 sm:$0xff]   ;;  %v6662_v32 = vld [vmem:[%s8735_s1 + $0xf68] ss:$16 sps:$4 sm:$0xff]  }
 0x1ce   : > { %v2077_v43 = vpop.f32.mrf.mxu0  ;;  %v2118_v44 = vpop.f32.mrf.mxu1  ;;  %3995 = vmatprep.subr.bf16.mxu0 %v6595_v34  ;;  %4036 = vmatprep.subr.bf16.mxu1 %v6598_v35  ;;  %v6667_v33 = vld [vmem:[%s8735_s1 + $0xf44] ss:$16 sps:$4 sm:$0xff]   ;;  %v6670_v34 = vld [vmem:[%s8735_s1 + $0xf4c] ss:$16 sps:$4 sm:$0xff]   ;;  %v5687_v35 = vcombine.low %v8071_v12, %v8244_v48  ;;  %v6668_v36 = vld [vmem:[%s8735_s1 + $0xf48] ss:$16 sps:$4 sm:$0xff]  }
 0x1cf   : > { %v8317_v49 = vadd.f32 %v2077_v43, %v8106_v26  ;;  %v8320_v51 = vadd.f32 %v2118_v44, %v8109_v47  ;;  %4025 = vmatprep.mubr.bf16.mxu0 %v3670_v20  ;;  %4066 = vmatprep.mubr.bf16.mxu1 %v3670_v20  ;;  %v6607_v47 = vld [vmem:[%s8735_s1 + $0xe84] ss:$16 sps:$4 sm:$0xff]   ;;  %v6665_v20 = vld [vmem:[%s8735_s1 + $0xf40] ss:$16 sps:$4 sm:$0xff]   ;;  %v6676_v12 = vld [vmem:[%s8735_s1 + $0xf2c] ss:$16 sps:$4 sm:$0xff]  }
 0x1d0   : > { %v2079_v52 = vpop.f32.mrf.mxu0  ;;  %v2120_v53 = vpop.f32.mrf.mxu1  ;;  %v6673_v37 = vld [vmem:[%s8735_s1 + $0xf24] ss:$16 sps:$4 sm:$0xff]   ;;  %v6674_v43 = vld [vmem:[%s8735_s1 + $0xf28] ss:$16 sps:$4 sm:$0xff]  }
 0x1d1   : > { %3996 = vmatpush1.bf16.msra.mxu0 %v6593_v39  ;;  %4037 = vmatpush1.bf16.msra.mxu1 %v6596_v42  ;;  %v3660_v39 = vshll.u32 %v5687_v35, 16  ;;  %v6671_v42 = vld [vmem:[%s8735_s1 + $0xf20] ss:$16 sps:$4 sm:$0xff]   ;;  %v6679_v44 = vld [vmem:[%s8735_s1 + $0xf04] ss:$16 sps:$4 sm:$0xff]  }
 0x1d2   : > { %v2080_v56 = vpop.f32.mrf.mxu0  ;;  %v2121_v26 = vpop.f32.mrf.mxu1  ;;  %3997 = vmatprep.subr.bf16.mxu0 %v6601_v21  ;;  %4038 = vmatprep.subr.bf16.mxu1 %v6604_v22  ;;  %v6682_v21 = vld [vmem:[%s8735_s1 + $0xf0c] ss:$16 sps:$4 sm:$0xff]   ;;  %v3658_v22 = vshrl.u32 %v5687_v35, 16  ;;  %v6730_v35 = vld [vmem:[%s8735_s1 + $0x1008] ss:$16 sps:$4 sm:$0xff]  }
 0x1d3   : > { %v3662_v52 = vrot.slane %v3660_v39, 1  ;;  %v8481_v53 = vld [vmem:[%s6977_s10 + $0x8] sm:$0xee]  ;;  %v6687_v56 = vld [vmem:[%s8735_s1 + $0x10e4] ss:$16 sps:$4 sm:$0xff]  }
 0x1d4   : > { %v6690_v26 = vld [vmem:[%s8735_s1 + $0x10ec] ss:$16 sps:$4 sm:$0xff]   ;;  %v6741_v39 = vld [vmem:[%s8735_s1 + $0x11c4] ss:$16 sps:$4 sm:$0xff]  }
 0x1d5   : > { %3998 = vmatpush1.bf16.msra.mxu0 %v6599_v54  ;;  %4039 = vmatpush1.bf16.msra.mxu1 %v6602_v55  ;;  %v6677_v54 = vld [vmem:[%s8735_s1 + $0xf00] ss:$16 sps:$4 sm:$0xff]   ;;  %v6680_v55 = vld [vmem:[%s8735_s1 + $0xf08] ss:$16 sps:$4 sm:$0xff]  }
 0x1d6   : > { %3999 = vmatprep.subr.bf16.mxu0 %v6607_v47  ;;  %4040 = vmatprep.subr.bf16.mxu1 %v6610_v57  ;;  %v5818_v47 = vcombine.high %v8481_v53, %v8244_v48  ;;  %v3663_v57 = vor.u32 %v3662_v52, %v3658_v22  ;;  %v6750_v22 = vld [vmem:[%s8735_s1 + $0x11ac] ss:$16 sps:$4 sm:$0xff]   ;;  %v6745_v52 = vld [vmem:[%s8735_s1 + $0x11a0] ss:$16 sps:$4 sm:$0xff]  }
 0x1d9   : > { %4000 = vmatpush1.bf16.msra.mxu0 %v6605_v58  ;;  %4041 = vmatpush1.bf16.msra.mxu1 %v6608_v59  ;;  %v6685_v58 = vld [vmem:[%s8735_s1 + $0x10e0] ss:$16 sps:$4 sm:$0xff]   ;;  %v6688_v59 = vld [vmem:[%s8735_s1 + $0x10e8] ss:$16 sps:$4 sm:$0xff]  }
 0x1da   : > { %4001 = vmatprep.subr.bf16.mxu0 %v6613_v60  ;;  %4042 = vmatprep.subr.bf16.mxu1 %v6616_v61  ;;  %v6693_v60 = vld [vmem:[%s8735_s1 + $0x10c4] ss:$16 sps:$4 sm:$0xff]   ;;  %v6696_v61 = vld [vmem:[%s8735_s1 + $0x10cc] ss:$16 sps:$4 sm:$0xff]  }
 0x1dd   : > { %4002 = vmatpush1.bf16.msra.mxu0 %v6611_v62  ;;  %4043 = vmatpush1.bf16.msra.mxu1 %v6614_v18  ;;  %v4151_v62 = vrot.slane %v5818_v47, 1  ;;  %v6754_v47 = vld [vmem:[%s8735_s1 + $0x1188] ss:$16 sps:$4 sm:$0xff]  }
 0x1de   : > { %4003 = vmatprep.subr.bf16.mxu0 %v6619_v63  ;;  %4044 = vmatprep.subr.bf16.mxu1 %v6622_v0 }
 0x1e1   : > { %4004 = vmatpush1.bf16.msra.mxu0 %v6617_v1  ;;  %4045 = vmatpush1.bf16.msra.mxu1 %v6620_v2  ;;  %v6691_v2 = vld [vmem:[%s8735_s1 + $0x10c0] ss:$16 sps:$4 sm:$0xff]  }
 0x1e2   : > { %4005 = vmatprep.subr.bf16.mxu0 %v6625_v5  ;;  %4046 = vmatprep.subr.bf16.mxu1 %v6628_v6  ;;  %v6694_v5 = vld [vmem:[%s8735_s1 + $0x10c8] ss:$16 sps:$4 sm:$0xff]  }
 0x1e5   : > { %4006 = vmatpush1.bf16.msra.mxu0 %v6623_v7  ;;  %4047 = vmatpush1.bf16.msra.mxu1 %v6626_v8 }
 0x1e6   : > { %4007 = vmatprep.subr.bf16.mxu0 %v6631_v9  ;;  %4048 = vmatprep.subr.bf16.mxu1 %v6634_v10 }
 0x1e9   : > { %4008 = vmatpush1.bf16.msra.mxu0 %v6629_v50  ;;  %4049 = vmatpush1.bf16.msra.mxu1 %v6632_v11  ;;  %v6697_v11 = vld [vmem:[%s8735_s1 + $0x10a0] ss:$16 sps:$4 sm:$0xff]  }
 0x1ea   : > { %4009 = vmatprep.subr.bf16.mxu0 %v6637_v13  ;;  %4050 = vmatprep.subr.bf16.mxu1 %v6640_v45  ;;  %v6700_v13 = vld [vmem:[%s8735_s1 + $0x10a8] ss:$16 sps:$4 sm:$0xff]  }
 0x1ed   : > { %4010 = vmatpush2.bf16.msra.mxu0 %v6635_v14  ;;  %4051 = vmatpush2.bf16.msra.mxu1 %v6638_v15  ;;  %v6708_v14 = vld [vmem:[%s8735_s1 + $0x108c] ss:$16 sps:$4 sm:$0xff]   ;;  %v4586_v15 = vld [vmem:[%s8737_s3] sm:$0xff] }
 0x1ee   : > { %4011 = vmatprep.subr.bf16.mxu0 %v6643_v16  ;;  %4052 = vmatprep.subr.bf16.mxu1 %v6646_v19  ;;  %v6801_v16 = vmov 0   ;;  %v6703_v19 = vld [vmem:[%s8735_s1 + $0x1080] ss:$16 sps:$4 sm:$0xff]  }
 0x1ef   : > { %5900 = vset.pattern.permute.xlu0 %v6801_v16 }
 0x1f0   : > { %4589 = vperm.xlu0 %5900, %v4586_v15  }
 0x1f1   : > { %4012 = vmatpush2.bf16.msra.mxu0 %v6641_v23  ;;  %4053 = vmatpush2.bf16.msra.mxu1 %v6644_v46  ;;  %v6706_v23 = vld [vmem:[%s8735_s1 + $0x1088] ss:$16 sps:$4 sm:$0xff]   ;;  %v6711_v46 = vld [vmem:[%s8735_s1 + $0x1064] ss:$16 sps:$4 sm:$0xff]  }
 0x1f2   : > { %4013 = vmatprep.subr.bf16.mxu0 %v6649_v24  ;;  %4054 = vmatprep.subr.bf16.mxu1 %v6652_v25  ;;  %v6714_v24 = vld [vmem:[%s8735_s1 + $0x106c] ss:$16 sps:$4 sm:$0xff]   ;;  %v6709_v25 = vld [vmem:[%s8735_s1 + $0x1060] ss:$16 sps:$4 sm:$0xff]  }
 0x1f5   : > { %4014 = vmatpush2.bf16.msra.mxu0 %v6647_v3  ;;  %4055 = vmatpush2.bf16.msra.mxu1 %v6650_v4  ;;  %v6712_v3 = vld [vmem:[%s8735_s1 + $0x1068] ss:$16 sps:$4 sm:$0xff]   ;;  %v6717_v4 = vld [vmem:[%s8735_s1 + $0x1044] ss:$16 sps:$4 sm:$0xff]  }
 0x1f6   : > { %4015 = vmatprep.subr.bf16.mxu0 %v6655_v27  ;;  %4056 = vmatprep.subr.bf16.mxu1 %v6658_v28  ;;  %v6720_v27 = vld [vmem:[%s8735_s1 + $0x104c] ss:$16 sps:$4 sm:$0xff]   ;;  %v6715_v28 = vld [vmem:[%s8735_s1 + $0x1040] ss:$16 sps:$4 sm:$0xff]  }
 0x1f9   : > { %4016 = vmatpush2.bf16.msra.mxu0 %v6653_v29  ;;  %4057 = vmatpush2.bf16.msra.mxu1 %v6656_v30  ;;  %v6718_v29 = vld [vmem:[%s8735_s1 + $0x1048] ss:$16 sps:$4 sm:$0xff]   ;;  %v6723_v30 = vld [vmem:[%s8735_s1 + $0x1024] ss:$16 sps:$4 sm:$0xff]  }
 0x1fa   : > { %4017 = vmatprep.subr.bf16.mxu0 %v6661_v31  ;;  %4058 = vmatprep.subr.bf16.mxu1 %v6664_v40  ;;  %v6726_v31 = vld [vmem:[%s8735_s1 + $0x102c] ss:$16 sps:$4 sm:$0xff]   ;;  %v6721_v40 = vld [vmem:[%s8735_s1 + $0x1020] ss:$16 sps:$4 sm:$0xff]  }
 0x1fd   : > { %4018 = vmatpush2.bf16.msra.mxu0 %v6659_v41  ;;  %4059 = vmatpush2.bf16.msra.mxu1 %v6662_v32  ;;  %v6724_v41 = vld [vmem:[%s8735_s1 + $0x1028] ss:$16 sps:$4 sm:$0xff]   ;;  %v6729_v32 = vld [vmem:[%s8735_s1 + $0x1004] ss:$16 sps:$4 sm:$0xff]  }
 0x1fe   : > { %4019 = vmatprep.subr.bf16.mxu0 %v6667_v33  ;;  %4060 = vmatprep.subr.bf16.mxu1 %v6670_v34  ;;  %v6732_v33 = vld [vmem:[%s8735_s1 + $0x100c] ss:$16 sps:$4 sm:$0xff]   ;;  %v6727_v34 = vld [vmem:[%s8735_s1 + $0x1000] ss:$16 sps:$4 sm:$0xff]  }
 0x201   : > { %4020 = vmatpush2.bf16.msra.mxu0 %v6665_v20  ;;  %4061 = vmatpush2.bf16.msra.mxu1 %v6668_v36  ;;  %v6735_v20 = vld [vmem:[%s8735_s1 + $0x11e4] ss:$16 sps:$4 sm:$0xff]   ;;  %v6738_v36 = vld [vmem:[%s8735_s1 + $0x11ec] ss:$16 sps:$4 sm:$0xff]  }
 0x202   : > { %4021 = vmatprep.subr.bf16.mxu0 %v6673_v37  ;;  %4062 = vmatprep.subr.bf16.mxu1 %v6676_v12  ;;  %v6733_v37 = vld [vmem:[%s8735_s1 + $0x11e0] ss:$16 sps:$4 sm:$0xff]   ;;  %v6736_v12 = vld [vmem:[%s8735_s1 + $0x11e8] ss:$16 sps:$4 sm:$0xff]  }
 0x205   : > { %4022 = vmatpush2.bf16.msra.mxu0 %v6671_v42  ;;  %4063 = vmatpush2.bf16.msra.mxu1 %v6674_v43  ;;  %v6744_v42 = vld [vmem:[%s8735_s1 + $0x11cc] ss:$16 sps:$4 sm:$0xff]   ;;  %v6739_v43 = vld [vmem:[%s8735_s1 + $0x11c0] ss:$16 sps:$4 sm:$0xff]  }
 0x206   : > { %4023 = vmatprep.subr.bf16.mxu0 %v6679_v44  ;;  %4064 = vmatprep.subr.bf16.mxu1 %v6682_v21  ;;  %v6742_v44 = vld [vmem:[%s8735_s1 + $0x11c8] ss:$16 sps:$4 sm:$0xff]   ;;  %v6747_v21 = vld [vmem:[%s8735_s1 + $0x11a4] ss:$16 sps:$4 sm:$0xff]  }
 0x209   : > { %4024 = vmatpush2.bf16.msra.mxu0 %v6677_v54  ;;  %4065 = vmatpush2.bf16.msra.mxu1 %v6680_v55  ;;  %v6748_v54 = vld [vmem:[%s8735_s1 + $0x11a8] ss:$16 sps:$4 sm:$0xff]   ;;  %v6753_v55 = vld [vmem:[%s8735_s1 + $0x1184] ss:$16 sps:$4 sm:$0xff]  }
 0x20a   : > { %4474 = vmatprep.subr.bf16.mxu0 %v6687_v56  ;;  %4515 = vmatprep.subr.bf16.mxu1 %v6690_v26  ;;  %v6756_v56 = vld [vmem:[%s8735_s1 + $0x118c] ss:$16 sps:$4 sm:$0xff]   ;;  %v6751_v26 = vld [vmem:[%s8735_s1 + $0x1180] ss:$16 sps:$4 sm:$0xff]  }
 0x20c   : > { %v2570_v18 = vpop.f32.mrf.mxu0  ;;  %v2611_v63 = vpop.f32.mrf.mxu1  ;;  %4026 = vmatmul.mubr.bf16.vlgmr.msra.gmra.mxu0 %v3663_v57  ;;  %4067 = vmatmul.mubr.bf16.vlgmr.msra.gmra.mxu1 %v3663_v57  ;;  %v6759_v57 = vld [vmem:[%s8735_s1 + $0x1164] ss:$16 sps:$4 sm:$0xff]  }
 0x20d   : > { %v8510_v0 = vadd.f32 %v2570_v18, %v8299_v17  ;;  %v8513_v1 = vadd.f32 %v2611_v63, %v8302_v38  ;;  %4475 = vmatpush1.bf16.msra.mxu0 %v6685_v58  ;;  %4516 = vmatpush1.bf16.msra.mxu1 %v6688_v59  ;;  %v6699_v17 = vld [vmem:[%s8735_s1 + $0x10a4] ss:$16 sps:$4 sm:$0xff]   ;;  %v6702_v38 = vld [vmem:[%s8735_s1 + $0x10ac] ss:$16 sps:$4 sm:$0xff]   ;;  %v6757_v59 = vld [vmem:[%s8735_s1 + $0x1160] ss:$16 sps:$4 sm:$0xff]  }
 0x20e   : > { %v2572_v6 = vpop.f32.mrf.mxu0  ;;  %v2613_v7 = vpop.f32.mrf.mxu1  ;;  %4476 = vmatprep.subr.bf16.mxu0 %v6693_v60  ;;  %4517 = vmatprep.subr.bf16.mxu1 %v6696_v61  ;;  %v6762_v58 = vld [vmem:[%s8735_s1 + $0x116c] ss:$16 sps:$4 sm:$0xff]   ;;  %v6760_v60 = vld [vmem:[%s8735_s1 + $0x1168] ss:$16 sps:$4 sm:$0xff]   ;;  %v6765_v61 = vld [vmem:[%s8735_s1 + $0x1144] ss:$16 sps:$4 sm:$0xff]  }
 0x20f   : > { %v8528_v8 = vadd.f32 %v2572_v6, %v8317_v49  ;;  %v8531_v9 = vadd.f32 %v2613_v7, %v8320_v51  ;;  %4506 = vmatprep.mubr.bf16.mxu0 %v4151_v62  ;;  %4547 = vmatprep.mubr.bf16.mxu1 %v4151_v62  ;;  %v6705_v51 = vld [vmem:[%s8735_s1 + $0x1084] ss:$16 sps:$4 sm:$0xff]   ;;  %v6768_v62 = vld [vmem:[%s8735_s1 + $0x114c] ss:$16 sps:$4 sm:$0xff]   ;;  %v6763_v18 = vld [vmem:[%s8735_s1 + $0x1140] ss:$16 sps:$4 sm:$0xff]  }
 0x210   : > { %v2574_v10 = vpop.f32.mrf.mxu0  ;;  %v2615_v50 = vpop.f32.mrf.mxu1  ;;  %v6766_v63 = vld [vmem:[%s8735_s1 + $0x1148] ss:$16 sps:$4 sm:$0xff]   ;;  %v6769_v6 = vld [vmem:[%s8735_s1 + $0x1120] ss:$16 sps:$4 sm:$0xff]  }
 0x211   : > { %4477 = vmatpush1.bf16.msra.mxu0 %v6691_v2  ;;  %4518 = vmatpush1.bf16.msra.mxu1 %v6694_v5  ;;  %v6771_v2 = vld [vmem:[%s8735_s1 + $0x1124] ss:$16 sps:$4 sm:$0xff]   ;;  %v6774_v5 = vld [vmem:[%s8735_s1 + $0x112c] ss:$16 sps:$4 sm:$0xff]   ;;  %v6772_v7 = vld [vmem:[%s8735_s1 + $0x1128] ss:$16 sps:$4 sm:$0xff]   ;;  %v5817_v10 = vcombine.low %v8481_v53, %v8244_v48 }
 0x212   : > { %v2575_v45 = vpop.f32.mrf.mxu0  ;;  %v2616_v49 = vpop.f32.mrf.mxu1  ;;  %4478 = vmatprep.subr.bf16.mxu0 %v6699_v17  ;;  %4519 = vmatprep.subr.bf16.mxu1 %v6702_v38  ;;  %v6777_v17 = vld [vmem:[%s8735_s1 + $0x1104] ss:$16 sps:$4 sm:$0xff]   ;;  %v6780_v38 = vld [vmem:[%s8735_s1 + $0x110c] ss:$16 sps:$4 sm:$0xff]   ;;  %v6775_v50 = vld [vmem:[%s8735_s1 + $0x1100] ss:$16 sps:$4 sm:$0xff]  }
 0x215   : > { %4479 = vmatpush1.bf16.msra.mxu0 %v6697_v11  ;;  %4520 = vmatpush1.bf16.msra.mxu1 %v6700_v13  ;;  %v6778_v11 = vld [vmem:[%s8735_s1 + $0x1108] ss:$16 sps:$4 sm:$0xff]   ;;  %v4150_v13 = vrot.slane %v5817_v10, 1 }
 0x216   : > { %4480 = vmatprep.subr.bf16.mxu0 %v6705_v51  ;;  %4521 = vmatprep.subr.bf16.mxu1 %v6708_v14 }
 0x219   : > { %4481 = vmatpush1.bf16.msra.mxu0 %v6703_v19  ;;  %4522 = vmatpush1.bf16.msra.mxu1 %v6706_v23 }
 0x21a   : > { %4482 = vmatprep.subr.bf16.mxu0 %v6711_v46  ;;  %4523 = vmatprep.subr.bf16.mxu1 %v6714_v24 }
 0x21d   : > { %4483 = vmatpush1.bf16.msra.mxu0 %v6709_v25  ;;  %4524 = vmatpush1.bf16.msra.mxu1 %v6712_v3 }
 0x21e   : > { %4484 = vmatprep.subr.bf16.mxu0 %v6717_v4  ;;  %4525 = vmatprep.subr.bf16.mxu1 %v6720_v27 }
 0x221   : > { %4485 = vmatpush1.bf16.msra.mxu0 %v6715_v28  ;;  %4526 = vmatpush1.bf16.msra.mxu1 %v6718_v29 }
 0x222   : > { %4486 = vmatprep.subr.bf16.mxu0 %v6723_v30  ;;  %4527 = vmatprep.subr.bf16.mxu1 %v6726_v31 }
 0x225   : > { %4487 = vmatpush1.bf16.msra.mxu0 %v6721_v40  ;;  %4528 = vmatpush1.bf16.msra.mxu1 %v6724_v41 }
 0x226   : > { %4488 = vmatprep.subr.bf16.mxu0 %v6729_v32  ;;  %4529 = vmatprep.subr.bf16.mxu1 %v6732_v33 }
 0x229   : > { %4489 = vmatpush1.bf16.msra.mxu0 %v6727_v34  ;;  %4530 = vmatpush1.bf16.msra.mxu1 %v6730_v35 }
 0x22a   : > { %4490 = vmatprep.subr.bf16.mxu0 %v6735_v20  ;;  %4531 = vmatprep.subr.bf16.mxu1 %v6738_v36 }
 0x22d   : > { %4491 = vmatpush2.bf16.msra.mxu0 %v6733_v37  ;;  %4532 = vmatpush2.bf16.msra.mxu1 %v6736_v12 }
 0x22e   : > { %4492 = vmatprep.subr.bf16.mxu0 %v6741_v39  ;;  %4533 = vmatprep.subr.bf16.mxu1 %v6744_v42  ;;  %v4562_v42 = vlaneseq }
 0x231   : > { %4493 = vmatpush2.bf16.msra.mxu0 %v6739_v43  ;;  %4534 = vmatpush2.bf16.msra.mxu1 %v6742_v44  ;;  %v4563_v43 = vshrl.u32 %v4562_v42, 7 }
 0x232   : > { %4494 = vmatprep.subr.bf16.mxu0 %v6747_v21  ;;  %4535 = vmatprep.subr.bf16.mxu1 %v6750_v22  ;;  %v4560_v22 = vld [vmem:[%s8736_s2] sm:$0xf] }
 0x233   : > { %v4564_v44 = vsub.s32 0, %v4563_v43  ;;  %v4572_v21 = vsub.s32 2, %v4563_v43 }
 0x235   : > { %4495 = vmatpush2.bf16.msra.mxu0 %v6745_v52  ;;  %4536 = vmatpush2.bf16.msra.mxu1 %v6748_v54  ;;  %v4568_v52 = vsub.s32 1, %v4563_v43  ;;  %v4576_v54 = vsub.s32 3, %v4563_v43 }
 0x236   : > { %4496 = vmatprep.subr.bf16.mxu0 %v6753_v55  ;;  %4537 = vmatprep.subr.bf16.mxu1 %v6756_v56  ;;  %v4565_v55 = vrot.slane %v4560_v22, %v4564_v44  ;;  %v4573_v56 = vrot.slane %v4560_v22, %v4572_v21 }
 0x239   : > { %4497 = vmatpush2.bf16.msra.mxu0 %v6751_v26  ;;  %4538 = vmatpush2.bf16.msra.mxu1 %v6754_v47 }
 0x23a   : > { %4498 = vmatprep.subr.bf16.mxu0 %v6759_v57  ;;  %4539 = vmatprep.subr.bf16.mxu1 %v6762_v58  ;;  %v4569_v57 = vrot.slane %v4560_v22, %v4568_v52 }
 0x23d   : > { %4499 = vmatpush2.bf16.msra.mxu0 %v6757_v59  ;;  %4540 = vmatpush2.bf16.msra.mxu1 %v6760_v60 }
 0x23e   : > { %4500 = vmatprep.subr.bf16.mxu0 %v6765_v61  ;;  %4541 = vmatprep.subr.bf16.mxu1 %v6768_v62  ;;  %v4577_v61 = vrot.slane %v4560_v22, %v4576_v54 }
 0x241   : > { %4501 = vmatpush2.bf16.msra.mxu0 %v6763_v18  ;;  %4542 = vmatpush2.bf16.msra.mxu1 %v6766_v63 }
 0x242   : > { %4502 = vmatprep.subr.bf16.mxu0 %v6771_v2  ;;  %4543 = vmatprep.subr.bf16.mxu1 %v6774_v5 }
 0x245   : > { %4503 = vmatpush2.bf16.msra.mxu0 %v6769_v6  ;;  %4544 = vmatpush2.bf16.msra.mxu1 %v6772_v7 }
 0x246   : > { %4504 = vmatprep.subr.bf16.mxu0 %v6777_v17  ;;  %4545 = vmatprep.subr.bf16.mxu1 %v6780_v38 }
 0x249   : > { %4505 = vmatpush2.bf16.msra.mxu0 %v6775_v50  ;;  %4546 = vmatpush2.bf16.msra.mxu1 %v6778_v11 }
 0x24c   : > { %v3051_v45 = vpop.f32.mrf.mxu0  ;;  %v3092_v49 = vpop.f32.mrf.mxu1  ;;  %4507 = vmatmul.mubr.bf16.vlgmr.msra.gmra.mxu0 %v4150_v13  ;;  %4548 = vmatmul.mubr.bf16.vlgmr.msra.gmra.mxu1 %v4150_v13 }
 0x24d   : > { %v3099_v48 = vadd.f32 %v3051_v45, %v8510_v0  ;;  %v3101_v53 = vadd.f32 %v3092_v49, %v8513_v1 }
 0x24e   : > { %v3053_v51 = vpop.f32.mrf.mxu0  ;;  %v3094_v14 = vpop.f32.mrf.mxu1 }
 0x24f   : > { %v3100_v15 = vadd.f32 %v3053_v51, %v8528_v8  ;;  %v3102_v16 = vadd.f32 %v3094_v14, %v8531_v9 }
 0x250   : > { %v3055_v19 = vpop.f32.mrf.mxu0  ;;  %v3096_v23 = vpop.f32.mrf.mxu1 }
 0x252   : > { %v3056_v46 = vpop.f32.mrf.mxu0  ;;  %v3097_v24 = vpop.f32.mrf.mxu1 }
 0x26b   : > { %v4590_v62 = vpop.permute.xlu0 %4589 }
 0x28c   : > { %v3530_v25 = vpop.f32.mrf.mxu0  ;;  %v3571_v3 = vpop.f32.mrf.mxu1 }
 0x28d   : > { %v3578_v4 = vadd.f32 %v3530_v25, %v3099_v48  ;;  %v3580_v27 = vadd.f32 %v3571_v3, %v3101_v53 }
 0x28e   : > { %v3532_v28 = vpop.f32.mrf.mxu0  ;;  %v3573_v29 = vpop.f32.mrf.mxu1 }
 0x28f   : > { %v3579_v30 = vadd.f32 %v3532_v28, %v3100_v15  ;;  %v3581_v0 = vadd.f32 %v3573_v29, %v3102_v16 }
 0x290   : > { %v3534_v31 = vpop.f32.mrf.mxu0  ;;  %v3575_v1 = vpop.f32.mrf.mxu1 }
 0x292   : > { %v3535_v40 = vpop.f32.mrf.mxu0  ;;  %v3576_v41 = vpop.f32.mrf.mxu1 }
 0x2cc   : > { %v4027_v32 = vpop.f32.mrf.mxu0  ;;  %v4068_v8 = vpop.f32.mrf.mxu1 }
 0x2cd   : > { %v4075_v33 = vadd.f32 %v4027_v32, %v3578_v4  ;;  %v4077_v9 = vadd.f32 %v4068_v8, %v3580_v27 }
 0x2ce   : > { %v4029_v34 = vpop.f32.mrf.mxu0  ;;  %v4070_v35 = vpop.f32.mrf.mxu1 }
 0x2cf   : > { %v4078_v20 = vadd.f32 %v4070_v35, %v3581_v0  ;;  %v4076_v58 = vadd.f32 %v4029_v34, %v3579_v30 }
 0x2d0   : > { %v4031_v36 = vpop.f32.mrf.mxu0  ;;  %v4072_v37 = vpop.f32.mrf.mxu1 }
 0x2d2   : > { %v4032_v12 = vpop.f32.mrf.mxu0  ;;  %v4073_v39 = vpop.f32.mrf.mxu1 }
 0x30c   : > { %v4508_v26 = vpop.f32.mrf.mxu0  ;;  %v4549_v47 = vpop.f32.mrf.mxu1 }
 0x30d   : > { %v4556_v59 = vadd.f32 %v4508_v26, %v4075_v33  ;;  %v4558_v60 = vadd.f32 %v4549_v47, %v4077_v9 }
 0x30e   : > { %v4510_v18 = vpop.f32.mrf.mxu0  ;;  %v4551_v63 = vpop.f32.mrf.mxu1 }
 0x30f   : > { %v8707_v2 = vadd.f32 %v4565_v55, %v4556_v59  ;;  %v8709_v5 = vadd.f32 %v4573_v56, %v4558_v60  ;;  %v4557_v6 = vadd.f32 %v4510_v18, %v4076_v58  ;;  %v4559_v7 = vadd.f32 %v4551_v63, %v4078_v20 }
 0x310   : > { %v4512_v17 = vpop.f32.mrf.mxu0  ;;  %v4553_v38 = vpop.f32.mrf.mxu1 }
 0x311   : > { %v8711_v10 = vadd.f32 %v4569_v57, %v4557_v6  ;;  %v8713_v50 = vadd.f32 %v4577_v61, %v4559_v7  ;;  %v4592_v11 = vmul.f32 %v4590_v62, %v8707_v2  ;;  %v4594_v13 = vmul.f32 %v4590_v62, %v8709_v5 }
 0x312   : > { %v4513_v45 = vpop.f32.mrf.mxu0  ;;  %v4554_v49 = vpop.f32.mrf.mxu1 }
 0x313   : > { %v4593_v48 = vmul.f32 %v4590_v62, %v8711_v10  ;;  %v4595_v53 = vmul.f32 %v4590_v62, %v8713_v50  ;;  %v4596_v51 = vrot.slane %v4592_v11, 4  ;;  %v4608_v14 = vrot.slane %v4594_v13, 4 }
 0x314   : > { %v4624_v15 = vmul.f32 %v4592_v11, %v8707_v2  ;;  %v4626_v16 = vmul.f32 %v4594_v13, %v8709_v5 }
 0x315   : > { %v4597_v19 = vadd.f32 %v4596_v51, %v4592_v11  ;;  %v4602_v23 = vrot.slane %v4593_v48, 4  ;;  %v4609_v46 = vadd.f32 %v4608_v14, %v4594_v13  ;;  %v4614_v24 = vrot.slane %v4595_v53, 4 }
 0x316   : > { %v4625_v25 = vmul.f32 %v4593_v48, %v8711_v10  ;;  %v4627_v3 = vmul.f32 %v4595_v53, %v8713_v50  ;;  %v4628_v4 = vrot.slane %v4624_v15, 4  ;;  %v4640_v27 = vrot.slane %v4626_v16, 4 }
 0x317   : > { %v4598_v28 = vrot.slane %v4597_v19, 2  ;;  %v4603_v29 = vadd.f32 %v4602_v23, %v4593_v48  ;;  %v4610_v30 = vrot.slane %v4609_v46, 2  ;;  %v4615_v0 = vadd.f32 %v4614_v24, %v4595_v53 }
 0x318   : > { %v4629_v31 = vadd.f32 %v4628_v4, %v4624_v15  ;;  %v4634_v1 = vrot.slane %v4625_v25, 4  ;;  %v4641_v40 = vadd.f32 %v4640_v27, %v4626_v16  ;;  %v4646_v41 = vrot.slane %v4627_v3, 4 }
 0x319   : > { %v4599_v32 = vadd.f32 %v4598_v28, %v4597_v19  ;;  %v4604_v8 = vrot.slane %v4603_v29, 2  ;;  %v4611_v33 = vadd.f32 %v4610_v30, %v4609_v46  ;;  %v4616_v9 = vrot.slane %v4615_v0, 2 }
 0x31a   : > { %v4630_v34 = vrot.slane %v4629_v31, 2  ;;  %v4635_v35 = vadd.f32 %v4634_v1, %v4625_v25  ;;  %v4642_v20 = vrot.slane %v4641_v40, 2  ;;  %v4647_v36 = vadd.f32 %v4646_v41, %v4627_v3 }
 0x31b   : > { %v4600_v37 = vrot.slane %v4599_v32, 1  ;;  %v4605_v12 = vadd.f32 %v4604_v8, %v4603_v29  ;;  %v4612_v39 = vrot.slane %v4611_v33, 1  ;;  %v4617_v42 = vadd.f32 %v4616_v9, %v4615_v0 }
 0x31c   : > { %v4631_v43 = vadd.f32 %v4630_v34, %v4629_v31  ;;  %v4636_v44 = vrot.slane %v4635_v35, 2  ;;  %v4643_v21 = vadd.f32 %v4642_v20, %v4641_v40  ;;  %v4648_v22 = vrot.slane %v4647_v36, 2 }
 0x31d   : > { %v4601_v52 = vadd.f32 %v4600_v37, %v4599_v32  ;;  %v4606_v54 = vrot.slane %v4605_v12, 1  ;;  %v4613_v55 = vadd.f32 %v4612_v39, %v4611_v33  ;;  %v4618_v56 = vrot.slane %v4617_v42, 1 }
 0x31e   : > { %v4632_v26 = vrot.slane %v4631_v43, 1  ;;  %v4637_v47 = vadd.f32 %v4636_v44, %v4635_v35  ;;  %v4644_v57 = vrot.slane %v4643_v21, 1  ;;  %v4649_v58 = vadd.f32 %v4648_v22, %v4647_v36 }
 0x31f   : > { %v4607_v59 = vadd.f32 %v4606_v54, %v4605_v12  ;;  %v4619_v60 = vadd.f32 %v4618_v56, %v4617_v42  ;;  %v4620_v61 = vmul.f32 0.25, %v4601_v52  ;;  %v4622_v62 = vmul.f32 0.25, %v4613_v55 }
 0x320   : > { %v4633_v18 = vadd.f32 %v4632_v26, %v4631_v43  ;;  %v4638_v63 = vrot.slane %v4637_v47, 1  ;;  %v4645_v6 = vadd.f32 %v4644_v57, %v4643_v21  ;;  %v4650_v7 = vrot.slane %v4649_v58, 1 }
 0x321   : > { %v4621_v17 = vmul.f32 0.25, %v4607_v59  ;;  %v4623_v38 = vmul.f32 0.25, %v4619_v60  ;;  %v4656_v11 = vmul.f32 %v4620_v61, %v4620_v61  ;;  %v4658_v13 = vmul.f32 %v4622_v62, %v4622_v62 }
 0x322   : > { %v4639_v45 = vadd.f32 %v4638_v63, %v4637_v47  ;;  %v4651_v49 = vadd.f32 %v4650_v7, %v4649_v58  ;;  %v4652_v48 = vmul.f32 0.25, %v4633_v18  ;;  %v4654_v53 = vmul.f32 0.25, %v4645_v6 }
 0x323   : > { %v4657_v51 = vmul.f32 %v4621_v17, %v4621_v17  ;;  %v4659_v14 = vmul.f32 %v4623_v38, %v4623_v38  ;;  %v4668_v31 = vsub.f32 %v8707_v2, %v4620_v61  ;;  %v4670_v40 = vsub.f32 %v8709_v5, %v4622_v62 }
 0x324   : > { %v4653_v15 = vmul.f32 0.25, %v4639_v45  ;;  %v4655_v16 = vmul.f32 0.25, %v4651_v49  ;;  %v4660_v19 = vsub.f32 %v4652_v48, %v4656_v11  ;;  %v4662_v23 = vsub.f32 %v4654_v53, %v4658_v13 }
 0x325   : > { %v4669_v32 = vsub.f32 %v8711_v10, %v4621_v17  ;;  %v4671_v9 = vsub.f32 %v8713_v50, %v4623_v38 }
 0x326   : > { %v4661_v46 = vsub.f32 %v4653_v15, %v4657_v51  ;;  %v4663_v24 = vsub.f32 %v4655_v16, %v4659_v14  ;;  %v4664_v25 = vmax.f32 %v4660_v19, 0.0  ;;  %v4666_v3 = vmax.f32 %v4662_v23, 0.0 }
 0x328   : > { %v4665_v4 = vmax.f32 %v4661_v46, 0.0  ;;  %v4667_v27 = vmax.f32 %v4663_v24, 0.0  ;;  %v4672_v28 = vadd.f32 1e-05, %v4664_v25  ;;  %v4674_v29 = vadd.f32 1e-05, %v4666_v3 }
 0x32a   : > { %v4673_v30 = vadd.f32 1e-05, %v4665_v4  ;;  %v4675_v0 = vadd.f32 1e-05, %v4667_v27  ;;  %6783 = vrsqrt.f32 %v4672_v28 }
 0x32b   : > { %6785 = vrsqrt.f32 %v4674_v29 }
 0x32c   : > { %6787 = vrsqrt.f32 %v4673_v30 }
 0x32d   : > { %6789 = vrsqrt.f32 %v4675_v0 }
 0x337   : > { %v6784_v1 = vpop.eup %6783 }
 0x338   : > { %v6786_v41 = vpop.eup %6785  ;;  %v4680_v8 = vmul.f32 %v6784_v1, %v4668_v31 }
 0x339   : > { %v6788_v33 = vpop.eup %6787  ;;  %v4682_v34 = vmul.f32 %v6786_v41, %v4670_v40 }
 0x33a   : > { %v6790_v35 = vpop.eup %6789  ;;  %v4681_v20 = vmul.f32 %v6788_v33, %v4669_v32  ;;  %v4688_v36 = vmul.f32 0.2, %v4680_v8  ;;  %vm4684_vm0 = vcmp.gt.f32.partialorder %v4680_v8, 0.0 }
 0x33b   : > { %v4683_v37 = vmul.f32 %v6790_v35, %v4671_v9  ;;  %v4690_v12 = vmul.f32 0.2, %v4682_v34  ;;  %vm4686_vm2 = vcmp.gt.f32.partialorder %v4682_v34, 0.0 }
 0x33c   : > { %vm4685_vm1 = vcmp.gt.f32.partialorder %v4681_v20, 0.0  ;;  %v4689_v2 = vmul.f32 0.2, %v4681_v20  ;;  %v4692_v10 = vsel %vm4684_vm0, %v4680_v8, %v4688_v36 }
 0x33d   : > { %vm4687_vm3 = vcmp.gt.f32.partialorder %v4683_v37, 0.0  ;;  %v4691_v5 = vmul.f32 0.2, %v4683_v37  ;;  %v4694_v50 = vsel %vm4686_vm2, %v4682_v34, %v4690_v12 }
 0x33e   : > { %v4693_v39 = vsel %vm4685_vm1, %v4681_v20, %v4689_v2 }
 0x33f   : > { %v4695_v42 = vsel %vm4687_vm3, %v4683_v37, %v4691_v5  ;;  %v5888_v43 = vpack.c.bf16 %v4693_v39, %v4692_v10 }
 0x340   : > { %v5889_v44 = vpack.c.bf16 %v4695_v42, %v4694_v50 }
 0x341   : > { %4712 = vst [vmem:[%s197_s20] sm:$0xff] %v5888_v43 }
 0x342   : > { %4713 = vst [vmem:[%s197_s20 + $0x8] sm:$0xff] %v5889_v44 }
 0x343 PF: > { %s14_s15 = sadd.s32 1, %s6799_s15  }
 0x344   : > { %p11_p4 = scmp.ge.s32.totalorder %s14_s15, 4  }
 0x346   :  { %13 = sbr.rel (!%p11_p4) target bundleno = 1 (0x1), region = 74 }

</bundles_post_ra>
